<compile_context>
chip_gen: v7x
topology: tpu7x:2x2x1
jax: 0.10.0
libtpu: 0.0.40
codegen_flags: <defaults>
</compile_context>

<pallas_src>
import jax
import jax.numpy as jnp
from jax.experimental import pallas as pl
from jax.experimental.pallas import tpu as pltpu

EPS = 1e-5
GROWTH = 8                 # growth_rate (k)
BLOCK_CONFIG = (2, 2, 2, 2)
NUM_INIT = 16              # num_init_features
BN_SIZE = 2
NUM_CLASSES = 14

_MM_VMEM_LIMIT = 32 * 1024 * 1024   # modest explicit budget; fits v5e/v6e/v7x


# ------------------------------ small helpers ------------------------------
def _round_up(x, m):
    return ((x + m - 1) // m) * m


def _choose_row_tile(m, cap):
    """Pad rows to a 16 multiple (bf16-safe) and pick a row tile <= cap."""
    mp = _round_up(m, 16)
    if mp <= cap:
        return mp, mp
    return _round_up(mp, cap), cap


# ------------------- Kernel 1: BN batch stats -> scale/shift ----------------
def _make_bn_stats_kernel(m_true):
    inv_m = 1.0 / float(m_true)

    def kernel(x_ref, g_ref, b_ref, scale_ref, shift_ref, s_acc, q_acc):
        i = pl.program_id(0)

        @pl.when(i == 0)
        def _():
            s_acc[...] = jnp.zeros_like(s_acc)
            q_acc[...] = jnp.zeros_like(q_acc)

        x = x_ref[...]
        s_acc[...] += jnp.sum(x, axis=0, keepdims=True)
        q_acc[...] += jnp.sum(x * x, axis=0, keepdims=True)

        @pl.when(i == pl.num_programs(0) - 1)
        def _():
            mean = s_acc[...] * inv_m
            # clamp: E[x^2] - mean^2 can go slightly negative (cancellation)
            var = jnp.maximum(q_acc[...] * inv_m - mean * mean, 0.0)
            scale = g_ref[...] * jax.lax.rsqrt(var + EPS)
            scale_ref[...] = scale
            shift_ref[...] = b_ref[...] - mean * scale

    return kernel


def bn_scale_shift(x_mat, gamma, beta):
    """x_mat: (M, C) f32 -> per-channel (scale, shift), each (1, C) f32."""
    M, C = x_mat.shape
    Mp, tm = _choose_row_tile(M, cap=512)
    Cp = _round_up(C, 128)
    xp = jnp.pad(x_mat.astype(jnp.float32), ((0, Mp - M), (0, Cp - C)))
    g = jnp.pad(gamma.reshape(1, C).astype(jnp.float32), ((0, 0), (0, Cp - C)))
    b = jnp.pad(beta.reshape(1, C).astype(jnp.float32), ((0, 0), (0, Cp - C)))
    scale, shift = pl.pallas_call(
        _make_bn_stats_kernel(M),
        out_shape=(jax.ShapeDtypeStruct((1, Cp), jnp.float32),
                   jax.ShapeDtypeStruct((1, Cp), jnp.float32)),
        grid_spec=pltpu.PrefetchScalarGridSpec(
            num_scalar_prefetch=0,
            grid=(Mp // tm,),
            in_specs=[pl.BlockSpec((tm, Cp), lambda i: (i, 0)),
                      pl.BlockSpec((1, Cp), lambda i: (0, 0)),
                      pl.BlockSpec((1, Cp), lambda i: (0, 0))],
            out_specs=[pl.BlockSpec((1, Cp), lambda i: (0, 0)),
                       pl.BlockSpec((1, Cp), lambda i: (0, 0))],
            scratch_shapes=[pltpu.VMEM((1, Cp), jnp.float32),
                            pltpu.VMEM((1, Cp), jnp.float32)]),
        compiler_params=pltpu.CompilerParams(
            dimension_semantics=("arbitrary",)),
    )(xp, g, b)
    return scale[:, :C], shift[:, :C]


# ------------------ Kernel 2: standalone BN+ReLU apply (row-tiled) ---------
def _bn_apply_kernel(x_ref, s_ref, h_ref, o_ref):
    o_ref[...] = jnp.maximum(x_ref[...] * s_ref[...] + h_ref[...], 0.0)


def bn_relu_apply(x_mat, scale, shift):
    """relu(x * scale + shift), x_mat: (M, C) f32."""
    M, C = x_mat.shape
    Mp, tm = _choose_row_tile(M, cap=512)
    Cp = _round_up(C, 128)
    xp = jnp.pad(x_mat.astype(jnp.float32), ((0, Mp - M), (0, Cp - C)))
    s = jnp.pad(scale.astype(jnp.float32), ((0, 0), (0, Cp - C)))
    h = jnp.pad(shift.astype(jnp.float32), ((0, 0), (0, Cp - C)))
    out = pl.pallas_call(
        _bn_apply_kernel,
        out_shape=jax.ShapeDtypeStruct((Mp, Cp), jnp.float32),
        grid_spec=pltpu.PrefetchScalarGridSpec(
            num_scalar_prefetch=0,
            grid=(Mp // tm,),
            in_specs=[pl.BlockSpec((tm, Cp), lambda i: (i, 0)),
                      pl.BlockSpec((1, Cp), lambda i: (0, 0)),
                      pl.BlockSpec((1, Cp), lambda i: (0, 0))],
            out_specs=pl.BlockSpec((tm, Cp), lambda i: (i, 0))),
        compiler_params=pltpu.CompilerParams(
            dimension_semantics=("parallel",)),
    )(xp, s, h)
    return out[:M, :C]


# --------- Kernel 3: tiled MXU matmul, optional fused BN+ReLU prologue ------
def _make_mm_kernel(has_bn, multi_k):
    def compute(a_ref, b_ref, o_ref, acc_ref, prologue):
        a = a_ref[...]
        if prologue is not None:
            a = prologue(a)                 # f32 elementwise (VPU)
        part = jnp.dot(a.astype(jnp.bfloat16), b_ref[...],
                       preferred_element_type=jnp.float32)
        if multi_k:
            @pl.when(pl.program_id(2) == 0)
            def _():
                acc_ref[...] = jnp.zeros_like(acc_ref)

            acc_ref[...] += part

            @pl.when(pl.program_id(2) == pl.num_programs(2) - 1)
            def _():
                o_ref[...] = acc_ref[...]
        else:
            o_ref[...] = part               # single K step: no scratch round-trip

    if has_bn:
        if multi_k:
            def kernel(a_ref, s_ref, h_ref, b_ref, o_ref, acc_ref):
                pro = lambda a: jnp.maximum(a * s_ref[...] + h_ref[...], 0.0)
                compute(a_ref, b_ref, o_ref, acc_ref, pro)
        else:
            def kernel(a_ref, s_ref, h_ref, b_ref, o_ref):
                pro = lambda a: jnp.maximum(a * s_ref[...] + h_ref[...], 0.0)
                compute(a_ref, b_ref, o_ref, None, pro)
    else:
        if multi_k:
            def kernel(a_ref, b_ref, o_ref, acc_ref):
                compute(a_ref, b_ref, o_ref, acc_ref, None)
        else:
            def kernel(a_ref, b_ref, o_ref):
                compute(a_ref, b_ref, o_ref, None, None)
    return kernel


def fused_matmul(a, b, scale=None, shift=None):
    """(M,K) @ (K,N) -> (M,N) f32.  If scale/shift given ((1,K) each), the A
    tile is transformed with relu(a*scale+shift) before hitting the MXU."""
    M, K = a.shape
    K2, N = b.shape
    assert K == K2
    has_bn = scale is not None

    Kp = _round_up(K, 128)
    tk = 256 if Kp % 256 == 0 else 128
    Np = _round_up(N, 128)
    tn = 256 if Np % 256 == 0 else 128
    Mp, tm = _choose_row_tile(M, cap=256)
    nk = Kp // tk
    multi_k = nk > 1

    a_p = jnp.pad(a, ((0, Mp - M), (0, Kp - K)))
    b_p = jnp.pad(b.astype(jnp.bfloat16), ((0, Kp - K), (0, Np - N)))

    in_arrays = [a_p]
    in_specs = [pl.BlockSpec((tm, tk), lambda i, j, k: (i, k))]
    if has_bn:
        s_p = jnp.pad(scale.astype(jnp.float32), ((0, 0), (0, Kp - K)))
        h_p = jnp.pad(shift.astype(jnp.float32), ((0, 0), (0, Kp - K)))
        in_arrays += [s_p, h_p]
        in_specs += [pl.BlockSpec((1, tk), lambda i, j, k: (0, k)),
                     pl.BlockSpec((1, tk), lambda i, j, k: (0, k))]
    in_arrays.append(b_p)
    in_specs.append(pl.BlockSpec((tk, tn), lambda i, j, k: (k, j)))

    scratch = [pltpu.VMEM((tm, tn), jnp.float32)] if multi_k else []

    out = pl.pallas_call(
        _make_mm_kernel(has_bn, multi_k),
        out_shape=jax.ShapeDtypeStruct((Mp, Np), jnp.float32),
        grid_spec=pltpu.PrefetchScalarGridSpec(
            num_scalar_prefetch=0,
            grid=(Mp // tm, Np // tn, nk),
            in_specs=in_specs,
            out_specs=pl.BlockSpec((tm, tn), lambda i, j, k: (i, j)),
            scratch_shapes=scratch),
        compiler_params=pltpu.CompilerParams(
            dimension_semantics=("parallel", "parallel", "arbitrary"),
            vmem_limit_bytes=_MM_VMEM_LIMIT),
    )(*in_arrays)
    return out[:M, :N]


# ------- Kernel 4: fused head: BN+ReLU -> global avg pool -> linear ---------
def _make_head_kernel(hw):
    inv = 1.0 / float(hw)

    def kernel(x_ref, s_ref, h_ref, w_ref, b_ref, o_ref):
        x = x_ref[...]                                      # (Np, HWp, Cp) f32
        y = jnp.maximum(x * s_ref[...] + h_ref[...], 0.0)
        hw_idx = jax.lax.broadcasted_iota(jnp.int32, y.shape, 1)
        y = jnp.where(hw_idx < hw, y, 0.0)                  # mask padded HW rows
        feat = jnp.sum(y, axis=1) * inv                     # (Np, Cp)
        o_ref[...] = (jnp.dot(feat.astype(jnp.bfloat16), w_ref[...],
                              preferred_element_type=jnp.float32)
                      + b_ref[...])

    return kernel


def classifier_head(x_nhwc, gamma, beta, fc_w, fc_b):
    N, H, W, C = x_nhwc.shape
    HW = H * W
    scale, shift = bn_scale_shift(x_nhwc.reshape(N * HW, C), gamma, beta)

    Np8 = _round_up(N, 8)
    HWp = _round_up(HW, 8)
    Cp = _round_up(C, 128)
    NC = fc_w.shape[0]
    NCp = _round_up(NC, 128)

    x3 = jnp.pad(x_nhwc.reshape(N, HW, C).astype(jnp.float32),
                 ((0, Np8 - N), (0, HWp - HW), (0, Cp - C)))
    s = jnp.pad(scale, ((0, 0), (0, Cp - C)))
    h = jnp.pad(shift, ((0, 0), (0, Cp - C)))
    w = jnp.pad(fc_w.T.astype(jnp.bfloat16), ((0, Cp - C), (0, NCp - NC)))
    b = jnp.pad(fc_b.reshape(1, NC).astype(jnp.float32),
                ((0, 0), (0, NCp - NC)))

    out = pl.pallas_call(
        _make_head_kernel(HW),
        out_shape=jax.ShapeDtypeStruct((Np8, NCp), jnp.float32),
    )(x3, s, h, w, b)
    return out[:N, :NC]


# ---------------------------- conv = im2col + MXU ---------------------------
def conv2d_im2col(x, w, stride, pad):
    """x: NHWC f32; w: torch layout (Cout, Cin, kh, kw); no bias."""
    N, H, W, Cin = x.shape
    Cout, _, kh, kw = w.shape
    xp = jnp.pad(x, ((0, 0), (pad, pad), (pad, pad), (0, 0)))
    Ho = (H + 2 * pad - kh) // stride + 1
    Wo = (W + 2 * pad - kw) // stride + 1
    cols = [xp[:, i:i + stride * (Ho - 1) + 1:stride,
               j:j + stride * (Wo - 1) + 1:stride, :]
            for i in range(kh) for j in range(kw)]
    patches = jnp.stack(cols, axis=3).reshape(
        N * Ho * Wo, kh * kw * Cin).astype(jnp.bfloat16)          # bf16 patches
    w_mat = jnp.transpose(w, (2, 3, 1, 0)).reshape(
        kh * kw * Cin, Cout).astype(jnp.bfloat16)
    y = fused_matmul(patches, w_mat)
    return y.reshape(N, Ho, Wo, Cout)


# ------------------------------ pooling (XLA-fused) -------------------------
def maxpool_3x3_s2_p1(x):
    # pairwise-max tree over 9 strided views: no 9x stacked materialization.
    N, H, W, C = x.shape
    xp = jnp.pad(x, ((0, 0), (1, 1), (1, 1), (0, 0)),
                 constant_values=-jnp.inf)
    Ho = (H + 2 - 3) // 2 + 1
    Wo = (W + 2 - 3) // 2 + 1
    out = None
    for i in range(3):
        for j in range(3):
            v = xp[:, i:i + 2 * (Ho - 1) + 1:2, j:j + 2 * (Wo - 1) + 1:2, :]
            out = v if out is None else jnp.maximum(out, v)
    return out


def avgpool_2x2_s2(x):
    N, H, W, C = x.shape
    Ho, Wo = H // 2, W // 2
    return x.reshape(N, Ho, 2, Wo, 2, C).mean(axis=(2, 4))


# -------------------------------- parameters -------------------------------
def init_params(key):
    params = {}

    def conv_w(k, cout, cin, kh, kw):
        std = (2.0 / (cin * kh * kw)) ** 0.5     # kaiming_normal_
        return jax.random.normal(k, (cout, cin, kh, kw), jnp.float32) * std

    keys = iter(jax.random.split(key, 64))
    params["conv0_w"] = conv_w(next(keys), NUM_INIT, 3, 7, 7)
    params["norm0_g"] = jnp.ones((NUM_INIT,), jnp.float32)
    params["norm0_b"] = jnp.zeros((NUM_INIT,), jnp.float32)

    nf = NUM_INIT
    for bi, nl in enumerate(BLOCK_CONFIG):
        for li in range(nl):
            cin = nf + li * GROWTH
            bneck = BN_SIZE * GROWTH
            params[f"block{bi}_layer{li}"] = {
                "norm1_g": jnp.ones((cin,), jnp.float32),
                "norm1_b": jnp.zeros((cin,), jnp.float32),
                "conv1_w": conv_w(next(keys), bneck, cin, 1, 1),
                "norm2_g": jnp.ones((bneck,), jnp.float32),
                "norm2_b": jnp.zeros((bneck,), jnp.float32),
                "conv2_w": conv_w(next(keys), GROWTH, bneck, 3, 3),
            }
        nf += nl * GROWTH
        if bi != len(BLOCK_CONFIG) - 1:
            params[f"trans{bi}"] = {
                "norm_g": jnp.ones((nf,), jnp.float32),
                "norm_b": jnp.zeros((nf,), jnp.float32),
                "conv_w": conv_w(next(keys), nf // 2, nf, 1, 1),
            }
            nf //= 2

    params["norm5_g"] = jnp.ones((nf,), jnp.float32)
    params["norm5_b"] = jnp.zeros((nf,), jnp.float32)
    params["fc_w"] = jax.random.normal(next(keys), (NUM_CLASSES, nf),
                                       jnp.float32) * (1.0 / nf ** 0.5)
    params["fc_b"] = jnp.zeros((NUM_CLASSES,), jnp.float32)   # init constant 0
    return params


# ---------------------------------- forward --------------------------------
def _dense_layer(slab, cin, p):
    """One _DenseLayer on the first `cin` channels of the slab."""
    N, H, W, _ = slab.shape
    M = N * H * W
    xin = slab[..., :cin].reshape(M, cin)

    # norm1 + relu1 + conv1 (1x1): BN+ReLU fused into the matmul prologue.
    s1, h1 = bn_scale_shift(xin, p["norm1_g"], p["norm1_b"])
    w1 = p["conv1_w"].reshape(p["conv1_w"].shape[0], cin).T   # (cin, bneck)
    bneck = w1.shape[1]
    y = fused_matmul(xin, w1, s1, h1)                          # (M, bneck)

    # norm2 + relu2 (must precede zero-padding of conv2), then conv2 (3x3).
    s2, h2 = bn_scale_shift(y, p["norm2_g"], p["norm2_b"])
    y = bn_relu_apply(y, s2, h2).reshape(N, H, W, bneck)
    return conv2d_im2col(y, p["conv2_w"], stride=1, pad=1)     # (N,H,W,GROWTH)


def densenet_forward(params, x_nchw):
    x = jnp.transpose(x_nchw, (0, 2, 3, 1)).astype(jnp.float32)   # NCHW -> NHWC

    # stem: conv0 -> norm0 -> relu0 -> pool0
    x = conv2d_im2col(x, params["conv0_w"], stride=2, pad=3)
    N, H, W, C = x.shape
    s0, h0 = bn_scale_shift(x.reshape(N * H * W, C),
                            params["norm0_g"], params["norm0_b"])
    x = bn_relu_apply(x.reshape(N * H * W, C), s0, h0).reshape(N, H, W, C)
    x = maxpool_3x3_s2_p1(x)

    # dense blocks (+ transitions); preallocated channel slab per block
    nf = NUM_INIT
    for bi, num_layers in enumerate(BLOCK_CONFIG):
        N, H, W, _ = x.shape
        slab = jnp.concatenate(
            [x, jnp.zeros((N, H, W, num_layers * GROWTH), jnp.float32)],
            axis=-1)
        for li in range(num_layers):
            cin = nf + li * GROWTH
            hnew = _dense_layer(slab, cin, params[f"block{bi}_layer{li}"])
            slab = slab.at[..., cin:cin + GROWTH].set(hnew)
        x = slab
        nf += num_layers * GROWTH

        if bi != len(BLOCK_CONFIG) - 1:
            t = params[f"trans{bi}"]
            N, H, W, _ = x.shape
            xin = x.reshape(N * H * W, nf)
            st, ht = bn_scale_shift(xin, t["norm_g"], t["norm_b"])
            wt = t["conv_w"].reshape(nf // 2, nf).T            # (nf, nf//2)
            y = fused_matmul(xin, wt, st, ht).reshape(N, H, W, nf // 2)
            x = avgpool_2x2_s2(y)
            nf //= 2

    # head: norm5 + relu + adaptive avg pool (1,1) + flatten + linear (fused)
    return classifier_head(x, params["norm5_g"], params["norm5_b"],
                           params["fc_w"], params["fc_b"])


if __name__ == "__main__":
    key = jax.random.PRNGKey(0)
    pkey, xkey = jax.random.split(key)
    params = init_params(pkey)
    x = jax.random.normal(xkey, (2, 3, 32, 32), jnp.float32)   # NCHW like torch

    fwd = jax.jit(densenet_forward)
    out = jax.block_until_ready(fwd(params, x))

    assert out.shape == (2, NUM_CLASSES), out.shape
    assert bool(jnp.all(jnp.isfinite(out)))
    print("KERNEL_OK")
</pallas_src>

<mosaic_0001>
module attributes {stable_mosaic.version = 11 : i64} {
  func.func @kernel(%arg0: i32, %arg1: i32, %arg2: i32, %arg3: memref<256x256xbf16, #tpu.memory_space<vmem>>, %arg4: memref<256x128xbf16, #tpu.memory_space<vmem>>, %arg5: memref<256x128xf32, #tpu.memory_space<vmem>>) attributes {dimension_semantics = [#tpu.dimension_semantics<parallel>, #tpu.dimension_semantics<parallel>, #tpu.dimension_semantics<arbitrary>], iteration_bounds = array<i64: 2, 1, 1>, scalar_prefetch = 0 : i64, scratch_operands = 0 : i64, tpu.core_type = #tpu.core_type<tc>, window_params = [{transform_indices = @transform_0, window_bounds = array<i64: 256, 256>}, {transform_indices = @transform_1, window_bounds = array<i64: 256, 128>}, {transform_indices = @transform_2, window_bounds = array<i64: 256, 128>}]} {
    %c0 = arith.constant 0 : index
    %c0_0 = arith.constant 0 : index
    %0 = vector.load %arg3[%c0, %c0_0] : memref<256x256xbf16, #tpu.memory_space<vmem>>, vector<256x256xbf16>
    %c0_1 = arith.constant 0 : index
    %c0_2 = arith.constant 0 : index
    %1 = vector.load %arg4[%c0_1, %c0_2] : memref<256x128xbf16, #tpu.memory_space<vmem>>, vector<256x128xbf16>
    %cst = arith.constant dense<0.000000e+00> : vector<256x128xf32>
    %2 = tpu.matmul %0, %1, %cst {dimension_numbers = #tpu.dot_dimension_numbers<[1], [0], [0], [1], [0, 0, 1, 1], [], []>} : vector<256x256xbf16>, vector<256x128xbf16>, vector<256x128xf32> -> vector<256x128xf32>
    %c0_3 = arith.constant 0 : index
    %c0_4 = arith.constant 0 : index
    %3 = vector.load %arg5[%c0_3, %c0_4] : memref<256x128xf32, #tpu.memory_space<vmem>>, vector<256x128xf32>
    tpu.vector_store %arg5[%c0_3, %c0_4], %2 {strides = array<i32>} : memref<256x128xf32, #tpu.memory_space<vmem>>, vector<256x128xf32>,
    return
  }
  func.func @transform_0(%arg0: i32, %arg1: i32, %arg2: i32) -> (i32, i32) {
    %c0_i32 = arith.constant 0 : i32
    return %arg0, %arg2 : i32, i32
  }
  func.func @transform_1(%arg0: i32, %arg1: i32, %arg2: i32) -> (i32, i32) {
    %c0_i32 = arith.constant 0 : i32
    return %arg2, %arg1 : i32, i32
  }
  func.func @transform_2(%arg0: i32, %arg1: i32, %arg2: i32) -> (i32, i32) {
    %c0_i32 = arith.constant 0 : i32
    return %arg0, %arg1 : i32, i32
  }
}

module attributes {stable_mosaic.version = 11 : i64} {
  func.func @kernel(%arg0: i32, %arg1: memref<512x128xf32, #tpu.memory_space<vmem>>, %arg2: memref<1x128xf32, #tpu.memory_space<vmem>>, %arg3: memref<1x128xf32, #tpu.memory_space<vmem>>, %arg4: memref<1x128xf32, #tpu.memory_space<vmem>>, %arg5: memref<1x128xf32, #tpu.memory_space<vmem>>, %arg6: memref<1x128xf32, #tpu.memory_space<vmem>>, %arg7: memref<1x128xf32, #tpu.memory_space<vmem>>) attributes {dimension_semantics = [#tpu.dimension_semantics<arbitrary>], iteration_bounds = array<i64: 1>, scalar_prefetch = 0 : i64, scratch_operands = 2 : i64, tpu.core_type = #tpu.core_type<tc>, window_params = [{transform_indices = @transform_0, window_bounds = array<i64: 512, 128>}, {pipeline_mode = #tpu.pipeline_mode<synchronous>, transform_indices = @transform_1, window_bounds = array<i64: 1, 128>}, {pipeline_mode = #tpu.pipeline_mode<synchronous>, transform_indices = @transform_2, window_bounds = array<i64: 1, 128>}, {pipeline_mode = #tpu.pipeline_mode<synchronous>, transform_indices = @transform_3, window_bounds = array<i64: 1, 128>}, {pipeline_mode = #tpu.pipeline_mode<synchronous>, transform_indices = @transform_4, window_bounds = array<i64: 1, 128>}]} {
    %c0_i32 = arith.constant 0 : i32
    %0 = arith.cmpi eq, %arg0, %c0_i32 : i32
    %1 = arith.extui %0 : i1 to i32
    %c0_i32_0 = arith.constant 0 : i32
    %2 = arith.cmpi ne, %1, %c0_i32_0 : i32
    scf.if %2 {
      %cst_13 = arith.constant 0.000000e+00 : f32
      %18 = vector.broadcast %cst_13 : f32 to vector<1x128xf32>
      %c0_14 = arith.constant 0 : index
      %c0_15 = arith.constant 0 : index
      %19 = vector.load %arg6[%c0_14, %c0_15] : memref<1x128xf32, #tpu.memory_space<vmem>>, vector<1x128xf32>
      tpu.vector_store %arg6[%c0_14, %c0_15], %18 {strides = array<i32>} : memref<1x128xf32, #tpu.memory_space<vmem>>, vector<1x128xf32>,
      %cst_16 = arith.constant 0.000000e+00 : f32
      %20 = vector.broadcast %cst_16 : f32 to vector<1x128xf32>
      %c0_17 = arith.constant 0 : index
      %c0_18 = arith.constant 0 : index
      %21 = vector.load %arg7[%c0_17, %c0_18] : memref<1x128xf32, #tpu.memory_space<vmem>>, vector<1x128xf32>
      tpu.vector_store %arg7[%c0_17, %c0_18], %20 {strides = array<i32>} : memref<1x128xf32, #tpu.memory_space<vmem>>, vector<1x128xf32>,
    } else {
    }
    %c0 = arith.constant 0 : index
    %c0_1 = arith.constant 0 : index
    %3 = vector.load %arg1[%c0, %c0_1] : memref<512x128xf32, #tpu.memory_space<vmem>>, vector<512x128xf32>
    %c0_2 = arith.constant 0 : index
    %c0_3 = arith.constant 0 : index
    %4 = vector.load %arg6[%c0_2, %c0_3] : memref<1x128xf32, #tpu.memory_space<vmem>>, vector<1x128xf32>
    %cst = arith.constant dense<0.000000e+00> : vector<128xf32>
    %5 = vector.multi_reduction <add>, %3, %cst [0] : vector<512x128xf32> to vector<128xf32>
    %6 = vector.shape_cast %5 : vector<128xf32> to vector<1x128xf32>
    %7 = arith.addf %4, %6 : vector<1x128xf32>
    %c0_4 = arith.constant 0 : index
    %c0_5 = arith.constant 0 : index
    %8 = vector.load %arg6[%c0_4, %c0_5] : memref<1x128xf32, #tpu.memory_space<vmem>>, vector<1x128xf32>
    tpu.vector_store %arg6[%c0_4, %c0_5], %7 {strides = array<i32>} : memref<1x128xf32, #tpu.memory_space<vmem>>, vector<1x128xf32>,
    %c0_6 = arith.constant 0 : index
    %c0_7 = arith.constant 0 : index
    %9 = vector.load %arg7[%c0_6, %c0_7] : memref<1x128xf32, #tpu.memory_space<vmem>>, vector<1x128xf32>
    %10 = arith.mulf %3, %3 : vector<512x128xf32>
    %cst_8 = arith.constant dense<0.000000e+00> : vector<128xf32>
    %11 = vector.multi_reduction <add>, %10, %cst_8 [0] : vector<512x128xf32> to vector<128xf32>
    %12 = vector.shape_cast %11 : vector<128xf32> to vector<1x128xf32>
    %13 = arith.addf %9, %12 : vector<1x128xf32>
    %c0_9 = arith.constant 0 : index
    %c0_10 = arith.constant 0 : index
    %14 = vector.load %arg7[%c0_9, %c0_10] : memref<1x128xf32, #tpu.memory_space<vmem>>, vector<1x128xf32>
    tpu.vector_store %arg7[%c0_9, %c0_10], %13 {strides = array<i32>} : memref<1x128xf32, #tpu.memory_space<vmem>>, vector<1x128xf32>,
    %c0_i32_11 = arith.constant 0 : i32
    %15 = arith.cmpi eq, %arg0, %c0_i32_11 : i32
    %16 = arith.extui %15 : i1 to i32
    %c0_i32_12 = arith.constant 0 : i32
    %17 = arith.cmpi ne, %16, %c0_i32_12 : i32
    scf.if %17 {
      %c0_13 = arith.constant 0 : index
      %c0_14 = arith.constant 0 : index
      %18 = vector.load %arg6[%c0_13, %c0_14] : memref<1x128xf32, #tpu.memory_space<vmem>>, vector<1x128xf32>
      %cst_15 = arith.constant 0.001953125 : f32
      %19 = vector.broadcast %cst_15 : f32 to vector<1x128xf32>
      %20 = arith.mulf %18, %19 : vector<1x128xf32>
      %c0_16 = arith.constant 0 : index
      %c0_17 = arith.constant 0 : index
      %21 = vector.load %arg7[%c0_16, %c0_17] : memref<1x128xf32, #tpu.memory_space<vmem>>, vector<1x128xf32>
      %cst_18 = arith.constant 0.001953125 : f32
      %22 = vector.broadcast %cst_18 : f32 to vector<1x128xf32>
      %23 = arith.mulf %21, %22 : vector<1x128xf32>
      %24 = arith.mulf %20, %20 : vector<1x128xf32>
      %25 = arith.subf %23, %24 : vector<1x128xf32>
      %cst_19 = arith.constant 0.000000e+00 : f32
      %26 = vector.broadcast %cst_19 : f32 to vector<1x128xf32>
      %27 = arith.maximumf %25, %26 : vector<1x128xf32>
      %c0_20 = arith.constant 0 : index
      %c0_21 = arith.constant 0 : index
      %28 = vector.load %arg2[%c0_20, %c0_21] : memref<1x128xf32, #tpu.memory_space<vmem>>, vector<1x128xf32>
      %cst_22 = arith.constant 9.99999974E-6 : f32
      %29 = vector.broadcast %cst_22 : f32 to vector<1x128xf32>
      %30 = arith.addf %27, %29 : vector<1x128xf32>
      %31 = math.rsqrt %30 : vector<1x128xf32>
      %32 = arith.mulf %28, %31 : vector<1x128xf32>
      %c0_23 = arith.constant 0 : index
      %c0_24 = arith.constant 0 : index
      %33 = vector.load %arg4[%c0_23, %c0_24] : memref<1x128xf32, #tpu.memory_space<vmem>>, vector<1x128xf32>
      tpu.vector_store %arg4[%c0_23, %c0_24], %32 {strides = array<i32>} : memref<1x128xf32, #tpu.memory_space<vmem>>, vector<1x128xf32>,
      %c0_25 = arith.constant 0 : index
      %c0_26 = arith.constant 0 : index
      %34 = vector.load %arg3[%c0_25, %c0_26] : memref<1x128xf32, #tpu.memory_space<vmem>>, vector<1x128xf32>
      %35 = arith.mulf %20, %32 : vector<1x128xf32>
      %36 = arith.subf %34, %35 : vector<1x128xf32>
      %c0_27 = arith.constant 0 : index
      %c0_28 = arith.constant 0 : index
      %37 = vector.load %arg5[%c0_27, %c0_28] : memref<1x128xf32, #tpu.memory_space<vmem>>, vector<1x128xf32>
      tpu.vector_store %arg5[%c0_27, %c0_28], %36 {strides = array<i32>} : memref<1x128xf32, #tpu.memory_space<vmem>>, vector<1x128xf32>,
    } else {
    }
    return
  }
  func.func @transform_0(%arg0: i32) -> (i32, i32) {
    %c0_i32 = arith.constant 0 : i32
    %c0_i32_0 = arith.constant 0 : i32
    return %arg0, %c0_i32 : i32, i32
  }
  func.func @transform_1(%arg0: i32) -> (i32, i32) {
    %c0_i32 = arith.constant 0 : i32
    %c0_i32_0 = arith.constant 0 : i32
    %c0_i32_1 = arith.constant 0 : i32
    return %c0_i32, %c0_i32_0 : i32, i32
  }
  func.func @transform_2(%arg0: i32) -> (i32, i32) {
    %c0_i32 = arith.constant 0 : i32
    %c0_i32_0 = arith.constant 0 : i32
    %c0_i32_1 = arith.constant 0 : i32
    return %c0_i32, %c0_i32_0 : i32, i32
  }
  func.func @transform_3(%arg0: i32) -> (i32, i32) {
    %c0_i32 = arith.constant 0 : i32
    %c0_i32_0 = arith.constant 0 : i32
    %c0_i32_1 = arith.constant 0 : i32
    return %c0_i32, %c0_i32_0 : i32, i32
  }
  func.func @transform_4(%arg0: i32) -> (i32, i32) {
    %c0_i32 = arith.constant 0 : i32
    %c0_i32_0 = arith.constant 0 : i32
    %c0_i32_1 = arith.constant 0 : i32
    return %c0_i32, %c0_i32_0 : i32, i32
  }
}

module attributes {stable_mosaic.version = 11 : i64} {
  func.func @_bn_apply_kernel(%arg0: i32, %arg1: memref<512x128xf32, #tpu.memory_space<vmem>>, %arg2: memref<1x128xf32, #tpu.memory_space<vmem>>, %arg3: memref<1x128xf32, #tpu.memory_space<vmem>>, %arg4: memref<512x128xf32, #tpu.memory_space<vmem>>) attributes {dimension_semantics = [#tpu.dimension_semantics<parallel>], iteration_bounds = array<i64: 1>, scalar_prefetch = 0 : i64, scratch_operands = 0 : i64, tpu.core_type = #tpu.core_type<tc>, window_params = [{transform_indices = @transform_0, window_bounds = array<i64: 512, 128>}, {pipeline_mode = #tpu.pipeline_mode<synchronous>, transform_indices = @transform_1, window_bounds = array<i64: 1, 128>}, {pipeline_mode = #tpu.pipeline_mode<synchronous>, transform_indices = @transform_2, window_bounds = array<i64: 1, 128>}, {transform_indices = @transform_3, window_bounds = array<i64: 512, 128>}]} {
    %c0 = arith.constant 0 : index
    %c0_0 = arith.constant 0 : index
    %0 = vector.load %arg1[%c0, %c0_0] : memref<512x128xf32, #tpu.memory_space<vmem>>, vector<512x128xf32>
    %c0_1 = arith.constant 0 : index
    %c0_2 = arith.constant 0 : index
    %1 = vector.load %arg2[%c0_1, %c0_2] : memref<1x128xf32, #tpu.memory_space<vmem>>, vector<1x128xf32>
    %2 = vector.broadcast %1 : vector<1x128xf32> to vector<512x128xf32>
    %3 = arith.mulf %0, %2 : vector<512x128xf32>
    %c0_3 = arith.constant 0 : index
    %c0_4 = arith.constant 0 : index
    %4 = vector.load %arg3[%c0_3, %c0_4] : memref<1x128xf32, #tpu.memory_space<vmem>>, vector<1x128xf32>
    %5 = vector.broadcast %4 : vector<1x128xf32> to vector<512x128xf32>
    %6 = arith.addf %3, %5 : vector<512x128xf32>
    %cst = arith.constant 0.000000e+00 : f32
    %7 = vector.broadcast %cst : f32 to vector<512x128xf32>
    %8 = arith.maximumf %6, %7 : vector<512x128xf32>
    %c0_5 = arith.constant 0 : index
    %c0_6 = arith.constant 0 : index
    %9 = vector.load %arg4[%c0_5, %c0_6] : memref<512x128xf32, #tpu.memory_space<vmem>>, vector<512x128xf32>
    tpu.vector_store %arg4[%c0_5, %c0_6], %8 {strides = array<i32>} : memref<512x128xf32, #tpu.memory_space<vmem>>, vector<512x128xf32>,
    return
  }
  func.func @transform_0(%arg0: i32) -> (i32, i32) {
    %c0_i32 = arith.constant 0 : i32
    %c0_i32_0 = arith.constant 0 : i32
    return %arg0, %c0_i32 : i32, i32
  }
  func.func @transform_1(%arg0: i32) -> (i32, i32) {
    %c0_i32 = arith.constant 0 : i32
    %c0_i32_0 = arith.constant 0 : i32
    %c0_i32_1 = arith.constant 0 : i32
    return %c0_i32, %c0_i32_0 : i32, i32
  }
  func.func @transform_2(%arg0: i32) -> (i32, i32) {
    %c0_i32 = arith.constant 0 : i32
    %c0_i32_0 = arith.constant 0 : i32
    %c0_i32_1 = arith.constant 0 : i32
    return %c0_i32, %c0_i32_0 : i32, i32
  }
  func.func @transform_3(%arg0: i32) -> (i32, i32) {
    %c0_i32 = arith.constant 0 : i32
    %c0_i32_0 = arith.constant 0 : i32
    return %arg0, %c0_i32 : i32, i32
  }
}

module attributes {stable_mosaic.version = 11 : i64} {
  func.func @kernel(%arg0: i32, %arg1: i32, %arg2: i32, %arg3: memref<128x128xf32, #tpu.memory_space<vmem>>, %arg4: memref<1x128xf32, #tpu.memory_space<vmem>>, %arg5: memref<1x128xf32, #tpu.memory_space<vmem>>, %arg6: memref<128x128xbf16, #tpu.memory_space<vmem>>, %arg7: memref<128x128xf32, #tpu.memory_space<vmem>>) attributes {dimension_semantics = [#tpu.dimension_semantics<parallel>, #tpu.dimension_semantics<parallel>, #tpu.dimension_semantics<arbitrary>], iteration_bounds = array<i64: 1, 1, 1>, scalar_prefetch = 0 : i64, scratch_operands = 0 : i64, tpu.core_type = #tpu.core_type<tc>, window_params = [{transform_indices = @transform_0, window_bounds = array<i64: 128, 128>}, {transform_indices = @transform_1, window_bounds = array<i64: 1, 128>}, {transform_indices = @transform_2, window_bounds = array<i64: 1, 128>}, {transform_indices = @transform_3, window_bounds = array<i64: 128, 128>}, {transform_indices = @transform_4, window_bounds = array<i64: 128, 128>}]} {
    %c0 = arith.constant 0 : index
    %c0_0 = arith.constant 0 : index
    %0 = vector.load %arg3[%c0, %c0_0] : memref<128x128xf32, #tpu.memory_space<vmem>>, vector<128x128xf32>
    %c0_1 = arith.constant 0 : index
    %c0_2 = arith.constant 0 : index
    %1 = vector.load %arg4[%c0_1, %c0_2] : memref<1x128xf32, #tpu.memory_space<vmem>>, vector<1x128xf32>
    %2 = vector.broadcast %1 : vector<1x128xf32> to vector<128x128xf32>
    %3 = arith.mulf %0, %2 : vector<128x128xf32>
    %c0_3 = arith.constant 0 : index
    %c0_4 = arith.constant 0 : index
    %4 = vector.load %arg5[%c0_3, %c0_4] : memref<1x128xf32, #tpu.memory_space<vmem>>, vector<1x128xf32>
    %5 = vector.broadcast %4 : vector<1x128xf32> to vector<128x128xf32>
    %6 = arith.addf %3, %5 : vector<128x128xf32>
    %cst = arith.constant 0.000000e+00 : f32
    %7 = vector.broadcast %cst : f32 to vector<128x128xf32>
    %8 = arith.maximumf %6, %7 : vector<128x128xf32>
    %9 = arith.truncf %8 : vector<128x128xf32> to vector<128x128xbf16>
    %c0_5 = arith.constant 0 : index
    %c0_6 = arith.constant 0 : index
    %10 = vector.load %arg6[%c0_5, %c0_6] : memref<128x128xbf16, #tpu.memory_space<vmem>>, vector<128x128xbf16>
    %cst_7 = arith.constant dense<0.000000e+00> : vector<128x128xf32>
    %11 = tpu.matmul %9, %10, %cst_7 {dimension_numbers = #tpu.dot_dimension_numbers<[1], [0], [0], [1], [0, 0, 1, 1], [], []>} : vector<128x128xbf16>, vector<128x128xbf16>, vector<128x128xf32> -> vector<128x128xf32>
    %c0_8 = arith.constant 0 : index
    %c0_9 = arith.constant 0 : index
    %12 = vector.load %arg7[%c0_8, %c0_9] : memref<128x128xf32, #tpu.memory_space<vmem>>, vector<128x128xf32>
    tpu.vector_store %arg7[%c0_8, %c0_9], %11 {strides = array<i32>} : memref<128x128xf32, #tpu.memory_space<vmem>>, vector<128x128xf32>,
    return
  }
  func.func @transform_0(%arg0: i32, %arg1: i32, %arg2: i32) -> (i32, i32) {
    %c0_i32 = arith.constant 0 : i32
    return %arg0, %arg2 : i32, i32
  }
  func.func @transform_1(%arg0: i32, %arg1: i32, %arg2: i32) -> (i32, i32) {
    %c0_i32 = arith.constant 0 : i32
    %c0_i32_0 = arith.constant 0 : i32
    return %c0_i32, %arg2 : i32, i32
  }
  func.func @transform_2(%arg0: i32, %arg1: i32, %arg2: i32) -> (i32, i32) {
    %c0_i32 = arith.constant 0 : i32
    %c0_i32_0 = arith.constant 0 : i32
    return %c0_i32, %arg2 : i32, i32
  }
  func.func @transform_3(%arg0: i32, %arg1: i32, %arg2: i32) -> (i32, i32) {
    %c0_i32 = arith.constant 0 : i32
    return %arg2, %arg1 : i32, i32
  }
  func.func @transform_4(%arg0: i32, %arg1: i32, %arg2: i32) -> (i32, i32) {
    %c0_i32 = arith.constant 0 : i32
    return %arg0, %arg1 : i32, i32
  }
}

module attributes {stable_mosaic.version = 11 : i64} {
  func.func @kernel(%arg0: i32, %arg1: memref<128x128xf32, #tpu.memory_space<vmem>>, %arg2: memref<1x128xf32, #tpu.memory_space<vmem>>, %arg3: memref<1x128xf32, #tpu.memory_space<vmem>>, %arg4: memref<1x128xf32, #tpu.memory_space<vmem>>, %arg5: memref<1x128xf32, #tpu.memory_space<vmem>>, %arg6: memref<1x128xf32, #tpu.memory_space<vmem>>, %arg7: memref<1x128xf32, #tpu.memory_space<vmem>>) attributes {dimension_semantics = [#tpu.dimension_semantics<arbitrary>], iteration_bounds = array<i64: 1>, scalar_prefetch = 0 : i64, scratch_operands = 2 : i64, tpu.core_type = #tpu.core_type<tc>, window_params = [{transform_indices = @transform_0, window_bounds = array<i64: 128, 128>}, {pipeline_mode = #tpu.pipeline_mode<synchronous>, transform_indices = @transform_1, window_bounds = array<i64: 1, 128>}, {pipeline_mode = #tpu.pipeline_mode<synchronous>, transform_indices = @transform_2, window_bounds = array<i64: 1, 128>}, {pipeline_mode = #tpu.pipeline_mode<synchronous>, transform_indices = @transform_3, window_bounds = array<i64: 1, 128>}, {pipeline_mode = #tpu.pipeline_mode<synchronous>, transform_indices = @transform_4, window_bounds = array<i64: 1, 128>}]} {
    %c0_i32 = arith.constant 0 : i32
    %0 = arith.cmpi eq, %arg0, %c0_i32 : i32
    %1 = arith.extui %0 : i1 to i32
    %c0_i32_0 = arith.constant 0 : i32
    %2 = arith.cmpi ne, %1, %c0_i32_0 : i32
    scf.if %2 {
      %cst_13 = arith.constant 0.000000e+00 : f32
      %18 = vector.broadcast %cst_13 : f32 to vector<1x128xf32>
      %c0_14 = arith.constant 0 : index
      %c0_15 = arith.constant 0 : index
      %19 = vector.load %arg6[%c0_14, %c0_15] : memref<1x128xf32, #tpu.memory_space<vmem>>, vector<1x128xf32>
      tpu.vector_store %arg6[%c0_14, %c0_15], %18 {strides = array<i32>} : memref<1x128xf32, #tpu.memory_space<vmem>>, vector<1x128xf32>,
      %cst_16 = arith.constant 0.000000e+00 : f32
      %20 = vector.broadcast %cst_16 : f32 to vector<1x128xf32>
      %c0_17 = arith.constant 0 : index
      %c0_18 = arith.constant 0 : index
      %21 = vector.load %arg7[%c0_17, %c0_18] : memref<1x128xf32, #tpu.memory_space<vmem>>, vector<1x128xf32>
      tpu.vector_store %arg7[%c0_17, %c0_18], %20 {strides = array<i32>} : memref<1x128xf32, #tpu.memory_space<vmem>>, vector<1x128xf32>,
    } else {
    }
    %c0 = arith.constant 0 : index
    %c0_1 = arith.constant 0 : index
    %3 = vector.load %arg1[%c0, %c0_1] : memref<128x128xf32, #tpu.memory_space<vmem>>, vector<128x128xf32>
    %c0_2 = arith.constant 0 : index
    %c0_3 = arith.constant 0 : index
    %4 = vector.load %arg6[%c0_2, %c0_3] : memref<1x128xf32, #tpu.memory_space<vmem>>, vector<1x128xf32>
    %cst = arith.constant dense<0.000000e+00> : vector<128xf32>
    %5 = vector.multi_reduction <add>, %3, %cst [0] : vector<128x128xf32> to vector<128xf32>
    %6 = vector.shape_cast %5 : vector<128xf32> to vector<1x128xf32>
    %7 = arith.addf %4, %6 : vector<1x128xf32>
    %c0_4 = arith.constant 0 : index
    %c0_5 = arith.constant 0 : index
    %8 = vector.load %arg6[%c0_4, %c0_5] : memref<1x128xf32, #tpu.memory_space<vmem>>, vector<1x128xf32>
    tpu.vector_store %arg6[%c0_4, %c0_5], %7 {strides = array<i32>} : memref<1x128xf32, #tpu.memory_space<vmem>>, vector<1x128xf32>,
    %c0_6 = arith.constant 0 : index
    %c0_7 = arith.constant 0 : index
    %9 = vector.load %arg7[%c0_6, %c0_7] : memref<1x128xf32, #tpu.memory_space<vmem>>, vector<1x128xf32>
    %10 = arith.mulf %3, %3 : vector<128x128xf32>
    %cst_8 = arith.constant dense<0.000000e+00> : vector<128xf32>
    %11 = vector.multi_reduction <add>, %10, %cst_8 [0] : vector<128x128xf32> to vector<128xf32>
    %12 = vector.shape_cast %11 : vector<128xf32> to vector<1x128xf32>
    %13 = arith.addf %9, %12 : vector<1x128xf32>
    %c0_9 = arith.constant 0 : index
    %c0_10 = arith.constant 0 : index
    %14 = vector.load %arg7[%c0_9, %c0_10] : memref<1x128xf32, #tpu.memory_space<vmem>>, vector<1x128xf32>
    tpu.vector_store %arg7[%c0_9, %c0_10], %13 {strides = array<i32>} : memref<1x128xf32, #tpu.memory_space<vmem>>, vector<1x128xf32>,
    %c0_i32_11 = arith.constant 0 : i32
    %15 = arith.cmpi eq, %arg0, %c0_i32_11 : i32
    %16 = arith.extui %15 : i1 to i32
    %c0_i32_12 = arith.constant 0 : i32
    %17 = arith.cmpi ne, %16, %c0_i32_12 : i32
    scf.if %17 {
      %c0_13 = arith.constant 0 : index
      %c0_14 = arith.constant 0 : index
      %18 = vector.load %arg6[%c0_13, %c0_14] : memref<1x128xf32, #tpu.memory_space<vmem>>, vector<1x128xf32>
      %cst_15 = arith.constant 7.812500e-03 : f32
      %19 = vector.broadcast %cst_15 : f32 to vector<1x128xf32>
      %20 = arith.mulf %18, %19 : vector<1x128xf32>
      %c0_16 = arith.constant 0 : index
      %c0_17 = arith.constant 0 : index
      %21 = vector.load %arg7[%c0_16, %c0_17] : memref<1x128xf32, #tpu.memory_space<vmem>>, vector<1x128xf32>
      %cst_18 = arith.constant 7.812500e-03 : f32
      %22 = vector.broadcast %cst_18 : f32 to vector<1x128xf32>
      %23 = arith.mulf %21, %22 : vector<1x128xf32>
      %24 = arith.mulf %20, %20 : vector<1x128xf32>
      %25 = arith.subf %23, %24 : vector<1x128xf32>
      %cst_19 = arith.constant 0.000000e+00 : f32
      %26 = vector.broadcast %cst_19 : f32 to vector<1x128xf32>
      %27 = arith.maximumf %25, %26 : vector<1x128xf32>
      %c0_20 = arith.constant 0 : index
      %c0_21 = arith.constant 0 : index
      %28 = vector.load %arg2[%c0_20, %c0_21] : memref<1x128xf32, #tpu.memory_space<vmem>>, vector<1x128xf32>
      %cst_22 = arith.constant 9.99999974E-6 : f32
      %29 = vector.broadcast %cst_22 : f32 to vector<1x128xf32>
      %30 = arith.addf %27, %29 : vector<1x128xf32>
      %31 = math.rsqrt %30 : vector<1x128xf32>
      %32 = arith.mulf %28, %31 : vector<1x128xf32>
      %c0_23 = arith.constant 0 : index
      %c0_24 = arith.constant 0 : index
      %33 = vector.load %arg4[%c0_23, %c0_24] : memref<1x128xf32, #tpu.memory_space<vmem>>, vector<1x128xf32>
      tpu.vector_store %arg4[%c0_23, %c0_24], %32 {strides = array<i32>} : memref<1x128xf32, #tpu.memory_space<vmem>>, vector<1x128xf32>,
      %c0_25 = arith.constant 0 : index
      %c0_26 = arith.constant 0 : index
      %34 = vector.load %arg3[%c0_25, %c0_26] : memref<1x128xf32, #tpu.memory_space<vmem>>, vector<1x128xf32>
      %35 = arith.mulf %20, %32 : vector<1x128xf32>
      %36 = arith.subf %34, %35 : vector<1x128xf32>
      %c0_27 = arith.constant 0 : index
      %c0_28 = arith.constant 0 : index
      %37 = vector.load %arg5[%c0_27, %c0_28] : memref<1x128xf32, #tpu.memory_space<vmem>>, vector<1x128xf32>
      tpu.vector_store %arg5[%c0_27, %c0_28], %36 {strides = array<i32>} : memref<1x128xf32, #tpu.memory_space<vmem>>, vector<1x128xf32>,
    } else {
    }
    return
  }
  func.func @transform_0(%arg0: i32) -> (i32, i32) {
    %c0_i32 = arith.constant 0 : i32
    %c0_i32_0 = arith.constant 0 : i32
    return %arg0, %c0_i32 : i32, i32
  }
  func.func @transform_1(%arg0: i32) -> (i32, i32) {
    %c0_i32 = arith.constant 0 : i32
    %c0_i32_0 = arith.constant 0 : i32
    %c0_i32_1 = arith.constant 0 : i32
    return %c0_i32, %c0_i32_0 : i32, i32
  }
  func.func @transform_2(%arg0: i32) -> (i32, i32) {
    %c0_i32 = arith.constant 0 : i32
    %c0_i32_0 = arith.constant 0 : i32
    %c0_i32_1 = arith.constant 0 : i32
    return %c0_i32, %c0_i32_0 : i32, i32
  }
  func.func @transform_3(%arg0: i32) -> (i32, i32) {
    %c0_i32 = arith.constant 0 : i32
    %c0_i32_0 = arith.constant 0 : i32
    %c0_i32_1 = arith.constant 0 : i32
    return %c0_i32, %c0_i32_0 : i32, i32
  }
  func.func @transform_4(%arg0: i32) -> (i32, i32) {
    %c0_i32 = arith.constant 0 : i32
    %c0_i32_0 = arith.constant 0 : i32
    %c0_i32_1 = arith.constant 0 : i32
    return %c0_i32, %c0_i32_0 : i32, i32
  }
}

module attributes {stable_mosaic.version = 11 : i64} {
  func.func @_bn_apply_kernel(%arg0: i32, %arg1: memref<128x128xf32, #tpu.memory_space<vmem>>, %arg2: memref<1x128xf32, #tpu.memory_space<vmem>>, %arg3: memref<1x128xf32, #tpu.memory_space<vmem>>, %arg4: memref<128x128xf32, #tpu.memory_space<vmem>>) attributes {dimension_semantics = [#tpu.dimension_semantics<parallel>], iteration_bounds = array<i64: 1>, scalar_prefetch = 0 : i64, scratch_operands = 0 : i64, tpu.core_type = #tpu.core_type<tc>, window_params = [{transform_indices = @transform_0, window_bounds = array<i64: 128, 128>}, {pipeline_mode = #tpu.pipeline_mode<synchronous>, transform_indices = @transform_1, window_bounds = array<i64: 1, 128>}, {pipeline_mode = #tpu.pipeline_mode<synchronous>, transform_indices = @transform_2, window_bounds = array<i64: 1, 128>}, {transform_indices = @transform_3, window_bounds = array<i64: 128, 128>}]} {
    %c0 = arith.constant 0 : index
    %c0_0 = arith.constant 0 : index
    %0 = vector.load %arg1[%c0, %c0_0] : memref<128x128xf32, #tpu.memory_space<vmem>>, vector<128x128xf32>
    %c0_1 = arith.constant 0 : index
    %c0_2 = arith.constant 0 : index
    %1 = vector.load %arg2[%c0_1, %c0_2] : memref<1x128xf32, #tpu.memory_space<vmem>>, vector<1x128xf32>
    %2 = vector.broadcast %1 : vector<1x128xf32> to vector<128x128xf32>
    %3 = arith.mulf %0, %2 : vector<128x128xf32>
    %c0_3 = arith.constant 0 : index
    %c0_4 = arith.constant 0 : index
    %4 = vector.load %arg3[%c0_3, %c0_4] : memref<1x128xf32, #tpu.memory_space<vmem>>, vector<1x128xf32>
    %5 = vector.broadcast %4 : vector<1x128xf32> to vector<128x128xf32>
    %6 = arith.addf %3, %5 : vector<128x128xf32>
    %cst = arith.constant 0.000000e+00 : f32
    %7 = vector.broadcast %cst : f32 to vector<128x128xf32>
    %8 = arith.maximumf %6, %7 : vector<128x128xf32>
    %c0_5 = arith.constant 0 : index
    %c0_6 = arith.constant 0 : index
    %9 = vector.load %arg4[%c0_5, %c0_6] : memref<128x128xf32, #tpu.memory_space<vmem>>, vector<128x128xf32>
    tpu.vector_store %arg4[%c0_5, %c0_6], %8 {strides = array<i32>} : memref<128x128xf32, #tpu.memory_space<vmem>>, vector<128x128xf32>,
    return
  }
  func.func @transform_0(%arg0: i32) -> (i32, i32) {
    %c0_i32 = arith.constant 0 : i32
    %c0_i32_0 = arith.constant 0 : i32
    return %arg0, %c0_i32 : i32, i32
  }
  func.func @transform_1(%arg0: i32) -> (i32, i32) {
    %c0_i32 = arith.constant 0 : i32
    %c0_i32_0 = arith.constant 0 : i32
    %c0_i32_1 = arith.constant 0 : i32
    return %c0_i32, %c0_i32_0 : i32, i32
  }
  func.func @transform_2(%arg0: i32) -> (i32, i32) {
    %c0_i32 = arith.constant 0 : i32
    %c0_i32_0 = arith.constant 0 : i32
    %c0_i32_1 = arith.constant 0 : i32
    return %c0_i32, %c0_i32_0 : i32, i32
  }
  func.func @transform_3(%arg0: i32) -> (i32, i32) {
    %c0_i32 = arith.constant 0 : i32
    %c0_i32_0 = arith.constant 0 : i32
    return %arg0, %c0_i32 : i32, i32
  }
}

module attributes {stable_mosaic.version = 11 : i64} {
  func.func @kernel(%arg0: i32, %arg1: i32, %arg2: i32, %arg3: memref<128x256xbf16, #tpu.memory_space<vmem>>, %arg4: memref<256x128xbf16, #tpu.memory_space<vmem>>, %arg5: memref<128x128xf32, #tpu.memory_space<vmem>>) attributes {dimension_semantics = [#tpu.dimension_semantics<parallel>, #tpu.dimension_semantics<parallel>, #tpu.dimension_semantics<arbitrary>], iteration_bounds = array<i64: 1, 1, 1>, scalar_prefetch = 0 : i64, scratch_operands = 0 : i64, tpu.core_type = #tpu.core_type<tc>, window_params = [{transform_indices = @transform_0, window_bounds = array<i64: 128, 256>}, {transform_indices = @transform_1, window_bounds = array<i64: 256, 128>}, {transform_indices = @transform_2, window_bounds = array<i64: 128, 128>}]} {
    %c0 = arith.constant 0 : index
    %c0_0 = arith.constant 0 : index
    %0 = vector.load %arg3[%c0, %c0_0] : memref<128x256xbf16, #tpu.memory_space<vmem>>, vector<128x256xbf16>
    %c0_1 = arith.constant 0 : index
    %c0_2 = arith.constant 0 : index
    %1 = vector.load %arg4[%c0_1, %c0_2] : memref<256x128xbf16, #tpu.memory_space<vmem>>, vector<256x128xbf16>
    %cst = arith.constant dense<0.000000e+00> : vector<128x128xf32>
    %2 = tpu.matmul %0, %1, %cst {dimension_numbers = #tpu.dot_dimension_numbers<[1], [0], [0], [1], [0, 0, 1, 1], [], []>} : vector<128x256xbf16>, vector<256x128xbf16>, vector<128x128xf32> -> vector<128x128xf32>
    %c0_3 = arith.constant 0 : index
    %c0_4 = arith.constant 0 : index
    %3 = vector.load %arg5[%c0_3, %c0_4] : memref<128x128xf32, #tpu.memory_space<vmem>>, vector<128x128xf32>
    tpu.vector_store %arg5[%c0_3, %c0_4], %2 {strides = array<i32>} : memref<128x128xf32, #tpu.memory_space<vmem>>, vector<128x128xf32>,
    return
  }
  func.func @transform_0(%arg0: i32, %arg1: i32, %arg2: i32) -> (i32, i32) {
    %c0_i32 = arith.constant 0 : i32
    return %arg0, %arg2 : i32, i32
  }
  func.func @transform_1(%arg0: i32, %arg1: i32, %arg2: i32) -> (i32, i32) {
    %c0_i32 = arith.constant 0 : i32
    return %arg2, %arg1 : i32, i32
  }
  func.func @transform_2(%arg0: i32, %arg1: i32, %arg2: i32) -> (i32, i32) {
    %c0_i32 = arith.constant 0 : i32
    return %arg0, %arg1 : i32, i32
  }
}

module attributes {stable_mosaic.version = 11 : i64} {
  func.func @kernel(%arg0: i32, %arg1: memref<32x128xf32, #tpu.memory_space<vmem>>, %arg2: memref<1x128xf32, #tpu.memory_space<vmem>>, %arg3: memref<1x128xf32, #tpu.memory_space<vmem>>, %arg4: memref<1x128xf32, #tpu.memory_space<vmem>>, %arg5: memref<1x128xf32, #tpu.memory_space<vmem>>, %arg6: memref<1x128xf32, #tpu.memory_space<vmem>>, %arg7: memref<1x128xf32, #tpu.memory_space<vmem>>) attributes {dimension_semantics = [#tpu.dimension_semantics<arbitrary>], iteration_bounds = array<i64: 1>, scalar_prefetch = 0 : i64, scratch_operands = 2 : i64, tpu.core_type = #tpu.core_type<tc>, window_params = [{transform_indices = @transform_0, window_bounds = array<i64: 32, 128>}, {pipeline_mode = #tpu.pipeline_mode<synchronous>, transform_indices = @transform_1, window_bounds = array<i64: 1, 128>}, {pipeline_mode = #tpu.pipeline_mode<synchronous>, transform_indices = @transform_2, window_bounds = array<i64: 1, 128>}, {pipeline_mode = #tpu.pipeline_mode<synchronous>, transform_indices = @transform_3, window_bounds = array<i64: 1, 128>}, {pipeline_mode = #tpu.pipeline_mode<synchronous>, transform_indices = @transform_4, window_bounds = array<i64: 1, 128>}]} {
    %c0_i32 = arith.constant 0 : i32
    %0 = arith.cmpi eq, %arg0, %c0_i32 : i32
    %1 = arith.extui %0 : i1 to i32
    %c0_i32_0 = arith.constant 0 : i32
    %2 = arith.cmpi ne, %1, %c0_i32_0 : i32
    scf.if %2 {
      %cst_13 = arith.constant 0.000000e+00 : f32
      %18 = vector.broadcast %cst_13 : f32 to vector<1x128xf32>
      %c0_14 = arith.constant 0 : index
      %c0_15 = arith.constant 0 : index
      %19 = vector.load %arg6[%c0_14, %c0_15] : memref<1x128xf32, #tpu.memory_space<vmem>>, vector<1x128xf32>
      tpu.vector_store %arg6[%c0_14, %c0_15], %18 {strides = array<i32>} : memref<1x128xf32, #tpu.memory_space<vmem>>, vector<1x128xf32>,
      %cst_16 = arith.constant 0.000000e+00 : f32
      %20 = vector.broadcast %cst_16 : f32 to vector<1x128xf32>
      %c0_17 = arith.constant 0 : index
      %c0_18 = arith.constant 0 : index
      %21 = vector.load %arg7[%c0_17, %c0_18] : memref<1x128xf32, #tpu.memory_space<vmem>>, vector<1x128xf32>
      tpu.vector_store %arg7[%c0_17, %c0_18], %20 {strides = array<i32>} : memref<1x128xf32, #tpu.memory_space<vmem>>, vector<1x128xf32>,
    } else {
    }
    %c0 = arith.constant 0 : index
    %c0_1 = arith.constant 0 : index
    %3 = vector.load %arg1[%c0, %c0_1] : memref<32x128xf32, #tpu.memory_space<vmem>>, vector<32x128xf32>
    %c0_2 = arith.constant 0 : index
    %c0_3 = arith.constant 0 : index
    %4 = vector.load %arg6[%c0_2, %c0_3] : memref<1x128xf32, #tpu.memory_space<vmem>>, vector<1x128xf32>
    %cst = arith.constant dense<0.000000e+00> : vector<128xf32>
    %5 = vector.multi_reduction <add>, %3, %cst [0] : vector<32x128xf32> to vector<128xf32>
    %6 = vector.shape_cast %5 : vector<128xf32> to vector<1x128xf32>
    %7 = arith.addf %4, %6 : vector<1x128xf32>
    %c0_4 = arith.constant 0 : index
    %c0_5 = arith.constant 0 : index
    %8 = vector.load %arg6[%c0_4, %c0_5] : memref<1x128xf32, #tpu.memory_space<vmem>>, vector<1x128xf32>
    tpu.vector_store %arg6[%c0_4, %c0_5], %7 {strides = array<i32>} : memref<1x128xf32, #tpu.memory_space<vmem>>, vector<1x128xf32>,
    %c0_6 = arith.constant 0 : index
    %c0_7 = arith.constant 0 : index
    %9 = vector.load %arg7[%c0_6, %c0_7] : memref<1x128xf32, #tpu.memory_space<vmem>>, vector<1x128xf32>
    %10 = arith.mulf %3, %3 : vector<32x128xf32>
    %cst_8 = arith.constant dense<0.000000e+00> : vector<128xf32>
    %11 = vector.multi_reduction <add>, %10, %cst_8 [0] : vector<32x128xf32> to vector<128xf32>
    %12 = vector.shape_cast %11 : vector<128xf32> to vector<1x128xf32>
    %13 = arith.addf %9, %12 : vector<1x128xf32>
    %c0_9 = arith.constant 0 : index
    %c0_10 = arith.constant 0 : index
    %14 = vector.load %arg7[%c0_9, %c0_10] : memref<1x128xf32, #tpu.memory_space<vmem>>, vector<1x128xf32>
    tpu.vector_store %arg7[%c0_9, %c0_10], %13 {strides = array<i32>} : memref<1x128xf32, #tpu.memory_space<vmem>>, vector<1x128xf32>,
    %c0_i32_11 = arith.constant 0 : i32
    %15 = arith.cmpi eq, %arg0, %c0_i32_11 : i32
    %16 = arith.extui %15 : i1 to i32
    %c0_i32_12 = arith.constant 0 : i32
    %17 = arith.cmpi ne, %16, %c0_i32_12 : i32
    scf.if %17 {
      %c0_13 = arith.constant 0 : index
      %c0_14 = arith.constant 0 : index
      %18 = vector.load %arg6[%c0_13, %c0_14] : memref<1x128xf32, #tpu.memory_space<vmem>>, vector<1x128xf32>
      %cst_15 = arith.constant 3.125000e-02 : f32
      %19 = vector.broadcast %cst_15 : f32 to vector<1x128xf32>
      %20 = arith.mulf %18, %19 : vector<1x128xf32>
      %c0_16 = arith.constant 0 : index
      %c0_17 = arith.constant 0 : index
      %21 = vector.load %arg7[%c0_16, %c0_17] : memref<1x128xf32, #tpu.memory_space<vmem>>, vector<1x128xf32>
      %cst_18 = arith.constant 3.125000e-02 : f32
      %22 = vector.broadcast %cst_18 : f32 to vector<1x128xf32>
      %23 = arith.mulf %21, %22 : vector<1x128xf32>
      %24 = arith.mulf %20, %20 : vector<1x128xf32>
      %25 = arith.subf %23, %24 : vector<1x128xf32>
      %cst_19 = arith.constant 0.000000e+00 : f32
      %26 = vector.broadcast %cst_19 : f32 to vector<1x128xf32>
      %27 = arith.maximumf %25, %26 : vector<1x128xf32>
      %c0_20 = arith.constant 0 : index
      %c0_21 = arith.constant 0 : index
      %28 = vector.load %arg2[%c0_20, %c0_21] : memref<1x128xf32, #tpu.memory_space<vmem>>, vector<1x128xf32>
      %cst_22 = arith.constant 9.99999974E-6 : f32
      %29 = vector.broadcast %cst_22 : f32 to vector<1x128xf32>
      %30 = arith.addf %27, %29 : vector<1x128xf32>
      %31 = math.rsqrt %30 : vector<1x128xf32>
      %32 = arith.mulf %28, %31 : vector<1x128xf32>
      %c0_23 = arith.constant 0 : index
      %c0_24 = arith.constant 0 : index
      %33 = vector.load %arg4[%c0_23, %c0_24] : memref<1x128xf32, #tpu.memory_space<vmem>>, vector<1x128xf32>
      tpu.vector_store %arg4[%c0_23, %c0_24], %32 {strides = array<i32>} : memref<1x128xf32, #tpu.memory_space<vmem>>, vector<1x128xf32>,
      %c0_25 = arith.constant 0 : index
      %c0_26 = arith.constant 0 : index
      %34 = vector.load %arg3[%c0_25, %c0_26] : memref<1x128xf32, #tpu.memory_space<vmem>>, vector<1x128xf32>
      %35 = arith.mulf %20, %32 : vector<1x128xf32>
      %36 = arith.subf %34, %35 : vector<1x128xf32>
      %c0_27 = arith.constant 0 : index
      %c0_28 = arith.constant 0 : index
      %37 = vector.load %arg5[%c0_27, %c0_28] : memref<1x128xf32, #tpu.memory_space<vmem>>, vector<1x128xf32>
      tpu.vector_store %arg5[%c0_27, %c0_28], %36 {strides = array<i32>} : memref<1x128xf32, #tpu.memory_space<vmem>>, vector<1x128xf32>,
    } else {
    }
    return
  }
  func.func @transform_0(%arg0: i32) -> (i32, i32) {
    %c0_i32 = arith.constant 0 : i32
    %c0_i32_0 = arith.constant 0 : i32
    return %arg0, %c0_i32 : i32, i32
  }
  func.func @transform_1(%arg0: i32) -> (i32, i32) {
    %c0_i32 = arith.constant 0 : i32
    %c0_i32_0 = arith.constant 0 : i32
    %c0_i32_1 = arith.constant 0 : i32
    return %c0_i32, %c0_i32_0 : i32, i32
  }
  func.func @transform_2(%arg0: i32) -> (i32, i32) {
    %c0_i32 = arith.constant 0 : i32
    %c0_i32_0 = arith.constant 0 : i32
    %c0_i32_1 = arith.constant 0 : i32
    return %c0_i32, %c0_i32_0 : i32, i32
  }
  func.func @transform_3(%arg0: i32) -> (i32, i32) {
    %c0_i32 = arith.constant 0 : i32
    %c0_i32_0 = arith.constant 0 : i32
    %c0_i32_1 = arith.constant 0 : i32
    return %c0_i32, %c0_i32_0 : i32, i32
  }
  func.func @transform_4(%arg0: i32) -> (i32, i32) {
    %c0_i32 = arith.constant 0 : i32
    %c0_i32_0 = arith.constant 0 : i32
    %c0_i32_1 = arith.constant 0 : i32
    return %c0_i32, %c0_i32_0 : i32, i32
  }
}

module attributes {stable_mosaic.version = 11 : i64} {
  func.func @_bn_apply_kernel(%arg0: i32, %arg1: memref<32x128xf32, #tpu.memory_space<vmem>>, %arg2: memref<1x128xf32, #tpu.memory_space<vmem>>, %arg3: memref<1x128xf32, #tpu.memory_space<vmem>>, %arg4: memref<32x128xf32, #tpu.memory_space<vmem>>) attributes {dimension_semantics = [#tpu.dimension_semantics<parallel>], iteration_bounds = array<i64: 1>, scalar_prefetch = 0 : i64, scratch_operands = 0 : i64, tpu.core_type = #tpu.core_type<tc>, window_params = [{transform_indices = @transform_0, window_bounds = array<i64: 32, 128>}, {pipeline_mode = #tpu.pipeline_mode<synchronous>, transform_indices = @transform_1, window_bounds = array<i64: 1, 128>}, {pipeline_mode = #tpu.pipeline_mode<synchronous>, transform_indices = @transform_2, window_bounds = array<i64: 1, 128>}, {transform_indices = @transform_3, window_bounds = array<i64: 32, 128>}]} {
    %c0 = arith.constant 0 : index
    %c0_0 = arith.constant 0 : index
    %0 = vector.load %arg1[%c0, %c0_0] : memref<32x128xf32, #tpu.memory_space<vmem>>, vector<32x128xf32>
    %c0_1 = arith.constant 0 : index
    %c0_2 = arith.constant 0 : index
    %1 = vector.load %arg2[%c0_1, %c0_2] : memref<1x128xf32, #tpu.memory_space<vmem>>, vector<1x128xf32>
    %2 = vector.broadcast %1 : vector<1x128xf32> to vector<32x128xf32>
    %3 = arith.mulf %0, %2 : vector<32x128xf32>
    %c0_3 = arith.constant 0 : index
    %c0_4 = arith.constant 0 : index
    %4 = vector.load %arg3[%c0_3, %c0_4] : memref<1x128xf32, #tpu.memory_space<vmem>>, vector<1x128xf32>
    %5 = vector.broadcast %4 : vector<1x128xf32> to vector<32x128xf32>
    %6 = arith.addf %3, %5 : vector<32x128xf32>
    %cst = arith.constant 0.000000e+00 : f32
    %7 = vector.broadcast %cst : f32 to vector<32x128xf32>
    %8 = arith.maximumf %6, %7 : vector<32x128xf32>
    %c0_5 = arith.constant 0 : index
    %c0_6 = arith.constant 0 : index
    %9 = vector.load %arg4[%c0_5, %c0_6] : memref<32x128xf32, #tpu.memory_space<vmem>>, vector<32x128xf32>
    tpu.vector_store %arg4[%c0_5, %c0_6], %8 {strides = array<i32>} : memref<32x128xf32, #tpu.memory_space<vmem>>, vector<32x128xf32>,
    return
  }
  func.func @transform_0(%arg0: i32) -> (i32, i32) {
    %c0_i32 = arith.constant 0 : i32
    %c0_i32_0 = arith.constant 0 : i32
    return %arg0, %c0_i32 : i32, i32
  }
  func.func @transform_1(%arg0: i32) -> (i32, i32) {
    %c0_i32 = arith.constant 0 : i32
    %c0_i32_0 = arith.constant 0 : i32
    %c0_i32_1 = arith.constant 0 : i32
    return %c0_i32, %c0_i32_0 : i32, i32
  }
  func.func @transform_2(%arg0: i32) -> (i32, i32) {
    %c0_i32 = arith.constant 0 : i32
    %c0_i32_0 = arith.constant 0 : i32
    %c0_i32_1 = arith.constant 0 : i32
    return %c0_i32, %c0_i32_0 : i32, i32
  }
  func.func @transform_3(%arg0: i32) -> (i32, i32) {
    %c0_i32 = arith.constant 0 : i32
    %c0_i32_0 = arith.constant 0 : i32
    return %arg0, %c0_i32 : i32, i32
  }
}

module attributes {stable_mosaic.version = 11 : i64} {
  func.func @kernel(%arg0: i32, %arg1: i32, %arg2: i32, %arg3: memref<32x128xf32, #tpu.memory_space<vmem>>, %arg4: memref<1x128xf32, #tpu.memory_space<vmem>>, %arg5: memref<1x128xf32, #tpu.memory_space<vmem>>, %arg6: memref<128x128xbf16, #tpu.memory_space<vmem>>, %arg7: memref<32x128xf32, #tpu.memory_space<vmem>>) attributes {dimension_semantics = [#tpu.dimension_semantics<parallel>, #tpu.dimension_semantics<parallel>, #tpu.dimension_semantics<arbitrary>], iteration_bounds = array<i64: 1, 1, 1>, scalar_prefetch = 0 : i64, scratch_operands = 0 : i64, tpu.core_type = #tpu.core_type<tc>, window_params = [{transform_indices = @transform_0, window_bounds = array<i64: 32, 128>}, {transform_indices = @transform_1, window_bounds = array<i64: 1, 128>}, {transform_indices = @transform_2, window_bounds = array<i64: 1, 128>}, {transform_indices = @transform_3, window_bounds = array<i64: 128, 128>}, {transform_indices = @transform_4, window_bounds = array<i64: 32, 128>}]} {
    %c0 = arith.constant 0 : index
    %c0_0 = arith.constant 0 : index
    %0 = vector.load %arg3[%c0, %c0_0] : memref<32x128xf32, #tpu.memory_space<vmem>>, vector<32x128xf32>
    %c0_1 = arith.constant 0 : index
    %c0_2 = arith.constant 0 : index
    %1 = vector.load %arg4[%c0_1, %c0_2] : memref<1x128xf32, #tpu.memory_space<vmem>>, vector<1x128xf32>
    %2 = vector.broadcast %1 : vector<1x128xf32> to vector<32x128xf32>
    %3 = arith.mulf %0, %2 : vector<32x128xf32>
    %c0_3 = arith.constant 0 : index
    %c0_4 = arith.constant 0 : index
    %4 = vector.load %arg5[%c0_3, %c0_4] : memref<1x128xf32, #tpu.memory_space<vmem>>, vector<1x128xf32>
    %5 = vector.broadcast %4 : vector<1x128xf32> to vector<32x128xf32>
    %6 = arith.addf %3, %5 : vector<32x128xf32>
    %cst = arith.constant 0.000000e+00 : f32
    %7 = vector.broadcast %cst : f32 to vector<32x128xf32>
    %8 = arith.maximumf %6, %7 : vector<32x128xf32>
    %9 = arith.truncf %8 : vector<32x128xf32> to vector<32x128xbf16>
    %c0_5 = arith.constant 0 : index
    %c0_6 = arith.constant 0 : index
    %10 = vector.load %arg6[%c0_5, %c0_6] : memref<128x128xbf16, #tpu.memory_space<vmem>>, vector<128x128xbf16>
    %cst_7 = arith.constant dense<0.000000e+00> : vector<32x128xf32>
    %11 = tpu.matmul %9, %10, %cst_7 {dimension_numbers = #tpu.dot_dimension_numbers<[1], [0], [0], [1], [0, 0, 1, 1], [], []>} : vector<32x128xbf16>, vector<128x128xbf16>, vector<32x128xf32> -> vector<32x128xf32>
    %c0_8 = arith.constant 0 : index
    %c0_9 = arith.constant 0 : index
    %12 = vector.load %arg7[%c0_8, %c0_9] : memref<32x128xf32, #tpu.memory_space<vmem>>, vector<32x128xf32>
    tpu.vector_store %arg7[%c0_8, %c0_9], %11 {strides = array<i32>} : memref<32x128xf32, #tpu.memory_space<vmem>>, vector<32x128xf32>,
    return
  }
  func.func @transform_0(%arg0: i32, %arg1: i32, %arg2: i32) -> (i32, i32) {
    %c0_i32 = arith.constant 0 : i32
    return %arg0, %arg2 : i32, i32
  }
  func.func @transform_1(%arg0: i32, %arg1: i32, %arg2: i32) -> (i32, i32) {
    %c0_i32 = arith.constant 0 : i32
    %c0_i32_0 = arith.constant 0 : i32
    return %c0_i32, %arg2 : i32, i32
  }
  func.func @transform_2(%arg0: i32, %arg1: i32, %arg2: i32) -> (i32, i32) {
    %c0_i32 = arith.constant 0 : i32
    %c0_i32_0 = arith.constant 0 : i32
    return %c0_i32, %arg2 : i32, i32
  }
  func.func @transform_3(%arg0: i32, %arg1: i32, %arg2: i32) -> (i32, i32) {
    %c0_i32 = arith.constant 0 : i32
    return %arg2, %arg1 : i32, i32
  }
  func.func @transform_4(%arg0: i32, %arg1: i32, %arg2: i32) -> (i32, i32) {
    %c0_i32 = arith.constant 0 : i32
    return %arg0, %arg1 : i32, i32
  }
}

module attributes {stable_mosaic.version = 11 : i64} {
  func.func @kernel(%arg0: i32, %arg1: i32, %arg2: i32, %arg3: memref<32x256xbf16, #tpu.memory_space<vmem>>, %arg4: memref<256x128xbf16, #tpu.memory_space<vmem>>, %arg5: memref<32x128xf32, #tpu.memory_space<vmem>>) attributes {dimension_semantics = [#tpu.dimension_semantics<parallel>, #tpu.dimension_semantics<parallel>, #tpu.dimension_semantics<arbitrary>], iteration_bounds = array<i64: 1, 1, 1>, scalar_prefetch = 0 : i64, scratch_operands = 0 : i64, tpu.core_type = #tpu.core_type<tc>, window_params = [{transform_indices = @transform_0, window_bounds = array<i64: 32, 256>}, {transform_indices = @transform_1, window_bounds = array<i64: 256, 128>}, {transform_indices = @transform_2, window_bounds = array<i64: 32, 128>}]} {
    %c0 = arith.constant 0 : index
    %c0_0 = arith.constant 0 : index
    %0 = vector.load %arg3[%c0, %c0_0] : memref<32x256xbf16, #tpu.memory_space<vmem>>, vector<32x256xbf16>
    %c0_1 = arith.constant 0 : index
    %c0_2 = arith.constant 0 : index
    %1 = vector.load %arg4[%c0_1, %c0_2] : memref<256x128xbf16, #tpu.memory_space<vmem>>, vector<256x128xbf16>
    %cst = arith.constant dense<0.000000e+00> : vector<32x128xf32>
    %2 = tpu.matmul %0, %1, %cst {dimension_numbers = #tpu.dot_dimension_numbers<[1], [0], [0], [1], [0, 0, 1, 1], [], []>} : vector<32x256xbf16>, vector<256x128xbf16>, vector<32x128xf32> -> vector<32x128xf32>
    %c0_3 = arith.constant 0 : index
    %c0_4 = arith.constant 0 : index
    %3 = vector.load %arg5[%c0_3, %c0_4] : memref<32x128xf32, #tpu.memory_space<vmem>>, vector<32x128xf32>
    tpu.vector_store %arg5[%c0_3, %c0_4], %2 {strides = array<i32>} : memref<32x128xf32, #tpu.memory_space<vmem>>, vector<32x128xf32>,
    return
  }
  func.func @transform_0(%arg0: i32, %arg1: i32, %arg2: i32) -> (i32, i32) {
    %c0_i32 = arith.constant 0 : i32
    return %arg0, %arg2 : i32, i32
  }
  func.func @transform_1(%arg0: i32, %arg1: i32, %arg2: i32) -> (i32, i32) {
    %c0_i32 = arith.constant 0 : i32
    return %arg2, %arg1 : i32, i32
  }
  func.func @transform_2(%arg0: i32, %arg1: i32, %arg2: i32) -> (i32, i32) {
    %c0_i32 = arith.constant 0 : i32
    return %arg0, %arg1 : i32, i32
  }
}

module attributes {stable_mosaic.version = 11 : i64} {
  func.func @kernel(%arg0: i32, %arg1: memref<16x128xf32, #tpu.memory_space<vmem>>, %arg2: memref<1x128xf32, #tpu.memory_space<vmem>>, %arg3: memref<1x128xf32, #tpu.memory_space<vmem>>, %arg4: memref<1x128xf32, #tpu.memory_space<vmem>>, %arg5: memref<1x128xf32, #tpu.memory_space<vmem>>, %arg6: memref<1x128xf32, #tpu.memory_space<vmem>>, %arg7: memref<1x128xf32, #tpu.memory_space<vmem>>) attributes {dimension_semantics = [#tpu.dimension_semantics<arbitrary>], iteration_bounds = array<i64: 1>, scalar_prefetch = 0 : i64, scratch_operands = 2 : i64, tpu.core_type = #tpu.core_type<tc>, window_params = [{transform_indices = @transform_0, window_bounds = array<i64: 16, 128>}, {pipeline_mode = #tpu.pipeline_mode<synchronous>, transform_indices = @transform_1, window_bounds = array<i64: 1, 128>}, {pipeline_mode = #tpu.pipeline_mode<synchronous>, transform_indices = @transform_2, window_bounds = array<i64: 1, 128>}, {pipeline_mode = #tpu.pipeline_mode<synchronous>, transform_indices = @transform_3, window_bounds = array<i64: 1, 128>}, {pipeline_mode = #tpu.pipeline_mode<synchronous>, transform_indices = @transform_4, window_bounds = array<i64: 1, 128>}]} {
    %c0_i32 = arith.constant 0 : i32
    %0 = arith.cmpi eq, %arg0, %c0_i32 : i32
    %1 = arith.extui %0 : i1 to i32
    %c0_i32_0 = arith.constant 0 : i32
    %2 = arith.cmpi ne, %1, %c0_i32_0 : i32
    scf.if %2 {
      %cst_13 = arith.constant 0.000000e+00 : f32
      %18 = vector.broadcast %cst_13 : f32 to vector<1x128xf32>
      %c0_14 = arith.constant 0 : index
      %c0_15 = arith.constant 0 : index
      %19 = vector.load %arg6[%c0_14, %c0_15] : memref<1x128xf32, #tpu.memory_space<vmem>>, vector<1x128xf32>
      tpu.vector_store %arg6[%c0_14, %c0_15], %18 {strides = array<i32>} : memref<1x128xf32, #tpu.memory_space<vmem>>, vector<1x128xf32>,
      %cst_16 = arith.constant 0.000000e+00 : f32
      %20 = vector.broadcast %cst_16 : f32 to vector<1x128xf32>
      %c0_17 = arith.constant 0 : index
      %c0_18 = arith.constant 0 : index
      %21 = vector.load %arg7[%c0_17, %c0_18] : memref<1x128xf32, #tpu.memory_space<vmem>>, vector<1x128xf32>
      tpu.vector_store %arg7[%c0_17, %c0_18], %20 {strides = array<i32>} : memref<1x128xf32, #tpu.memory_space<vmem>>, vector<1x128xf32>,
    } else {
    }
    %c0 = arith.constant 0 : index
    %c0_1 = arith.constant 0 : index
    %3 = vector.load %arg1[%c0, %c0_1] : memref<16x128xf32, #tpu.memory_space<vmem>>, vector<16x128xf32>
    %c0_2 = arith.constant 0 : index
    %c0_3 = arith.constant 0 : index
    %4 = vector.load %arg6[%c0_2, %c0_3] : memref<1x128xf32, #tpu.memory_space<vmem>>, vector<1x128xf32>
    %cst = arith.constant dense<0.000000e+00> : vector<128xf32>
    %5 = vector.multi_reduction <add>, %3, %cst [0] : vector<16x128xf32> to vector<128xf32>
    %6 = vector.shape_cast %5 : vector<128xf32> to vector<1x128xf32>
    %7 = arith.addf %4, %6 : vector<1x128xf32>
    %c0_4 = arith.constant 0 : index
    %c0_5 = arith.constant 0 : index
    %8 = vector.load %arg6[%c0_4, %c0_5] : memref<1x128xf32, #tpu.memory_space<vmem>>, vector<1x128xf32>
    tpu.vector_store %arg6[%c0_4, %c0_5], %7 {strides = array<i32>} : memref<1x128xf32, #tpu.memory_space<vmem>>, vector<1x128xf32>,
    %c0_6 = arith.constant 0 : index
    %c0_7 = arith.constant 0 : index
    %9 = vector.load %arg7[%c0_6, %c0_7] : memref<1x128xf32, #tpu.memory_space<vmem>>, vector<1x128xf32>
    %10 = arith.mulf %3, %3 : vector<16x128xf32>
    %cst_8 = arith.constant dense<0.000000e+00> : vector<128xf32>
    %11 = vector.multi_reduction <add>, %10, %cst_8 [0] : vector<16x128xf32> to vector<128xf32>
    %12 = vector.shape_cast %11 : vector<128xf32> to vector<1x128xf32>
    %13 = arith.addf %9, %12 : vector<1x128xf32>
    %c0_9 = arith.constant 0 : index
    %c0_10 = arith.constant 0 : index
    %14 = vector.load %arg7[%c0_9, %c0_10] : memref<1x128xf32, #tpu.memory_space<vmem>>, vector<1x128xf32>
    tpu.vector_store %arg7[%c0_9, %c0_10], %13 {strides = array<i32>} : memref<1x128xf32, #tpu.memory_space<vmem>>, vector<1x128xf32>,
    %c0_i32_11 = arith.constant 0 : i32
    %15 = arith.cmpi eq, %arg0, %c0_i32_11 : i32
    %16 = arith.extui %15 : i1 to i32
    %c0_i32_12 = arith.constant 0 : i32
    %17 = arith.cmpi ne, %16, %c0_i32_12 : i32
    scf.if %17 {
      %c0_13 = arith.constant 0 : index
      %c0_14 = arith.constant 0 : index
      %18 = vector.load %arg6[%c0_13, %c0_14] : memref<1x128xf32, #tpu.memory_space<vmem>>, vector<1x128xf32>
      %cst_15 = arith.constant 1.250000e-01 : f32
      %19 = vector.broadcast %cst_15 : f32 to vector<1x128xf32>
      %20 = arith.mulf %18, %19 : vector<1x128xf32>
      %c0_16 = arith.constant 0 : index
      %c0_17 = arith.constant 0 : index
      %21 = vector.load %arg7[%c0_16, %c0_17] : memref<1x128xf32, #tpu.memory_space<vmem>>, vector<1x128xf32>
      %cst_18 = arith.constant 1.250000e-01 : f32
      %22 = vector.broadcast %cst_18 : f32 to vector<1x128xf32>
      %23 = arith.mulf %21, %22 : vector<1x128xf32>
      %24 = arith.mulf %20, %20 : vector<1x128xf32>
      %25 = arith.subf %23, %24 : vector<1x128xf32>
      %cst_19 = arith.constant 0.000000e+00 : f32
      %26 = vector.broadcast %cst_19 : f32 to vector<1x128xf32>
      %27 = arith.maximumf %25, %26 : vector<1x128xf32>
      %c0_20 = arith.constant 0 : index
      %c0_21 = arith.constant 0 : index
      %28 = vector.load %arg2[%c0_20, %c0_21] : memref<1x128xf32, #tpu.memory_space<vmem>>, vector<1x128xf32>
      %cst_22 = arith.constant 9.99999974E-6 : f32
      %29 = vector.broadcast %cst_22 : f32 to vector<1x128xf32>
      %30 = arith.addf %27, %29 : vector<1x128xf32>
      %31 = math.rsqrt %30 : vector<1x128xf32>
      %32 = arith.mulf %28, %31 : vector<1x128xf32>
      %c0_23 = arith.constant 0 : index
      %c0_24 = arith.constant 0 : index
      %33 = vector.load %arg4[%c0_23, %c0_24] : memref<1x128xf32, #tpu.memory_space<vmem>>, vector<1x128xf32>
      tpu.vector_store %arg4[%c0_23, %c0_24], %32 {strides = array<i32>} : memref<1x128xf32, #tpu.memory_space<vmem>>, vector<1x128xf32>,
      %c0_25 = arith.constant 0 : index
      %c0_26 = arith.constant 0 : index
      %34 = vector.load %arg3[%c0_25, %c0_26] : memref<1x128xf32, #tpu.memory_space<vmem>>, vector<1x128xf32>
      %35 = arith.mulf %20, %32 : vector<1x128xf32>
      %36 = arith.subf %34, %35 : vector<1x128xf32>
      %c0_27 = arith.constant 0 : index
      %c0_28 = arith.constant 0 : index
      %37 = vector.load %arg5[%c0_27, %c0_28] : memref<1x128xf32, #tpu.memory_space<vmem>>, vector<1x128xf32>
      tpu.vector_store %arg5[%c0_27, %c0_28], %36 {strides = array<i32>} : memref<1x128xf32, #tpu.memory_space<vmem>>, vector<1x128xf32>,
    } else {
    }
    return
  }
  func.func @transform_0(%arg0: i32) -> (i32, i32) {
    %c0_i32 = arith.constant 0 : i32
    %c0_i32_0 = arith.constant 0 : i32
    return %arg0, %c0_i32 : i32, i32
  }
  func.func @transform_1(%arg0: i32) -> (i32, i32) {
    %c0_i32 = arith.constant 0 : i32
    %c0_i32_0 = arith.constant 0 : i32
    %c0_i32_1 = arith.constant 0 : i32
    return %c0_i32, %c0_i32_0 : i32, i32
  }
  func.func @transform_2(%arg0: i32) -> (i32, i32) {
    %c0_i32 = arith.constant 0 : i32
    %c0_i32_0 = arith.constant 0 : i32
    %c0_i32_1 = arith.constant 0 : i32
    return %c0_i32, %c0_i32_0 : i32, i32
  }
  func.func @transform_3(%arg0: i32) -> (i32, i32) {
    %c0_i32 = arith.constant 0 : i32
    %c0_i32_0 = arith.constant 0 : i32
    %c0_i32_1 = arith.constant 0 : i32
    return %c0_i32, %c0_i32_0 : i32, i32
  }
  func.func @transform_4(%arg0: i32) -> (i32, i32) {
    %c0_i32 = arith.constant 0 : i32
    %c0_i32_0 = arith.constant 0 : i32
    %c0_i32_1 = arith.constant 0 : i32
    return %c0_i32, %c0_i32_0 : i32, i32
  }
}

module attributes {stable_mosaic.version = 11 : i64} {
  func.func @kernel(%arg0: i32, %arg1: i32, %arg2: i32, %arg3: memref<16x128xf32, #tpu.memory_space<vmem>>, %arg4: memref<1x128xf32, #tpu.memory_space<vmem>>, %arg5: memref<1x128xf32, #tpu.memory_space<vmem>>, %arg6: memref<128x128xbf16, #tpu.memory_space<vmem>>, %arg7: memref<16x128xf32, #tpu.memory_space<vmem>>) attributes {dimension_semantics = [#tpu.dimension_semantics<parallel>, #tpu.dimension_semantics<parallel>, #tpu.dimension_semantics<arbitrary>], iteration_bounds = array<i64: 1, 1, 1>, scalar_prefetch = 0 : i64, scratch_operands = 0 : i64, tpu.core_type = #tpu.core_type<tc>, window_params = [{transform_indices = @transform_0, window_bounds = array<i64: 16, 128>}, {transform_indices = @transform_1, window_bounds = array<i64: 1, 128>}, {transform_indices = @transform_2, window_bounds = array<i64: 1, 128>}, {transform_indices = @transform_3, window_bounds = array<i64: 128, 128>}, {transform_indices = @transform_4, window_bounds = array<i64: 16, 128>}]} {
    %c0 = arith.constant 0 : index
    %c0_0 = arith.constant 0 : index
    %0 = vector.load %arg3[%c0, %c0_0] : memref<16x128xf32, #tpu.memory_space<vmem>>, vector<16x128xf32>
    %c0_1 = arith.constant 0 : index
    %c0_2 = arith.constant 0 : index
    %1 = vector.load %arg4[%c0_1, %c0_2] : memref<1x128xf32, #tpu.memory_space<vmem>>, vector<1x128xf32>
    %2 = vector.broadcast %1 : vector<1x128xf32> to vector<16x128xf32>
    %3 = arith.mulf %0, %2 : vector<16x128xf32>
    %c0_3 = arith.constant 0 : index
    %c0_4 = arith.constant 0 : index
    %4 = vector.load %arg5[%c0_3, %c0_4] : memref<1x128xf32, #tpu.memory_space<vmem>>, vector<1x128xf32>
    %5 = vector.broadcast %4 : vector<1x128xf32> to vector<16x128xf32>
    %6 = arith.addf %3, %5 : vector<16x128xf32>
    %cst = arith.constant 0.000000e+00 : f32
    %7 = vector.broadcast %cst : f32 to vector<16x128xf32>
    %8 = arith.maximumf %6, %7 : vector<16x128xf32>
    %9 = arith.truncf %8 : vector<16x128xf32> to vector<16x128xbf16>
    %c0_5 = arith.constant 0 : index
    %c0_6 = arith.constant 0 : index
    %10 = vector.load %arg6[%c0_5, %c0_6] : memref<128x128xbf16, #tpu.memory_space<vmem>>, vector<128x128xbf16>
    %cst_7 = arith.constant dense<0.000000e+00> : vector<16x128xf32>
    %11 = tpu.matmul %9, %10, %cst_7 {dimension_numbers = #tpu.dot_dimension_numbers<[1], [0], [0], [1], [0, 0, 1, 1], [], []>} : vector<16x128xbf16>, vector<128x128xbf16>, vector<16x128xf32> -> vector<16x128xf32>
    %c0_8 = arith.constant 0 : index
    %c0_9 = arith.constant 0 : index
    %12 = vector.load %arg7[%c0_8, %c0_9] : memref<16x128xf32, #tpu.memory_space<vmem>>, vector<16x128xf32>
    tpu.vector_store %arg7[%c0_8, %c0_9], %11 {strides = array<i32>} : memref<16x128xf32, #tpu.memory_space<vmem>>, vector<16x128xf32>,
    return
  }
  func.func @transform_0(%arg0: i32, %arg1: i32, %arg2: i32) -> (i32, i32) {
    %c0_i32 = arith.constant 0 : i32
    return %arg0, %arg2 : i32, i32
  }
  func.func @transform_1(%arg0: i32, %arg1: i32, %arg2: i32) -> (i32, i32) {
    %c0_i32 = arith.constant 0 : i32
    %c0_i32_0 = arith.constant 0 : i32
    return %c0_i32, %arg2 : i32, i32
  }
  func.func @transform_2(%arg0: i32, %arg1: i32, %arg2: i32) -> (i32, i32) {
    %c0_i32 = arith.constant 0 : i32
    %c0_i32_0 = arith.constant 0 : i32
    return %c0_i32, %arg2 : i32, i32
  }
  func.func @transform_3(%arg0: i32, %arg1: i32, %arg2: i32) -> (i32, i32) {
    %c0_i32 = arith.constant 0 : i32
    return %arg2, %arg1 : i32, i32
  }
  func.func @transform_4(%arg0: i32, %arg1: i32, %arg2: i32) -> (i32, i32) {
    %c0_i32 = arith.constant 0 : i32
    return %arg0, %arg1 : i32, i32
  }
}

module attributes {stable_mosaic.version = 11 : i64} {
  func.func @_bn_apply_kernel(%arg0: i32, %arg1: memref<16x128xf32, #tpu.memory_space<vmem>>, %arg2: memref<1x128xf32, #tpu.memory_space<vmem>>, %arg3: memref<1x128xf32, #tpu.memory_space<vmem>>, %arg4: memref<16x128xf32, #tpu.memory_space<vmem>>) attributes {dimension_semantics = [#tpu.dimension_semantics<parallel>], iteration_bounds = array<i64: 1>, scalar_prefetch = 0 : i64, scratch_operands = 0 : i64, tpu.core_type = #tpu.core_type<tc>, window_params = [{transform_indices = @transform_0, window_bounds = array<i64: 16, 128>}, {pipeline_mode = #tpu.pipeline_mode<synchronous>, transform_indices = @transform_1, window_bounds = array<i64: 1, 128>}, {pipeline_mode = #tpu.pipeline_mode<synchronous>, transform_indices = @transform_2, window_bounds = array<i64: 1, 128>}, {transform_indices = @transform_3, window_bounds = array<i64: 16, 128>}]} {
    %c0 = arith.constant 0 : index
    %c0_0 = arith.constant 0 : index
    %0 = vector.load %arg1[%c0, %c0_0] : memref<16x128xf32, #tpu.memory_space<vmem>>, vector<16x128xf32>
    %c0_1 = arith.constant 0 : index
    %c0_2 = arith.constant 0 : index
    %1 = vector.load %arg2[%c0_1, %c0_2] : memref<1x128xf32, #tpu.memory_space<vmem>>, vector<1x128xf32>
    %2 = vector.broadcast %1 : vector<1x128xf32> to vector<16x128xf32>
    %3 = arith.mulf %0, %2 : vector<16x128xf32>
    %c0_3 = arith.constant 0 : index
    %c0_4 = arith.constant 0 : index
    %4 = vector.load %arg3[%c0_3, %c0_4] : memref<1x128xf32, #tpu.memory_space<vmem>>, vector<1x128xf32>
    %5 = vector.broadcast %4 : vector<1x128xf32> to vector<16x128xf32>
    %6 = arith.addf %3, %5 : vector<16x128xf32>
    %cst = arith.constant 0.000000e+00 : f32
    %7 = vector.broadcast %cst : f32 to vector<16x128xf32>
    %8 = arith.maximumf %6, %7 : vector<16x128xf32>
    %c0_5 = arith.constant 0 : index
    %c0_6 = arith.constant 0 : index
    %9 = vector.load %arg4[%c0_5, %c0_6] : memref<16x128xf32, #tpu.memory_space<vmem>>, vector<16x128xf32>
    tpu.vector_store %arg4[%c0_5, %c0_6], %8 {strides = array<i32>} : memref<16x128xf32, #tpu.memory_space<vmem>>, vector<16x128xf32>,
    return
  }
  func.func @transform_0(%arg0: i32) -> (i32, i32) {
    %c0_i32 = arith.constant 0 : i32
    %c0_i32_0 = arith.constant 0 : i32
    return %arg0, %c0_i32 : i32, i32
  }
  func.func @transform_1(%arg0: i32) -> (i32, i32) {
    %c0_i32 = arith.constant 0 : i32
    %c0_i32_0 = arith.constant 0 : i32
    %c0_i32_1 = arith.constant 0 : i32
    return %c0_i32, %c0_i32_0 : i32, i32
  }
  func.func @transform_2(%arg0: i32) -> (i32, i32) {
    %c0_i32 = arith.constant 0 : i32
    %c0_i32_0 = arith.constant 0 : i32
    %c0_i32_1 = arith.constant 0 : i32
    return %c0_i32, %c0_i32_0 : i32, i32
  }
  func.func @transform_3(%arg0: i32) -> (i32, i32) {
    %c0_i32 = arith.constant 0 : i32
    %c0_i32_0 = arith.constant 0 : i32
    return %arg0, %c0_i32 : i32, i32
  }
}

module attributes {stable_mosaic.version = 11 : i64} {
  func.func @kernel(%arg0: i32, %arg1: i32, %arg2: i32, %arg3: memref<16x256xbf16, #tpu.memory_space<vmem>>, %arg4: memref<256x128xbf16, #tpu.memory_space<vmem>>, %arg5: memref<16x128xf32, #tpu.memory_space<vmem>>) attributes {dimension_semantics = [#tpu.dimension_semantics<parallel>, #tpu.dimension_semantics<parallel>, #tpu.dimension_semantics<arbitrary>], iteration_bounds = array<i64: 1, 1, 1>, scalar_prefetch = 0 : i64, scratch_operands = 0 : i64, tpu.core_type = #tpu.core_type<tc>, window_params = [{transform_indices = @transform_0, window_bounds = array<i64: 16, 256>}, {transform_indices = @transform_1, window_bounds = array<i64: 256, 128>}, {transform_indices = @transform_2, window_bounds = array<i64: 16, 128>}]} {
    %c0 = arith.constant 0 : index
    %c0_0 = arith.constant 0 : index
    %0 = vector.load %arg3[%c0, %c0_0] : memref<16x256xbf16, #tpu.memory_space<vmem>>, vector<16x256xbf16>
    %c0_1 = arith.constant 0 : index
    %c0_2 = arith.constant 0 : index
    %1 = vector.load %arg4[%c0_1, %c0_2] : memref<256x128xbf16, #tpu.memory_space<vmem>>, vector<256x128xbf16>
    %cst = arith.constant dense<0.000000e+00> : vector<16x128xf32>
    %2 = tpu.matmul %0, %1, %cst {dimension_numbers = #tpu.dot_dimension_numbers<[1], [0], [0], [1], [0, 0, 1, 1], [], []>} : vector<16x256xbf16>, vector<256x128xbf16>, vector<16x128xf32> -> vector<16x128xf32>
    %c0_3 = arith.constant 0 : index
    %c0_4 = arith.constant 0 : index
    %3 = vector.load %arg5[%c0_3, %c0_4] : memref<16x128xf32, #tpu.memory_space<vmem>>, vector<16x128xf32>
    tpu.vector_store %arg5[%c0_3, %c0_4], %2 {strides = array<i32>} : memref<16x128xf32, #tpu.memory_space<vmem>>, vector<16x128xf32>,
    return
  }
  func.func @transform_0(%arg0: i32, %arg1: i32, %arg2: i32) -> (i32, i32) {
    %c0_i32 = arith.constant 0 : i32
    return %arg0, %arg2 : i32, i32
  }
  func.func @transform_1(%arg0: i32, %arg1: i32, %arg2: i32) -> (i32, i32) {
    %c0_i32 = arith.constant 0 : i32
    return %arg2, %arg1 : i32, i32
  }
  func.func @transform_2(%arg0: i32, %arg1: i32, %arg2: i32) -> (i32, i32) {
    %c0_i32 = arith.constant 0 : i32
    return %arg0, %arg1 : i32, i32
  }
}

module attributes {stable_mosaic.version = 11 : i64} {
  func.func @kernel(%arg0: i32, %arg1: memref<16x128xf32, #tpu.memory_space<vmem>>, %arg2: memref<1x128xf32, #tpu.memory_space<vmem>>, %arg3: memref<1x128xf32, #tpu.memory_space<vmem>>, %arg4: memref<1x128xf32, #tpu.memory_space<vmem>>, %arg5: memref<1x128xf32, #tpu.memory_space<vmem>>, %arg6: memref<1x128xf32, #tpu.memory_space<vmem>>, %arg7: memref<1x128xf32, #tpu.memory_space<vmem>>) attributes {dimension_semantics = [#tpu.dimension_semantics<arbitrary>], iteration_bounds = array<i64: 1>, scalar_prefetch = 0 : i64, scratch_operands = 2 : i64, tpu.core_type = #tpu.core_type<tc>, window_params = [{transform_indices = @transform_0, window_bounds = array<i64: 16, 128>}, {pipeline_mode = #tpu.pipeline_mode<synchronous>, transform_indices = @transform_1, window_bounds = array<i64: 1, 128>}, {pipeline_mode = #tpu.pipeline_mode<synchronous>, transform_indices = @transform_2, window_bounds = array<i64: 1, 128>}, {pipeline_mode = #tpu.pipeline_mode<synchronous>, transform_indices = @transform_3, window_bounds = array<i64: 1, 128>}, {pipeline_mode = #tpu.pipeline_mode<synchronous>, transform_indices = @transform_4, window_bounds = array<i64: 1, 128>}]} {
    %c0_i32 = arith.constant 0 : i32
    %0 = arith.cmpi eq, %arg0, %c0_i32 : i32
    %1 = arith.extui %0 : i1 to i32
    %c0_i32_0 = arith.constant 0 : i32
    %2 = arith.cmpi ne, %1, %c0_i32_0 : i32
    scf.if %2 {
      %cst_13 = arith.constant 0.000000e+00 : f32
      %18 = vector.broadcast %cst_13 : f32 to vector<1x128xf32>
      %c0_14 = arith.constant 0 : index
      %c0_15 = arith.constant 0 : index
      %19 = vector.load %arg6[%c0_14, %c0_15] : memref<1x128xf32, #tpu.memory_space<vmem>>, vector<1x128xf32>
      tpu.vector_store %arg6[%c0_14, %c0_15], %18 {strides = array<i32>} : memref<1x128xf32, #tpu.memory_space<vmem>>, vector<1x128xf32>,
      %cst_16 = arith.constant 0.000000e+00 : f32
      %20 = vector.broadcast %cst_16 : f32 to vector<1x128xf32>
      %c0_17 = arith.constant 0 : index
      %c0_18 = arith.constant 0 : index
      %21 = vector.load %arg7[%c0_17, %c0_18] : memref<1x128xf32, #tpu.memory_space<vmem>>, vector<1x128xf32>
      tpu.vector_store %arg7[%c0_17, %c0_18], %20 {strides = array<i32>} : memref<1x128xf32, #tpu.memory_space<vmem>>, vector<1x128xf32>,
    } else {
    }
    %c0 = arith.constant 0 : index
    %c0_1 = arith.constant 0 : index
    %3 = vector.load %arg1[%c0, %c0_1] : memref<16x128xf32, #tpu.memory_space<vmem>>, vector<16x128xf32>
    %c0_2 = arith.constant 0 : index
    %c0_3 = arith.constant 0 : index
    %4 = vector.load %arg6[%c0_2, %c0_3] : memref<1x128xf32, #tpu.memory_space<vmem>>, vector<1x128xf32>
    %cst = arith.constant dense<0.000000e+00> : vector<128xf32>
    %5 = vector.multi_reduction <add>, %3, %cst [0] : vector<16x128xf32> to vector<128xf32>
    %6 = vector.shape_cast %5 : vector<128xf32> to vector<1x128xf32>
    %7 = arith.addf %4, %6 : vector<1x128xf32>
    %c0_4 = arith.constant 0 : index
    %c0_5 = arith.constant 0 : index
    %8 = vector.load %arg6[%c0_4, %c0_5] : memref<1x128xf32, #tpu.memory_space<vmem>>, vector<1x128xf32>
    tpu.vector_store %arg6[%c0_4, %c0_5], %7 {strides = array<i32>} : memref<1x128xf32, #tpu.memory_space<vmem>>, vector<1x128xf32>,
    %c0_6 = arith.constant 0 : index
    %c0_7 = arith.constant 0 : index
    %9 = vector.load %arg7[%c0_6, %c0_7] : memref<1x128xf32, #tpu.memory_space<vmem>>, vector<1x128xf32>
    %10 = arith.mulf %3, %3 : vector<16x128xf32>
    %cst_8 = arith.constant dense<0.000000e+00> : vector<128xf32>
    %11 = vector.multi_reduction <add>, %10, %cst_8 [0] : vector<16x128xf32> to vector<128xf32>
    %12 = vector.shape_cast %11 : vector<128xf32> to vector<1x128xf32>
    %13 = arith.addf %9, %12 : vector<1x128xf32>
    %c0_9 = arith.constant 0 : index
    %c0_10 = arith.constant 0 : index
    %14 = vector.load %arg7[%c0_9, %c0_10] : memref<1x128xf32, #tpu.memory_space<vmem>>, vector<1x128xf32>
    tpu.vector_store %arg7[%c0_9, %c0_10], %13 {strides = array<i32>} : memref<1x128xf32, #tpu.memory_space<vmem>>, vector<1x128xf32>,
    %c0_i32_11 = arith.constant 0 : i32
    %15 = arith.cmpi eq, %arg0, %c0_i32_11 : i32
    %16 = arith.extui %15 : i1 to i32
    %c0_i32_12 = arith.constant 0 : i32
    %17 = arith.cmpi ne, %16, %c0_i32_12 : i32
    scf.if %17 {
      %c0_13 = arith.constant 0 : index
      %c0_14 = arith.constant 0 : index
      %18 = vector.load %arg6[%c0_13, %c0_14] : memref<1x128xf32, #tpu.memory_space<vmem>>, vector<1x128xf32>
      %cst_15 = arith.constant 5.000000e-01 : f32
      %19 = vector.broadcast %cst_15 : f32 to vector<1x128xf32>
      %20 = arith.mulf %18, %19 : vector<1x128xf32>
      %c0_16 = arith.constant 0 : index
      %c0_17 = arith.constant 0 : index
      %21 = vector.load %arg7[%c0_16, %c0_17] : memref<1x128xf32, #tpu.memory_space<vmem>>, vector<1x128xf32>
      %cst_18 = arith.constant 5.000000e-01 : f32
      %22 = vector.broadcast %cst_18 : f32 to vector<1x128xf32>
      %23 = arith.mulf %21, %22 : vector<1x128xf32>
      %24 = arith.mulf %20, %20 : vector<1x128xf32>
      %25 = arith.subf %23, %24 : vector<1x128xf32>
      %cst_19 = arith.constant 0.000000e+00 : f32
      %26 = vector.broadcast %cst_19 : f32 to vector<1x128xf32>
      %27 = arith.maximumf %25, %26 : vector<1x128xf32>
      %c0_20 = arith.constant 0 : index
      %c0_21 = arith.constant 0 : index
      %28 = vector.load %arg2[%c0_20, %c0_21] : memref<1x128xf32, #tpu.memory_space<vmem>>, vector<1x128xf32>
      %cst_22 = arith.constant 9.99999974E-6 : f32
      %29 = vector.broadcast %cst_22 : f32 to vector<1x128xf32>
      %30 = arith.addf %27, %29 : vector<1x128xf32>
      %31 = math.rsqrt %30 : vector<1x128xf32>
      %32 = arith.mulf %28, %31 : vector<1x128xf32>
      %c0_23 = arith.constant 0 : index
      %c0_24 = arith.constant 0 : index
      %33 = vector.load %arg4[%c0_23, %c0_24] : memref<1x128xf32, #tpu.memory_space<vmem>>, vector<1x128xf32>
      tpu.vector_store %arg4[%c0_23, %c0_24], %32 {strides = array<i32>} : memref<1x128xf32, #tpu.memory_space<vmem>>, vector<1x128xf32>,
      %c0_25 = arith.constant 0 : index
      %c0_26 = arith.constant 0 : index
      %34 = vector.load %arg3[%c0_25, %c0_26] : memref<1x128xf32, #tpu.memory_space<vmem>>, vector<1x128xf32>
      %35 = arith.mulf %20, %32 : vector<1x128xf32>
      %36 = arith.subf %34, %35 : vector<1x128xf32>
      %c0_27 = arith.constant 0 : index
      %c0_28 = arith.constant 0 : index
      %37 = vector.load %arg5[%c0_27, %c0_28] : memref<1x128xf32, #tpu.memory_space<vmem>>, vector<1x128xf32>
      tpu.vector_store %arg5[%c0_27, %c0_28], %36 {strides = array<i32>} : memref<1x128xf32, #tpu.memory_space<vmem>>, vector<1x128xf32>,
    } else {
    }
    return
  }
  func.func @transform_0(%arg0: i32) -> (i32, i32) {
    %c0_i32 = arith.constant 0 : i32
    %c0_i32_0 = arith.constant 0 : i32
    return %arg0, %c0_i32 : i32, i32
  }
  func.func @transform_1(%arg0: i32) -> (i32, i32) {
    %c0_i32 = arith.constant 0 : i32
    %c0_i32_0 = arith.constant 0 : i32
    %c0_i32_1 = arith.constant 0 : i32
    return %c0_i32, %c0_i32_0 : i32, i32
  }
  func.func @transform_2(%arg0: i32) -> (i32, i32) {
    %c0_i32 = arith.constant 0 : i32
    %c0_i32_0 = arith.constant 0 : i32
    %c0_i32_1 = arith.constant 0 : i32
    return %c0_i32, %c0_i32_0 : i32, i32
  }
  func.func @transform_3(%arg0: i32) -> (i32, i32) {
    %c0_i32 = arith.constant 0 : i32
    %c0_i32_0 = arith.constant 0 : i32
    %c0_i32_1 = arith.constant 0 : i32
    return %c0_i32, %c0_i32_0 : i32, i32
  }
  func.func @transform_4(%arg0: i32) -> (i32, i32) {
    %c0_i32 = arith.constant 0 : i32
    %c0_i32_0 = arith.constant 0 : i32
    %c0_i32_1 = arith.constant 0 : i32
    return %c0_i32, %c0_i32_0 : i32, i32
  }
}

module attributes {stable_mosaic.version = 11 : i64} {
  func.func @kernel(%arg0: memref<8x8x128xf32, #tpu.memory_space<vmem>>, %arg1: memref<1x128xf32, #tpu.memory_space<vmem>>, %arg2: memref<1x128xf32, #tpu.memory_space<vmem>>, %arg3: memref<128x128xbf16, #tpu.memory_space<vmem>>, %arg4: memref<1x128xf32, #tpu.memory_space<vmem>>, %arg5: memref<8x128xf32, #tpu.memory_space<vmem>>) attributes {dimension_semantics = [], scalar_prefetch = 0 : i64, scratch_operands = 0 : i64, tpu.core_type = #tpu.core_type<tc>} {
    %c0 = arith.constant 0 : index
    %c0_0 = arith.constant 0 : index
    %c0_1 = arith.constant 0 : index
    %0 = vector.load %arg0[%c0, %c0_0, %c0_1] : memref<8x8x128xf32, #tpu.memory_space<vmem>>, vector<8x8x128xf32>
    %c0_2 = arith.constant 0 : index
    %c0_3 = arith.constant 0 : index
    %1 = vector.load %arg1[%c0_2, %c0_3] : memref<1x128xf32, #tpu.memory_space<vmem>>, vector<1x128xf32>
    %2 = vector.shape_cast %1 : vector<1x128xf32> to vector<1x1x128xf32>
    %3 = vector.broadcast %2 : vector<1x1x128xf32> to vector<8x8x128xf32>
    %4 = arith.mulf %0, %3 : vector<8x8x128xf32>
    %c0_4 = arith.constant 0 : index
    %c0_5 = arith.constant 0 : index
    %5 = vector.load %arg2[%c0_4, %c0_5] : memref<1x128xf32, #tpu.memory_space<vmem>>, vector<1x128xf32>
    %6 = vector.shape_cast %5 : vector<1x128xf32> to vector<1x1x128xf32>
    %7 = vector.broadcast %6 : vector<1x1x128xf32> to vector<8x8x128xf32>
    %8 = arith.addf %4, %7 : vector<8x8x128xf32>
    %cst = arith.constant 0.000000e+00 : f32
    %9 = vector.broadcast %cst : f32 to vector<8x8x128xf32>
    %10 = arith.maximumf %8, %9 : vector<8x8x128xf32>
    %11 = tpu.iota {dimensions = array<i32: 1>} : vector<8x8x128xi32>
    %c1_i32 = arith.constant 1 : i32
    %12 = vector.broadcast %c1_i32 : i32 to vector<8x8x128xi32>
    %13 = arith.cmpi slt, %11, %12 : vector<8x8x128xi32>
    %cst_6 = arith.constant 0.000000e+00 : f32
    %14 = vector.broadcast %cst_6 : f32 to vector<8x8x128xf32>
    %15 = arith.select %13, %10, %14 : vector<8x8x128xi1>, vector<8x8x128xf32>
    %cst_7 = arith.constant dense<0.000000e+00> : vector<8x128xf32>
    %16 = vector.multi_reduction <add>, %15, %cst_7 [1] : vector<8x8x128xf32> to vector<8x128xf32>
    %cst_8 = arith.constant 1.000000e+00 : f32
    %17 = vector.broadcast %cst_8 : f32 to vector<8x128xf32>
    %18 = arith.mulf %16, %17 : vector<8x128xf32>
    %19 = arith.truncf %18 : vector<8x128xf32> to vector<8x128xbf16>
    %c0_9 = arith.constant 0 : index
    %c0_10 = arith.constant 0 : index
    %20 = vector.load %arg3[%c0_9, %c0_10] : memref<128x128xbf16, #tpu.memory_space<vmem>>, vector<128x128xbf16>
    %cst_11 = arith.constant dense<0.000000e+00> : vector<8x128xf32>
    %21 = tpu.matmul %19, %20, %cst_11 {dimension_numbers = #tpu.dot_dimension_numbers<[1], [0], [0], [1], [0, 0, 1, 1], [], []>} : vector<8x128xbf16>, vector<128x128xbf16>, vector<8x128xf32> -> vector<8x128xf32>
    %c0_12 = arith.constant 0 : index
    %c0_13 = arith.constant 0 : index
    %22 = vector.load %arg4[%c0_12, %c0_13] : memref<1x128xf32, #tpu.memory_space<vmem>>, vector<1x128xf32>
    %23 = vector.broadcast %22 : vector<1x128xf32> to vector<8x128xf32>
    %24 = arith.addf %21, %23 : vector<8x128xf32>
    %c0_14 = arith.constant 0 : index
    %c0_15 = arith.constant 0 : index
    %25 = vector.load %arg5[%c0_14, %c0_15] : memref<8x128xf32, #tpu.memory_space<vmem>>, vector<8x128xf32>
    tpu.vector_store %arg5[%c0_14, %c0_15], %24 {strides = array<i32>} : memref<8x128xf32, #tpu.memory_space<vmem>>, vector<8x128xf32>,
    return
  }
}

</mosaic_0001>

<bundles_post_ra>
// kernel: densenet_forward.52
= control target key start
LH: loop header
LB: loop body
LE: loop exit
PB: predicated region body
PF: predicated region fallthrough
CT: control target
= control target key end

     0   :  { %v324_v0 = vmov 0.0   ;;  %s554_s0 = inlined_call_operand.vmem [shape: f32[512,128], index: 0, kind: input, shape index: {}]   ;;  %s555_s1 = inlined_call_operand.vmem [shape: f32[1,128], index: 1, kind: input, shape index: {}]   ;;  %s556_s2 = inlined_call_operand.vmem [shape: f32[1,128], index: 2, kind: input, shape index: {}]   ;;  %s557_s3 = inlined_call_operand.vmem [shape: f32[1,128], index: 3, kind: output, shape index: {0}]   ;;  %s558_s4 = inlined_call_operand.vmem [shape: f32[1,128], index: 4, kind: output, shape index: {1}]  }
   0x1   :  { %20 = vst [vmem:[#allocation2] sm:$0x1] %v324_v0  ;;  %21 = vst [vmem:[#allocation3] sm:$0x1] %v324_v0  ;;  %v22_v1 = vld [vmem:[%s554_s0] sm:$0xff]  ;;  %v23_v2 = vld [vmem:[%s554_s0 + $0x8] sm:$0xff] }
   0x2   :  { %v24_v3 = vld [vmem:[%s554_s0 + $0x10] sm:$0xff]  ;;  %v25_v4 = vld [vmem:[%s554_s0 + $0x18] sm:$0xff]  ;;  %v87_v5 = vadd.f32 %v23_v2, %v22_v1  ;;  %v159_v6 = vmul.f32 %v22_v1, %v22_v1  ;;  %v160_v7 = vmul.f32 %v23_v2, %v23_v2  ;;  %v26_v9 = vld [vmem:[%s554_s0 + $0x20] sm:$0xff] }
   0x3   :  { %v161_v8 = vmul.f32 %v24_v3, %v24_v3  ;;  %v162_v11 = vmul.f32 %v25_v4, %v25_v4  ;;  %v27_v13 = vld [vmem:[%s554_s0 + $0x28] sm:$0xff]  ;;  %v163_v15 = vmul.f32 %v26_v9, %v26_v9  ;;  %v28_v17 = vld [vmem:[%s554_s0 + $0x30] sm:$0xff]  ;;  %v29_v21 = vld [vmem:[%s554_s0 + $0x38] sm:$0xff] }
   0x4   :  { %v88_v10 = vadd.f32 %v87_v5, %v24_v3  ;;  %v223_v12 = vadd.f32 %v160_v7, %v159_v6  ;;  %v164_v19 = vmul.f32 %v27_v13, %v27_v13  ;;  %v165_v23 = vmul.f32 %v28_v17, %v28_v17  ;;  %v30_v25 = vld [vmem:[%s554_s0 + $0x40] sm:$0xff]  ;;  %v31_v29 = vld [vmem:[%s554_s0 + $0x48] sm:$0xff]  ;;  %v32_v33 = vld [vmem:[%s554_s0 + $0x50] sm:$0xff] }
   0x5   :  { %v166_v27 = vmul.f32 %v29_v21, %v29_v21  ;;  %v167_v31 = vmul.f32 %v30_v25, %v30_v25  ;;  %v168_v35 = vmul.f32 %v31_v29, %v31_v29  ;;  %v33_v37 = vld [vmem:[%s554_s0 + $0x58] sm:$0xff]  ;;  %v169_v39 = vmul.f32 %v32_v33, %v32_v33  ;;  %v34_v41 = vld [vmem:[%s554_s0 + $0x60] sm:$0xff]  ;;  %v35_v45 = vld [vmem:[%s554_s0 + $0x68] sm:$0xff] }
   0x6   :  { %v89_v14 = vadd.f32 %v88_v10, %v25_v4  ;;  %v224_v16 = vadd.f32 %v223_v12, %v161_v8  ;;  %v170_v43 = vmul.f32 %v33_v37, %v33_v37  ;;  %v171_v47 = vmul.f32 %v34_v41, %v34_v41  ;;  %v36_v49 = vld [vmem:[%s554_s0 + $0x70] sm:$0xff]  ;;  %v37_v53 = vld [vmem:[%s554_s0 + $0x78] sm:$0xff]  ;;  %v38_v57 = vld [vmem:[%s554_s0 + $0x80] sm:$0xff] }
   0x7   :  { %v172_v51 = vmul.f32 %v35_v45, %v35_v45  ;;  %v173_v55 = vmul.f32 %v36_v49, %v36_v49  ;;  %v174_v59 = vmul.f32 %v37_v53, %v37_v53  ;;  %v39_v61 = vld [vmem:[%s554_s0 + $0x88] sm:$0xff]  ;;  %v175_v63 = vmul.f32 %v38_v57, %v38_v57  ;;  %v40_v1 = vld [vmem:[%s554_s0 + $0x90] sm:$0xff]  ;;  %v41_v5 = vld [vmem:[%s554_s0 + $0x98] sm:$0xff] }
   0x8   :  { %v90_v18 = vadd.f32 %v89_v14, %v26_v9  ;;  %v225_v20 = vadd.f32 %v224_v16, %v162_v11  ;;  %v176_v3 = vmul.f32 %v39_v61, %v39_v61  ;;  %v177_v7 = vmul.f32 %v40_v1, %v40_v1  ;;  %v42_v9 = vld [vmem:[%s554_s0 + $0xa0] sm:$0xff] }
   0x9   :  { %v178_v11 = vmul.f32 %v41_v5, %v41_v5 }
   0xa   :  { %v91_v22 = vadd.f32 %v90_v18, %v27_v13  ;;  %v226_v24 = vadd.f32 %v225_v20, %v163_v15  ;;  %v43_v13 = vld [vmem:[%s554_s0 + $0xa8] sm:$0xff]  ;;  %v179_v15 = vmul.f32 %v42_v9, %v42_v9 }
   0xc   :  { %v92_v26 = vadd.f32 %v91_v22, %v28_v17  ;;  %v227_v28 = vadd.f32 %v226_v24, %v164_v19  ;;  %v44_v17 = vld [vmem:[%s554_s0 + $0xb0] sm:$0xff]  ;;  %v180_v19 = vmul.f32 %v43_v13, %v43_v13 }
   0xe   :  { %v93_v30 = vadd.f32 %v92_v26, %v29_v21  ;;  %v228_v32 = vadd.f32 %v227_v28, %v165_v23  ;;  %v45_v21 = vld [vmem:[%s554_s0 + $0xb8] sm:$0xff]  ;;  %v181_v23 = vmul.f32 %v44_v17, %v44_v17 }
  0x10   :  { %v94_v34 = vadd.f32 %v93_v30, %v30_v25  ;;  %v229_v36 = vadd.f32 %v228_v32, %v166_v27  ;;  %v46_v25 = vld [vmem:[%s554_s0 + $0xc0] sm:$0xff]  ;;  %v182_v27 = vmul.f32 %v45_v21, %v45_v21 }
  0x12   :  { %v95_v38 = vadd.f32 %v94_v34, %v31_v29  ;;  %v230_v40 = vadd.f32 %v229_v36, %v167_v31  ;;  %v47_v29 = vld [vmem:[%s554_s0 + $0xc8] sm:$0xff]  ;;  %v183_v31 = vmul.f32 %v46_v25, %v46_v25 }
  0x14   :  { %v96_v42 = vadd.f32 %v95_v38, %v32_v33  ;;  %v231_v44 = vadd.f32 %v230_v40, %v168_v35  ;;  %v48_v33 = vld [vmem:[%s554_s0 + $0xd0] sm:$0xff]  ;;  %v184_v35 = vmul.f32 %v47_v29, %v47_v29 }
  0x16   :  { %v97_v46 = vadd.f32 %v96_v42, %v33_v37  ;;  %v232_v48 = vadd.f32 %v231_v44, %v169_v39  ;;  %v49_v37 = vld [vmem:[%s554_s0 + $0xd8] sm:$0xff]  ;;  %v185_v39 = vmul.f32 %v48_v33, %v48_v33 }
  0x18   :  { %v98_v50 = vadd.f32 %v97_v46, %v34_v41  ;;  %v233_v52 = vadd.f32 %v232_v48, %v170_v43  ;;  %v50_v41 = vld [vmem:[%s554_s0 + $0xe0] sm:$0xff]  ;;  %v186_v43 = vmul.f32 %v49_v37, %v49_v37 }
  0x1a   :  { %v99_v54 = vadd.f32 %v98_v50, %v35_v45  ;;  %v234_v56 = vadd.f32 %v233_v52, %v171_v47  ;;  %v51_v45 = vld [vmem:[%s554_s0 + $0xe8] sm:$0xff]  ;;  %v187_v47 = vmul.f32 %v50_v41, %v50_v41 }
  0x1c   :  { %v100_v58 = vadd.f32 %v99_v54, %v36_v49  ;;  %v235_v60 = vadd.f32 %v234_v56, %v172_v51  ;;  %v52_v49 = vld [vmem:[%s554_s0 + $0xf0] sm:$0xff]  ;;  %v188_v51 = vmul.f32 %v51_v45, %v51_v45 }
  0x1e   :  { %v101_v62 = vadd.f32 %v100_v58, %v37_v53  ;;  %v236_v0 = vadd.f32 %v235_v60, %v173_v55  ;;  %v53_v53 = vld [vmem:[%s554_s0 + $0xf8] sm:$0xff]  ;;  %v189_v55 = vmul.f32 %v52_v49, %v52_v49 }
  0x20   :  { %v102_v2 = vadd.f32 %v101_v62, %v38_v57  ;;  %v237_v4 = vadd.f32 %v236_v0, %v174_v59  ;;  %v54_v57 = vld [vmem:[%s554_s0 + $0x100] sm:$0xff]  ;;  %v190_v59 = vmul.f32 %v53_v53, %v53_v53 }
  0x22   :  { %v103_v6 = vadd.f32 %v102_v2, %v39_v61  ;;  %v238_v8 = vadd.f32 %v237_v4, %v175_v63  ;;  %v55_v61 = vld [vmem:[%s554_s0 + $0x108] sm:$0xff]  ;;  %v191_v63 = vmul.f32 %v54_v57, %v54_v57 }
  0x24   :  { %v104_v10 = vadd.f32 %v103_v6, %v40_v1  ;;  %v239_v12 = vadd.f32 %v238_v8, %v176_v3  ;;  %v56_v1 = vld [vmem:[%s554_s0 + $0x110] sm:$0xff]  ;;  %v192_v3 = vmul.f32 %v55_v61, %v55_v61 }
  0x26   :  { %v105_v14 = vadd.f32 %v104_v10, %v41_v5  ;;  %v240_v16 = vadd.f32 %v239_v12, %v177_v7  ;;  %v57_v5 = vld [vmem:[%s554_s0 + $0x118] sm:$0xff]  ;;  %v193_v7 = vmul.f32 %v56_v1, %v56_v1 }
  0x28   :  { %v106_v18 = vadd.f32 %v105_v14, %v42_v9  ;;  %v241_v20 = vadd.f32 %v240_v16, %v178_v11  ;;  %v58_v9 = vld [vmem:[%s554_s0 + $0x120] sm:$0xff]  ;;  %v194_v11 = vmul.f32 %v57_v5, %v57_v5 }
  0x2a   :  { %v107_v22 = vadd.f32 %v106_v18, %v43_v13  ;;  %v242_v24 = vadd.f32 %v241_v20, %v179_v15  ;;  %v59_v13 = vld [vmem:[%s554_s0 + $0x128] sm:$0xff]  ;;  %v195_v15 = vmul.f32 %v58_v9, %v58_v9 }
  0x2c   :  { %v108_v26 = vadd.f32 %v107_v22, %v44_v17  ;;  %v243_v28 = vadd.f32 %v242_v24, %v180_v19  ;;  %v60_v17 = vld [vmem:[%s554_s0 + $0x130] sm:$0xff]  ;;  %v196_v19 = vmul.f32 %v59_v13, %v59_v13 }
  0x2e   :  { %v109_v30 = vadd.f32 %v108_v26, %v45_v21  ;;  %v244_v32 = vadd.f32 %v243_v28, %v181_v23  ;;  %v61_v21 = vld [vmem:[%s554_s0 + $0x138] sm:$0xff]  ;;  %v197_v23 = vmul.f32 %v60_v17, %v60_v17 }
  0x30   :  { %v110_v34 = vadd.f32 %v109_v30, %v46_v25  ;;  %v245_v36 = vadd.f32 %v244_v32, %v182_v27  ;;  %v62_v25 = vld [vmem:[%s554_s0 + $0x140] sm:$0xff]  ;;  %v198_v27 = vmul.f32 %v61_v21, %v61_v21 }
  0x32   :  { %v111_v38 = vadd.f32 %v110_v34, %v47_v29  ;;  %v246_v40 = vadd.f32 %v245_v36, %v183_v31  ;;  %v63_v29 = vld [vmem:[%s554_s0 + $0x148] sm:$0xff]  ;;  %v199_v31 = vmul.f32 %v62_v25, %v62_v25 }
  0x34   :  { %v112_v42 = vadd.f32 %v111_v38, %v48_v33  ;;  %v247_v44 = vadd.f32 %v246_v40, %v184_v35  ;;  %v64_v33 = vld [vmem:[%s554_s0 + $0x150] sm:$0xff]  ;;  %v200_v35 = vmul.f32 %v63_v29, %v63_v29 }
  0x36   :  { %v113_v46 = vadd.f32 %v112_v42, %v49_v37  ;;  %v248_v48 = vadd.f32 %v247_v44, %v185_v39  ;;  %v65_v37 = vld [vmem:[%s554_s0 + $0x158] sm:$0xff]  ;;  %v201_v39 = vmul.f32 %v64_v33, %v64_v33 }
  0x38   :  { %v114_v50 = vadd.f32 %v113_v46, %v50_v41  ;;  %v249_v52 = vadd.f32 %v248_v48, %v186_v43  ;;  %v66_v41 = vld [vmem:[%s554_s0 + $0x160] sm:$0xff]  ;;  %v202_v43 = vmul.f32 %v65_v37, %v65_v37 }
  0x3a   :  { %v115_v54 = vadd.f32 %v114_v50, %v51_v45  ;;  %v250_v56 = vadd.f32 %v249_v52, %v187_v47  ;;  %v67_v45 = vld [vmem:[%s554_s0 + $0x168] sm:$0xff]  ;;  %v203_v47 = vmul.f32 %v66_v41, %v66_v41 }
  0x3c   :  { %v116_v58 = vadd.f32 %v115_v54, %v52_v49  ;;  %v251_v60 = vadd.f32 %v250_v56, %v188_v51  ;;  %v68_v49 = vld [vmem:[%s554_s0 + $0x170] sm:$0xff]  ;;  %v204_v51 = vmul.f32 %v67_v45, %v67_v45 }
  0x3e   :  { %v117_v62 = vadd.f32 %v116_v58, %v53_v53  ;;  %v252_v0 = vadd.f32 %v251_v60, %v189_v55  ;;  %v69_v53 = vld [vmem:[%s554_s0 + $0x178] sm:$0xff]  ;;  %v205_v55 = vmul.f32 %v68_v49, %v68_v49 }
  0x40   :  { %v118_v2 = vadd.f32 %v117_v62, %v54_v57  ;;  %v253_v4 = vadd.f32 %v252_v0, %v190_v59  ;;  %v70_v57 = vld [vmem:[%s554_s0 + $0x180] sm:$0xff]  ;;  %v206_v59 = vmul.f32 %v69_v53, %v69_v53 }
  0x42   :  { %v119_v6 = vadd.f32 %v118_v2, %v55_v61  ;;  %v254_v8 = vadd.f32 %v253_v4, %v191_v63  ;;  %v71_v61 = vld [vmem:[%s554_s0 + $0x188] sm:$0xff]  ;;  %v207_v63 = vmul.f32 %v70_v57, %v70_v57 }
  0x44   :  { %v120_v10 = vadd.f32 %v119_v6, %v56_v1  ;;  %v255_v12 = vadd.f32 %v254_v8, %v192_v3  ;;  %v72_v1 = vld [vmem:[%s554_s0 + $0x190] sm:$0xff]  ;;  %v208_v3 = vmul.f32 %v71_v61, %v71_v61 }
  0x46   :  { %v121_v14 = vadd.f32 %v120_v10, %v57_v5  ;;  %v256_v16 = vadd.f32 %v255_v12, %v193_v7  ;;  %v73_v5 = vld [vmem:[%s554_s0 + $0x198] sm:$0xff]  ;;  %v209_v7 = vmul.f32 %v72_v1, %v72_v1 }
  0x48   :  { %v122_v18 = vadd.f32 %v121_v14, %v58_v9  ;;  %v257_v20 = vadd.f32 %v256_v16, %v194_v11  ;;  %v74_v9 = vld [vmem:[%s554_s0 + $0x1a0] sm:$0xff]  ;;  %v210_v11 = vmul.f32 %v73_v5, %v73_v5 }
  0x4a   :  { %v123_v22 = vadd.f32 %v122_v18, %v59_v13  ;;  %v258_v24 = vadd.f32 %v257_v20, %v195_v15  ;;  %v75_v13 = vld [vmem:[%s554_s0 + $0x1a8] sm:$0xff]  ;;  %v211_v15 = vmul.f32 %v74_v9, %v74_v9 }
  0x4c   :  { %v124_v26 = vadd.f32 %v123_v22, %v60_v17  ;;  %v259_v28 = vadd.f32 %v258_v24, %v196_v19  ;;  %v76_v17 = vld [vmem:[%s554_s0 + $0x1b0] sm:$0xff]  ;;  %v212_v19 = vmul.f32 %v75_v13, %v75_v13 }
  0x4e   :  { %v125_v30 = vadd.f32 %v124_v26, %v61_v21  ;;  %v260_v32 = vadd.f32 %v259_v28, %v197_v23  ;;  %v77_v21 = vld [vmem:[%s554_s0 + $0x1b8] sm:$0xff]  ;;  %v213_v23 = vmul.f32 %v76_v17, %v76_v17 }
  0x50   :  { %v126_v34 = vadd.f32 %v125_v30, %v62_v25  ;;  %v261_v36 = vadd.f32 %v260_v32, %v198_v27  ;;  %v78_v25 = vld [vmem:[%s554_s0 + $0x1c0] sm:$0xff]  ;;  %v214_v27 = vmul.f32 %v77_v21, %v77_v21 }
  0x52   :  { %v127_v38 = vadd.f32 %v126_v34, %v63_v29  ;;  %v262_v40 = vadd.f32 %v261_v36, %v199_v31  ;;  %v79_v29 = vld [vmem:[%s554_s0 + $0x1c8] sm:$0xff]  ;;  %v215_v31 = vmul.f32 %v78_v25, %v78_v25 }
  0x54   :  { %v128_v42 = vadd.f32 %v127_v38, %v64_v33  ;;  %v263_v44 = vadd.f32 %v262_v40, %v200_v35  ;;  %v80_v33 = vld [vmem:[%s554_s0 + $0x1d0] sm:$0xff]  ;;  %v216_v35 = vmul.f32 %v79_v29, %v79_v29 }
  0x56   :  { %v129_v46 = vadd.f32 %v128_v42, %v65_v37  ;;  %v264_v48 = vadd.f32 %v263_v44, %v201_v39  ;;  %v81_v37 = vld [vmem:[%s554_s0 + $0x1d8] sm:$0xff]  ;;  %v217_v39 = vmul.f32 %v80_v33, %v80_v33 }
  0x58   :  { %v130_v50 = vadd.f32 %v129_v46, %v66_v41  ;;  %v265_v52 = vadd.f32 %v264_v48, %v202_v43  ;;  %v82_v41 = vld [vmem:[%s554_s0 + $0x1e0] sm:$0xff]  ;;  %v218_v43 = vmul.f32 %v81_v37, %v81_v37 }
  0x5a   :  { %v131_v54 = vadd.f32 %v130_v50, %v67_v45  ;;  %v266_v56 = vadd.f32 %v265_v52, %v203_v47  ;;  %v83_v45 = vld [vmem:[%s554_s0 + $0x1e8] sm:$0xff]  ;;  %v219_v47 = vmul.f32 %v82_v41, %v82_v41 }
  0x5c   :  { %v132_v58 = vadd.f32 %v131_v54, %v68_v49  ;;  %v267_v60 = vadd.f32 %v266_v56, %v204_v51  ;;  %v84_v49 = vld [vmem:[%s554_s0 + $0x1f0] sm:$0xff]  ;;  %v220_v51 = vmul.f32 %v83_v45, %v83_v45 }
  0x5e   :  { %v133_v62 = vadd.f32 %v132_v58, %v69_v53  ;;  %v268_v0 = vadd.f32 %v267_v60, %v205_v55  ;;  %v85_v53 = vld [vmem:[%s554_s0 + $0x1f8] sm:$0xff]  ;;  %v221_v55 = vmul.f32 %v84_v49, %v84_v49 }
  0x5f   :  { %v222_v58 = vmul.f32 %v85_v53, %v85_v53 }
  0x60   :  { %v134_v2 = vadd.f32 %v133_v62, %v70_v57  ;;  %v269_v4 = vadd.f32 %v268_v0, %v206_v59 }
  0x62   :  { %v135_v6 = vadd.f32 %v134_v2, %v71_v61  ;;  %v270_v8 = vadd.f32 %v269_v4, %v207_v63 }
  0x64   :  { %v136_v10 = vadd.f32 %v135_v6, %v72_v1  ;;  %v271_v12 = vadd.f32 %v270_v8, %v208_v3 }
  0x66   :  { %v137_v14 = vadd.f32 %v136_v10, %v73_v5  ;;  %v272_v16 = vadd.f32 %v271_v12, %v209_v7  ;;  %v86_v7 = vld [vmem:[#allocation2] sm:$0x1]  ;;  %v158_v12 = vld [vmem:[#allocation3] sm:$0x1] }
  0x68   :  { %v138_v18 = vadd.f32 %v137_v14, %v74_v9  ;;  %v273_v20 = vadd.f32 %v272_v16, %v210_v11 }
  0x6a   :  { %v139_v22 = vadd.f32 %v138_v18, %v75_v13  ;;  %v274_v24 = vadd.f32 %v273_v20, %v211_v15 }
  0x6c   :  { %v140_v26 = vadd.f32 %v139_v22, %v76_v17  ;;  %v275_v28 = vadd.f32 %v274_v24, %v212_v19 }
  0x6e   :  { %v141_v30 = vadd.f32 %v140_v26, %v77_v21  ;;  %v276_v32 = vadd.f32 %v275_v28, %v213_v23  ;;  %v304_v23 = vld [vmem:[%s555_s1] sm:$0x1] }
  0x6f   :  { %v309_v26 = vld [vmem:[%s556_s2] sm:$0x1] }
  0x70   :  { %v142_v34 = vadd.f32 %v141_v30, %v78_v25  ;;  %v277_v36 = vadd.f32 %v276_v32, %v214_v27 }
  0x72   :  { %v143_v38 = vadd.f32 %v142_v34, %v79_v29  ;;  %v278_v40 = vadd.f32 %v277_v36, %v215_v31 }
  0x74   :  { %v144_v42 = vadd.f32 %v143_v38, %v80_v33  ;;  %v279_v44 = vadd.f32 %v278_v40, %v216_v35 }
  0x76   :  { %v145_v46 = vadd.f32 %v144_v42, %v81_v37  ;;  %v280_v48 = vadd.f32 %v279_v44, %v217_v39 }
  0x78   :  { %v146_v50 = vadd.f32 %v145_v46, %v82_v41  ;;  %v281_v52 = vadd.f32 %v280_v48, %v218_v43 }
  0x7a   :  { %v147_v54 = vadd.f32 %v146_v50, %v83_v45  ;;  %v282_v56 = vadd.f32 %v281_v52, %v219_v47 }
  0x7c   :  { %v148_v57 = vadd.f32 %v147_v54, %v84_v49  ;;  %v283_v59 = vadd.f32 %v282_v56, %v220_v51 }
  0x7e   :  { %v149_v60 = vadd.f32 %v148_v57, %v85_v53  ;;  %v284_v61 = vadd.f32 %v283_v59, %v221_v55 }
  0x80   :  { %v150_v62 = vrot.slane %v149_v60, 4  ;;  %v285_v63 = vadd.f32 %v284_v61, %v222_v58 }
  0x82   :  { %v151_v0 = vadd.f32 %v150_v62, %v149_v60  ;;  %v286_v1 = vrot.slane %v285_v63, 4 }
  0x84   :  { %v152_v2 = vrot.slane %v151_v0, 2  ;;  %v287_v3 = vadd.f32 %v286_v1, %v285_v63 }
  0x86   :  { %v153_v4 = vadd.f32 %v152_v2, %v151_v0  ;;  %v288_v5 = vrot.slane %v287_v3, 2 }
  0x88   :  { %v154_v6 = vrot.slane %v153_v4, 1  ;;  %v289_v8 = vadd.f32 %v288_v5, %v287_v3 }
  0x8a   :  { %v155_v9 = vadd.f32 %v154_v6, %v153_v4  ;;  %v290_v10 = vrot.slane %v289_v8, 1 }
  0x8c   :  { %v156_v11 = vadd.f32 %v155_v9, %v86_v7  ;;  %v291_v13 = vadd.f32 %v290_v10, %v289_v8 }
  0x8e   :  { %157 = vst [vmem:[#allocation2] sm:$0x1] %v156_v11  ;;  %v292_v14 = vadd.f32 %v291_v13, %v158_v12 }
  0x90   :  { %293 = vst [vmem:[#allocation3] sm:$0x1] %v292_v14 }
  0x95   :  { %v297_v15 = vld [vmem:[#allocation2] sm:$0x1] }
  0x96   :  { %v298_v16 = vmul.f32 0.001953125, %v297_v15 }
  0x97   :  { %v299_v17 = vld [vmem:[#allocation3] sm:$0x1] }
  0x98   :  { %v301_v18 = vmul.f32 %v298_v16, %v298_v16  ;;  %v300_v19 = vmul.f32 0.001953125, %v299_v17 }
  0x9a   :  { %v302_v20 = vsub.f32 %v300_v19, %v301_v18 }
  0x9c   :  { %v303_v21 = vmax.f32 %v302_v20, 0.0 }
  0x9e   :  { %v305_v22 = vadd.f32 1e-05, %v303_v21 }
  0xa0   :  { %322 = vrsqrt.f32 %v305_v22 }
  0xaa   :  { %v323_v24 = vpop.eup %322 }
  0xab   :  { %v307_v25 = vmul.f32 %v323_v24, %v304_v23 }
  0xad   :  { %308 = vst [vmem:[%s557_s3] sm:$0x1] %v307_v25  ;;  %v310_v27 = vmul.f32 %v307_v25, %v298_v16 }
  0xaf   :  { %v311_v28 = vsub.f32 %v309_v26, %v310_v27 }
  0xb1   :  { %312 = vst [vmem:[%s558_s4] sm:$0x1] %v311_v28 }

// kernel: densenet_forward.53
= control target key start
LH: loop header
LB: loop body
LE: loop exit
PB: predicated region body
PF: predicated region fallthrough
CT: control target
= control target key end

     0   :  { %s896_s0 = inlined_call_operand.vmem [shape: f32[512,128], index: 0, kind: input, shape index: {}]   ;;  %s897_s1 = inlined_call_operand.vmem [shape: f32[1,128], index: 1, kind: input, shape index: {}]   ;;  %s898_s2 = inlined_call_operand.vmem [shape: f32[1,128], index: 2, kind: input, shape index: {}]   ;;  %s899_s3 = inlined_call_operand.vmem [shape: f32[512,128], index: 3, kind: output, shape index: {}]  }
   0x1   :  { %v14_v0 = vld [vmem:[%s896_s0] sm:$0xff]  ;;  %v15_v4 = vld [vmem:[%s896_s0 + $0x8] sm:$0xff]  ;;  %v16_v5 = vld [vmem:[%s896_s0 + $0x10] sm:$0xff] }
   0x2   :  { %v380_v1 = vld [vmem:[%s897_s1] ss:$0 sm:$0xff]  ;;  %v17_v6 = vld [vmem:[%s896_s0 + $0x18] sm:$0xff]  ;;  %v19_v11 = vld [vmem:[%s896_s0 + $0x28] sm:$0xff] }
   0x3   :  { %v385_v2 = vld [vmem:[%s898_s2] ss:$0 sm:$0xff]  ;;  %v85_v3 = vmul.f32 %v380_v1, %v14_v0  ;;  %v86_v7 = vmul.f32 %v380_v1, %v15_v4  ;;  %v87_v8 = vmul.f32 %v380_v1, %v16_v5  ;;  %v88_v9 = vmul.f32 %v380_v1, %v17_v6  ;;  %v20_v12 = vld [vmem:[%s896_s0 + $0x30] sm:$0xff]  ;;  %v21_v17 = vld [vmem:[%s896_s0 + $0x38] sm:$0xff] }
   0x4   :  { %v18_v10 = vld [vmem:[%s896_s0 + $0x20] sm:$0xff]  ;;  %v90_v15 = vmul.f32 %v380_v1, %v19_v11  ;;  %v91_v16 = vmul.f32 %v380_v1, %v20_v12  ;;  %v92_v21 = vmul.f32 %v380_v1, %v21_v17  ;;  %v23_v27 = vld [vmem:[%s896_s0 + $0x48] sm:$0xff]  ;;  %v24_v28 = vld [vmem:[%s896_s0 + $0x50] sm:$0xff] }
   0x5   :  { %v156_v13 = vadd.f32 %v385_v2, %v85_v3  ;;  %v89_v14 = vmul.f32 %v380_v1, %v18_v10  ;;  %v157_v18 = vadd.f32 %v385_v2, %v86_v7  ;;  %v158_v19 = vadd.f32 %v385_v2, %v87_v8  ;;  %v22_v22 = vld [vmem:[%s896_s0 + $0x40] sm:$0xff]  ;;  %v25_v29 = vld [vmem:[%s896_s0 + $0x58] sm:$0xff]  ;;  %v27_v35 = vld [vmem:[%s896_s0 + $0x68] sm:$0xff] }
   0x6   :  { %v159_v20 = vadd.f32 %v385_v2, %v88_v9  ;;  %v161_v25 = vadd.f32 %v385_v2, %v90_v15  ;;  %v162_v26 = vadd.f32 %v385_v2, %v91_v16  ;;  %v163_v33 = vadd.f32 %v385_v2, %v92_v21  ;;  %v26_v34 = vld [vmem:[%s896_s0 + $0x60] sm:$0xff]  ;;  %v28_v36 = vld [vmem:[%s896_s0 + $0x70] sm:$0xff]  ;;  %v29_v41 = vld [vmem:[%s896_s0 + $0x78] sm:$0xff] }
   0x7   :  { %v220_v23 = vmax.f32 %v156_v13, 0.0  ;;  %v160_v24 = vadd.f32 %v385_v2, %v89_v14  ;;  %v221_v30 = vmax.f32 %v157_v18, 0.0  ;;  %v222_v31 = vmax.f32 %v158_v19, 0.0  ;;  %v30_v54 = vld [vmem:[%s896_s0 + $0x80] sm:$0xff]  ;;  %v31_v59 = vld [vmem:[%s896_s0 + $0x88] sm:$0xff]  ;;  %v32_v60 = vld [vmem:[%s896_s0 + $0x90] sm:$0xff] }
   0x8   :  { %v223_v32 = vmax.f32 %v159_v20, 0.0  ;;  %v225_v38 = vmax.f32 %v161_v25, 0.0  ;;  %v226_v39 = vmax.f32 %v162_v26, 0.0  ;;  %v93_v40 = vmul.f32 %v380_v1, %v22_v22  ;;  %v33_v61 = vld [vmem:[%s896_s0 + $0x98] sm:$0xff]  ;;  %v34_v4 = vld [vmem:[%s896_s0 + $0xa0] sm:$0xff]  ;;  %v35_v5 = vld [vmem:[%s896_s0 + $0xa8] sm:$0xff] }
   0x9   :  { %284 = vst [vmem:[%s899_s3] sm:$0xff] %v220_v23  ;;  %v224_v37 = vmax.f32 %v160_v24, 0.0  ;;  %285 = vst [vmem:[%s899_s3 + $0x8] sm:$0xff] %v221_v30  ;;  %v227_v42 = vmax.f32 %v163_v33, 0.0  ;;  %v94_v43 = vmul.f32 %v380_v1, %v23_v27  ;;  %v95_v44 = vmul.f32 %v380_v1, %v24_v28  ;;  %v36_v6 = vld [vmem:[%s896_s0 + $0xb0] sm:$0xff]  ;;  %v37_v11 = vld [vmem:[%s896_s0 + $0xb8] sm:$0xff] }
   0xa   :  { %286 = vst [vmem:[%s899_s3 + $0x10] sm:$0xff] %v222_v31  ;;  %287 = vst [vmem:[%s899_s3 + $0x18] sm:$0xff] %v223_v32  ;;  %v96_v45 = vmul.f32 %v380_v1, %v25_v29  ;;  %v164_v46 = vadd.f32 %v385_v2, %v93_v40  ;;  %v97_v47 = vmul.f32 %v380_v1, %v26_v34  ;;  %v38_v24 = vld [vmem:[%s896_s0 + $0xc0] sm:$0xff]  ;;  %v39_v29 = vld [vmem:[%s896_s0 + $0xc8] sm:$0xff] }
   0xb   :  { %288 = vst [vmem:[%s899_s3 + $0x20] sm:$0xff] %v224_v37  ;;  %289 = vst [vmem:[%s899_s3 + $0x28] sm:$0xff] %v225_v38  ;;  %v98_v48 = vmul.f32 %v380_v1, %v27_v35  ;;  %v99_v49 = vmul.f32 %v380_v1, %v28_v36  ;;  %v165_v50 = vadd.f32 %v385_v2, %v94_v43  ;;  %v40_v30 = vld [vmem:[%s896_s0 + $0xd0] sm:$0xff]  ;;  %v41_v31 = vld [vmem:[%s896_s0 + $0xd8] sm:$0xff] }
   0xc   :  { %290 = vst [vmem:[%s899_s3 + $0x30] sm:$0xff] %v226_v39  ;;  %291 = vst [vmem:[%s899_s3 + $0x38] sm:$0xff] %v227_v42  ;;  %v166_v51 = vadd.f32 %v385_v2, %v95_v44  ;;  %v167_v52 = vadd.f32 %v385_v2, %v96_v45  ;;  %v100_v53 = vmul.f32 %v380_v1, %v29_v41  ;;  %v228_v55 = vmax.f32 %v164_v46, 0.0  ;;  %v42_v36 = vld [vmem:[%s896_s0 + $0xe0] sm:$0xff]  ;;  %v43_v37 = vld [vmem:[%s896_s0 + $0xe8] sm:$0xff] }
   0xd   :  { %v168_v56 = vadd.f32 %v385_v2, %v97_v47  ;;  %v169_v57 = vadd.f32 %v385_v2, %v98_v48  ;;  %v170_v58 = vadd.f32 %v385_v2, %v99_v49  ;;  %v229_v62 = vmax.f32 %v165_v50, 0.0  ;;  %v44_v38 = vld [vmem:[%s896_s0 + $0xf0] sm:$0xff]  ;;  %v45_v43 = vld [vmem:[%s896_s0 + $0xf8] sm:$0xff] }
   0xe   :  { %v230_v63 = vmax.f32 %v166_v51, 0.0  ;;  %v231_v0 = vmax.f32 %v167_v52, 0.0  ;;  %v171_v3 = vadd.f32 %v385_v2, %v100_v53  ;;  %292 = vst [vmem:[%s899_s3 + $0x40] sm:$0xff] %v228_v55  ;;  %v101_v10 = vmul.f32 %v380_v1, %v30_v54 }
   0xf   :  { %v232_v7 = vmax.f32 %v168_v56, 0.0  ;;  %v233_v8 = vmax.f32 %v169_v57, 0.0  ;;  %v234_v9 = vmax.f32 %v170_v58, 0.0  ;;  %293 = vst [vmem:[%s899_s3 + $0x48] sm:$0xff] %v229_v62  ;;  %v102_v13 = vmul.f32 %v380_v1, %v31_v59  ;;  %v46_v56 = vld [vmem:[%s896_s0 + $0x100] sm:$0xff]  ;;  %v48_v62 = vld [vmem:[%s896_s0 + $0x110] sm:$0xff] }
  0x10   :  { %294 = vst [vmem:[%s899_s3 + $0x50] sm:$0xff] %v230_v63  ;;  %295 = vst [vmem:[%s899_s3 + $0x58] sm:$0xff] %v231_v0  ;;  %v235_v12 = vmax.f32 %v171_v3, 0.0  ;;  %v103_v14 = vmul.f32 %v380_v1, %v32_v60  ;;  %v104_v15 = vmul.f32 %v380_v1, %v33_v61  ;;  %v172_v16 = vadd.f32 %v385_v2, %v101_v10  ;;  %v47_v61 = vld [vmem:[%s896_s0 + $0x108] sm:$0xff]  ;;  %v49_v63 = vld [vmem:[%s896_s0 + $0x118] sm:$0xff] }
  0x11   :  { %296 = vst [vmem:[%s899_s3 + $0x60] sm:$0xff] %v232_v7  ;;  %297 = vst [vmem:[%s899_s3 + $0x68] sm:$0xff] %v233_v8  ;;  %v105_v17 = vmul.f32 %v380_v1, %v34_v4  ;;  %v106_v18 = vmul.f32 %v380_v1, %v35_v5  ;;  %v107_v19 = vmul.f32 %v380_v1, %v36_v6  ;;  %v50_v6 = vld [vmem:[%s896_s0 + $0x120] sm:$0xff]  ;;  %v51_v7 = vld [vmem:[%s896_s0 + $0x128] sm:$0xff] }
  0x12   :  { %298 = vst [vmem:[%s899_s3 + $0x70] sm:$0xff] %v234_v9  ;;  %299 = vst [vmem:[%s899_s3 + $0x78] sm:$0xff] %v235_v12  ;;  %v173_v20 = vadd.f32 %v385_v2, %v102_v13  ;;  %v174_v21 = vadd.f32 %v385_v2, %v103_v14  ;;  %v175_v22 = vadd.f32 %v385_v2, %v104_v15  ;;  %v236_v25 = vmax.f32 %v172_v16, 0.0  ;;  %v52_v8 = vld [vmem:[%s896_s0 + $0x130] sm:$0xff]  ;;  %v53_v13 = vld [vmem:[%s896_s0 + $0x138] sm:$0xff] }
  0x13   :  { %v108_v23 = vmul.f32 %v380_v1, %v37_v11  ;;  %v176_v26 = vadd.f32 %v385_v2, %v105_v17  ;;  %v177_v27 = vadd.f32 %v385_v2, %v106_v18  ;;  %v178_v28 = vadd.f32 %v385_v2, %v107_v19 }
  0x14   :  { %v237_v32 = vmax.f32 %v173_v20, 0.0  ;;  %v238_v33 = vmax.f32 %v174_v21, 0.0  ;;  %v239_v34 = vmax.f32 %v175_v22, 0.0  ;;  %300 = vst [vmem:[%s899_s3 + $0x80] sm:$0xff] %v236_v25  ;;  %v109_v42 = vmul.f32 %v380_v1, %v38_v24 }
  0x15   :  { %v179_v35 = vadd.f32 %v385_v2, %v108_v23  ;;  %v240_v39 = vmax.f32 %v176_v26, 0.0  ;;  %v241_v40 = vmax.f32 %v177_v27, 0.0  ;;  %v242_v41 = vmax.f32 %v178_v28, 0.0  ;;  %v54_v26 = vld [vmem:[%s896_s0 + $0x140] sm:$0xff] }
  0x16   :  { %301 = vst [vmem:[%s899_s3 + $0x88] sm:$0xff] %v237_v32  ;;  %302 = vst [vmem:[%s899_s3 + $0x90] sm:$0xff] %v238_v33  ;;  %v110_v45 = vmul.f32 %v380_v1, %v39_v29  ;;  %v111_v46 = vmul.f32 %v380_v1, %v40_v30  ;;  %v112_v47 = vmul.f32 %v380_v1, %v41_v31  ;;  %v55_v31 = vld [vmem:[%s896_s0 + $0x148] sm:$0xff]  ;;  %v56_v32 = vld [vmem:[%s896_s0 + $0x150] sm:$0xff] }
  0x17   :  { %303 = vst [vmem:[%s899_s3 + $0x98] sm:$0xff] %v239_v34  ;;  %v243_v44 = vmax.f32 %v179_v35, 0.0  ;;  %304 = vst [vmem:[%s899_s3 + $0xa0] sm:$0xff] %v240_v39  ;;  %v180_v48 = vadd.f32 %v385_v2, %v109_v42  ;;  %v113_v49 = vmul.f32 %v380_v1, %v42_v36  ;;  %v114_v50 = vmul.f32 %v380_v1, %v43_v37  ;;  %v57_v33 = vld [vmem:[%s896_s0 + $0x158] sm:$0xff]  ;;  %v59_v39 = vld [vmem:[%s896_s0 + $0x168] sm:$0xff] }
  0x18   :  { %305 = vst [vmem:[%s899_s3 + $0xa8] sm:$0xff] %v241_v40  ;;  %306 = vst [vmem:[%s899_s3 + $0xb0] sm:$0xff] %v242_v41  ;;  %v115_v51 = vmul.f32 %v380_v1, %v44_v38  ;;  %v181_v52 = vadd.f32 %v385_v2, %v110_v45  ;;  %v182_v53 = vadd.f32 %v385_v2, %v111_v46  ;;  %v58_v38 = vld [vmem:[%s896_s0 + $0x160] sm:$0xff]  ;;  %v60_v40 = vld [vmem:[%s896_s0 + $0x170] sm:$0xff] }
  0x19   :  { %307 = vst [vmem:[%s899_s3 + $0xb8] sm:$0xff] %v243_v44  ;;  %v183_v54 = vadd.f32 %v385_v2, %v112_v47  ;;  %v116_v55 = vmul.f32 %v380_v1, %v45_v43  ;;  %v244_v57 = vmax.f32 %v180_v48, 0.0  ;;  %v184_v58 = vadd.f32 %v385_v2, %v113_v49  ;;  %v61_v45 = vld [vmem:[%s896_s0 + $0x178] sm:$0xff] }
  0x1a   :  { %v185_v59 = vadd.f32 %v385_v2, %v114_v50  ;;  %v186_v60 = vadd.f32 %v385_v2, %v115_v51  ;;  %v245_v0 = vmax.f32 %v181_v52, 0.0  ;;  %v246_v3 = vmax.f32 %v182_v53, 0.0 }
  0x1b   :  { %v247_v4 = vmax.f32 %v183_v54, 0.0  ;;  %v187_v5 = vadd.f32 %v385_v2, %v116_v55  ;;  %308 = vst [vmem:[%s899_s3 + $0xc0] sm:$0xff] %v244_v57  ;;  %v248_v9 = vmax.f32 %v184_v58, 0.0  ;;  %v117_v12 = vmul.f32 %v380_v1, %v46_v56  ;;  %v62_v58 = vld [vmem:[%s896_s0 + $0x180] sm:$0xff] }
  0x1c   :  { %v249_v10 = vmax.f32 %v185_v59, 0.0  ;;  %v250_v11 = vmax.f32 %v186_v60, 0.0  ;;  %309 = vst [vmem:[%s899_s3 + $0xc8] sm:$0xff] %v245_v0  ;;  %310 = vst [vmem:[%s899_s3 + $0xd0] sm:$0xff] %v246_v3  ;;  %v118_v15 = vmul.f32 %v380_v1, %v47_v61  ;;  %v119_v16 = vmul.f32 %v380_v1, %v48_v62  ;;  %v64_v0 = vld [vmem:[%s896_s0 + $0x190] sm:$0xff]  ;;  %v65_v3 = vld [vmem:[%s896_s0 + $0x198] sm:$0xff] }
  0x1d   :  { %311 = vst [vmem:[%s899_s3 + $0xd8] sm:$0xff] %v247_v4  ;;  %v251_v14 = vmax.f32 %v187_v5, 0.0  ;;  %v120_v17 = vmul.f32 %v380_v1, %v49_v63  ;;  %312 = vst [vmem:[%s899_s3 + $0xe0] sm:$0xff] %v248_v9  ;;  %v188_v18 = vadd.f32 %v385_v2, %v117_v12  ;;  %v121_v19 = vmul.f32 %v380_v1, %v50_v6  ;;  %v63_v63 = vld [vmem:[%s896_s0 + $0x188] sm:$0xff] }
  0x1e   :  { %313 = vst [vmem:[%s899_s3 + $0xe8] sm:$0xff] %v249_v10  ;;  %314 = vst [vmem:[%s899_s3 + $0xf0] sm:$0xff] %v250_v11  ;;  %v122_v20 = vmul.f32 %v380_v1, %v51_v7  ;;  %v123_v21 = vmul.f32 %v380_v1, %v52_v8  ;;  %v189_v22 = vadd.f32 %v385_v2, %v118_v15  ;;  %v66_v8 = vld [vmem:[%s896_s0 + $0x1a0] sm:$0xff]  ;;  %v67_v9 = vld [vmem:[%s896_s0 + $0x1a8] sm:$0xff] }
  0x1f   :  { %315 = vst [vmem:[%s899_s3 + $0xf8] sm:$0xff] %v251_v14  ;;  %v190_v23 = vadd.f32 %v385_v2, %v119_v16  ;;  %v191_v24 = vadd.f32 %v385_v2, %v120_v17  ;;  %v124_v25 = vmul.f32 %v380_v1, %v53_v13  ;;  %v252_v27 = vmax.f32 %v188_v18, 0.0  ;;  %v68_v10 = vld [vmem:[%s896_s0 + $0x1b0] sm:$0xff]  ;;  %v69_v15 = vld [vmem:[%s896_s0 + $0x1b8] sm:$0xff] }
  0x20   :  { %v192_v28 = vadd.f32 %v385_v2, %v121_v19  ;;  %v193_v29 = vadd.f32 %v385_v2, %v122_v20  ;;  %v194_v30 = vadd.f32 %v385_v2, %v123_v21  ;;  %v253_v34 = vmax.f32 %v189_v22, 0.0 }
  0x21   :  { %v254_v35 = vmax.f32 %v190_v23, 0.0  ;;  %v255_v36 = vmax.f32 %v191_v24, 0.0  ;;  %v195_v37 = vadd.f32 %v385_v2, %v124_v25  ;;  %316 = vst [vmem:[%s899_s3 + $0x100] sm:$0xff] %v252_v27  ;;  %v125_v44 = vmul.f32 %v380_v1, %v54_v26 }
  0x22   :  { %v256_v41 = vmax.f32 %v192_v28, 0.0  ;;  %v257_v42 = vmax.f32 %v193_v29, 0.0  ;;  %v258_v43 = vmax.f32 %v194_v30, 0.0  ;;  %317 = vst [vmem:[%s899_s3 + $0x108] sm:$0xff] %v253_v34  ;;  %v126_v47 = vmul.f32 %v380_v1, %v55_v31  ;;  %v70_v28 = vld [vmem:[%s896_s0 + $0x1c0] sm:$0xff]  ;;  %v72_v34 = vld [vmem:[%s896_s0 + $0x1d0] sm:$0xff] }
  0x23   :  { %318 = vst [vmem:[%s899_s3 + $0x110] sm:$0xff] %v254_v35  ;;  %319 = vst [vmem:[%s899_s3 + $0x118] sm:$0xff] %v255_v36  ;;  %v259_v46 = vmax.f32 %v195_v37, 0.0  ;;  %v127_v48 = vmul.f32 %v380_v1, %v56_v32  ;;  %v128_v49 = vmul.f32 %v380_v1, %v57_v33  ;;  %v196_v50 = vadd.f32 %v385_v2, %v125_v44  ;;  %v71_v33 = vld [vmem:[%s896_s0 + $0x1c8] sm:$0xff]  ;;  %v73_v35 = vld [vmem:[%s896_s0 + $0x1d8] sm:$0xff] }
  0x24   :  { %320 = vst [vmem:[%s899_s3 + $0x120] sm:$0xff] %v256_v41  ;;  %321 = vst [vmem:[%s899_s3 + $0x128] sm:$0xff] %v257_v42  ;;  %v129_v51 = vmul.f32 %v380_v1, %v58_v38  ;;  %v130_v52 = vmul.f32 %v380_v1, %v59_v39  ;;  %v131_v53 = vmul.f32 %v380_v1, %v60_v40  ;;  %v74_v40 = vld [vmem:[%s896_s0 + $0x1e0] sm:$0xff]  ;;  %v75_v41 = vld [vmem:[%s896_s0 + $0x1e8] sm:$0xff] }
  0x25   :  { %322 = vst [vmem:[%s899_s3 + $0x130] sm:$0xff] %v258_v43  ;;  %323 = vst [vmem:[%s899_s3 + $0x138] sm:$0xff] %v259_v46  ;;  %v197_v54 = vadd.f32 %v385_v2, %v126_v47  ;;  %v198_v55 = vadd.f32 %v385_v2, %v127_v48  ;;  %v199_v56 = vadd.f32 %v385_v2, %v128_v49  ;;  %v260_v59 = vmax.f32 %v196_v50, 0.0  ;;  %v76_v42 = vld [vmem:[%s896_s0 + $0x1f0] sm:$0xff]  ;;  %v77_v47 = vld [vmem:[%s896_s0 + $0x1f8] sm:$0xff] }
  0x26   :  { %v132_v57 = vmul.f32 %v380_v1, %v61_v45  ;;  %v200_v60 = vadd.f32 %v385_v2, %v129_v51  ;;  %v201_v61 = vadd.f32 %v385_v2, %v130_v52  ;;  %v202_v62 = vadd.f32 %v385_v2, %v131_v53 }
  0x27   :  { %v261_v4 = vmax.f32 %v197_v54, 0.0  ;;  %v262_v5 = vmax.f32 %v198_v55, 0.0  ;;  %v263_v6 = vmax.f32 %v199_v56, 0.0  ;;  %324 = vst [vmem:[%s899_s3 + $0x140] sm:$0xff] %v260_v59  ;;  %v133_v14 = vmul.f32 %v380_v1, %v62_v58 }
  0x28   :  { %v203_v7 = vadd.f32 %v385_v2, %v132_v57  ;;  %v264_v11 = vmax.f32 %v200_v60, 0.0  ;;  %v265_v12 = vmax.f32 %v201_v61, 0.0  ;;  %v266_v13 = vmax.f32 %v202_v62, 0.0 }
  0x29   :  { %325 = vst [vmem:[%s899_s3 + $0x148] sm:$0xff] %v261_v4  ;;  %326 = vst [vmem:[%s899_s3 + $0x150] sm:$0xff] %v262_v5  ;;  %v134_v17 = vmul.f32 %v380_v1, %v63_v63  ;;  %v135_v18 = vmul.f32 %v380_v1, %v64_v0  ;;  %v136_v19 = vmul.f32 %v380_v1, %v65_v3 }
  0x2a   :  { %327 = vst [vmem:[%s899_s3 + $0x158] sm:$0xff] %v263_v6  ;;  %v267_v16 = vmax.f32 %v203_v7, 0.0  ;;  %328 = vst [vmem:[%s899_s3 + $0x160] sm:$0xff] %v264_v11  ;;  %v204_v20 = vadd.f32 %v385_v2, %v133_v14  ;;  %v137_v21 = vmul.f32 %v380_v1, %v66_v8  ;;  %v138_v22 = vmul.f32 %v380_v1, %v67_v9 }
  0x2b   :  { %329 = vst [vmem:[%s899_s3 + $0x168] sm:$0xff] %v265_v12  ;;  %330 = vst [vmem:[%s899_s3 + $0x170] sm:$0xff] %v266_v13  ;;  %v139_v23 = vmul.f32 %v380_v1, %v68_v10  ;;  %v205_v24 = vadd.f32 %v385_v2, %v134_v17  ;;  %v206_v25 = vadd.f32 %v385_v2, %v135_v18 }
  0x2c   :  { %331 = vst [vmem:[%s899_s3 + $0x178] sm:$0xff] %v267_v16  ;;  %v207_v26 = vadd.f32 %v385_v2, %v136_v19  ;;  %v140_v27 = vmul.f32 %v380_v1, %v69_v15  ;;  %v268_v29 = vmax.f32 %v204_v20, 0.0  ;;  %v208_v30 = vadd.f32 %v385_v2, %v137_v21 }
  0x2d   :  { %v209_v31 = vadd.f32 %v385_v2, %v138_v22  ;;  %v210_v32 = vadd.f32 %v385_v2, %v139_v23  ;;  %v269_v36 = vmax.f32 %v205_v24, 0.0  ;;  %v270_v37 = vmax.f32 %v206_v25, 0.0 }
  0x2e   :  { %v271_v38 = vmax.f32 %v207_v26, 0.0  ;;  %v211_v39 = vadd.f32 %v385_v2, %v140_v27  ;;  %332 = vst [vmem:[%s899_s3 + $0x180] sm:$0xff] %v268_v29  ;;  %v272_v43 = vmax.f32 %v208_v30, 0.0  ;;  %v141_v46 = vmul.f32 %v380_v1, %v70_v28 }
  0x2f   :  { %v273_v44 = vmax.f32 %v209_v31, 0.0  ;;  %v274_v45 = vmax.f32 %v210_v32, 0.0  ;;  %333 = vst [vmem:[%s899_s3 + $0x188] sm:$0xff] %v269_v36  ;;  %334 = vst [vmem:[%s899_s3 + $0x190] sm:$0xff] %v270_v37  ;;  %v142_v49 = vmul.f32 %v380_v1, %v71_v33  ;;  %v143_v50 = vmul.f32 %v380_v1, %v72_v34 }
  0x30   :  { %335 = vst [vmem:[%s899_s3 + $0x198] sm:$0xff] %v271_v38  ;;  %v275_v48 = vmax.f32 %v211_v39, 0.0  ;;  %v144_v51 = vmul.f32 %v380_v1, %v73_v35  ;;  %336 = vst [vmem:[%s899_s3 + $0x1a0] sm:$0xff] %v272_v43  ;;  %v212_v52 = vadd.f32 %v385_v2, %v141_v46  ;;  %v145_v53 = vmul.f32 %v380_v1, %v74_v40 }
  0x31   :  { %337 = vst [vmem:[%s899_s3 + $0x1a8] sm:$0xff] %v273_v44  ;;  %338 = vst [vmem:[%s899_s3 + $0x1b0] sm:$0xff] %v274_v45  ;;  %v146_v54 = vmul.f32 %v380_v1, %v75_v41  ;;  %v147_v55 = vmul.f32 %v380_v1, %v76_v42  ;;  %v213_v56 = vadd.f32 %v385_v2, %v142_v49 }
  0x32   :  { %339 = vst [vmem:[%s899_s3 + $0x1b8] sm:$0xff] %v275_v48  ;;  %v214_v57 = vadd.f32 %v385_v2, %v143_v50  ;;  %v215_v58 = vadd.f32 %v385_v2, %v144_v51  ;;  %v148_v59 = vmul.f32 %v380_v1, %v77_v47  ;;  %v276_v60 = vmax.f32 %v212_v52, 0.0 }
  0x33   :  { %v216_v61 = vadd.f32 %v385_v2, %v145_v53  ;;  %v217_v62 = vadd.f32 %v385_v2, %v146_v54  ;;  %v218_v63 = vadd.f32 %v385_v2, %v147_v55  ;;  %v277_v0 = vmax.f32 %v213_v56, 0.0 }
  0x34   :  { %v278_v3 = vmax.f32 %v214_v57, 0.0  ;;  %v279_v4 = vmax.f32 %v215_v58, 0.0  ;;  %v219_v5 = vadd.f32 %v385_v2, %v148_v59  ;;  %340 = vst [vmem:[%s899_s3 + $0x1c0] sm:$0xff] %v276_v60 }
  0x35   :  { %v280_v6 = vmax.f32 %v216_v61, 0.0  ;;  %v281_v7 = vmax.f32 %v217_v62, 0.0  ;;  %v282_v8 = vmax.f32 %v218_v63, 0.0  ;;  %341 = vst [vmem:[%s899_s3 + $0x1c8] sm:$0xff] %v277_v0 }
  0x36   :  { %342 = vst [vmem:[%s899_s3 + $0x1d0] sm:$0xff] %v278_v3  ;;  %343 = vst [vmem:[%s899_s3 + $0x1d8] sm:$0xff] %v279_v4  ;;  %v283_v1 = vmax.f32 %v219_v5, 0.0 }
  0x37   :  { %344 = vst [vmem:[%s899_s3 + $0x1e0] sm:$0xff] %v280_v6  ;;  %345 = vst [vmem:[%s899_s3 + $0x1e8] sm:$0xff] %v281_v7 }
  0x38   :  { %346 = vst [vmem:[%s899_s3 + $0x1f0] sm:$0xff] %v282_v8  ;;  %347 = vst [vmem:[%s899_s3 + $0x1f8] sm:$0xff] %v283_v1 }

// kernel: densenet_forward.51
= control target key start
LH: loop header
LB: loop body
LE: loop exit
PB: predicated region body
PF: predicated region fallthrough
CT: control target
= control target key end

     0   :  { %s1159_s9 = smov 0   ;;  %s1161_s10 = smov 0   ;;  %s1315_s0 = inlined_call_operand.vmem [shape: bf16[512,256], index: 0, kind: input, shape index: {}]   ;;  %s1316_s1 = inlined_call_operand.vmem [shape: bf16[256,128], index: 1, kind: input, shape index: {}]   ;;  %s1317_s2 = inlined_call_operand.vmem [shape: f32[512,128], index: 2, kind: output, shape index: {}]  }
   0x1   :  { %s1163_s11 = smov 0  }
   0x2 LB: > { %s31_s12 = sadd.s32 1, %s1138_s10  ;;  %p847_p0 = scmp.ge.s32.totalorder %s1142_s11, 1  ;;  %s1142_s11 = sphi %s1163_s11, %s12_s11   ;;  %s1138_s10 = sphi %s1161_s10, %s1319_s10   ;;  %s1134_s9 = sphi %s1159_s9, %s1318_s9  }
   0x3   : > { %p33_p1 = scmp.ge.s32.totalorder %s31_s12, 2  ;;  %p158_p2 = scmp.lt.s32.totalorder %s1142_s11, 3 }
   0x5   : > { %s1321_s12 = smov (%p33_p1, %s31_s12), 0  ;;  %p159_p3 = pnand %p847_p0, %p158_p2 }
   0x6   : > { %v1056_v0 = vld [vmem:[%s1316_s1 + $0x40] sm:$0xff] (!%p159_p3)   ;;  %s848_s15 = sshll.u32 (!%p159_p3), %s1134_s9, 5  ;;  %v1058_v2 = vld [vmem:[%s1316_s1 + $0x48] sm:$0xff] (!%p159_p3)   ;;  %v1060_v4 = vld [vmem:[%s1316_s1 + $0x50] sm:$0xff] (!%p159_p3)  }
   0x7   : > { %162 = sbr.rel (%p159_p3) target bundleno = 313 (0x139), region = 28  ;;  %v1057_v1 = vld [vmem:[%s1316_s1] sm:$0xff] (!%p159_p3)   ;;  %904 = vmatprep.subr.bf16.mxu0 (!%p159_p3), %v1056_v0  ;;  %1016 = vmatprep.subr.bf16.mxu1 (!%p159_p3), %v1056_v0  ;;  %v1059_v3 = vld [vmem:[%s1316_s1 + $0x8] sm:$0xff] (!%p159_p3)   ;;  %p198_p4 = scmp.lt.s32.totalorder (!%p159_p3), %s848_s15, 63  ;;  %v1061_v5 = vld [vmem:[%s1316_s1 + $0x10] sm:$0xff] (!%p159_p3)  }
   0x8   : > { %905 = vmatpush3.bf16.msra.mxu0 (!%p159_p3), %v1057_v1  ;;  %1024 = vmatpush3.bf16.msra.mxu1 (!%p159_p3), %v1057_v1  ;;  %v1062_v6 = vld [vmem:[%s1316_s1 + $0x58] sm:$0xff] (!%p159_p3)   ;;  %v1064_v8 = vld [vmem:[%s1316_s1 + $0x60] sm:$0xff] (!%p159_p3)   ;;  %v1066_v10 = vld [vmem:[%s1316_s1 + $0x68] sm:$0xff] (!%p159_p3)  }
   0x9   : > { %906 = vmatprep.subr.bf16.mxu0 (!%p159_p3), %v1058_v2  ;;  %1017 = vmatprep.subr.bf16.mxu1 (!%p159_p3), %v1058_v2  ;;  %v1063_v7 = vld [vmem:[%s1316_s1 + $0x18] sm:$0xff] (!%p159_p3)   ;;  %v1065_v9 = vld [vmem:[%s1316_s1 + $0x20] sm:$0xff] (!%p159_p3)   ;;  %v1067_v13 = vld [vmem:[%s1316_s1 + $0x28] sm:$0xff] (!%p159_p3)  }
   0xa   : > { %v1068_v14 = vld [vmem:[%s1316_s1 + $0x70] sm:$0xff] (!%p159_p3)   ;;  %v1070_v16 = vld [vmem:[%s1316_s1 + $0x78] sm:$0xff] (!%p159_p3)  }
   0xb   : > { %v1069_v15 = vld [vmem:[%s1316_s1 + $0x30] sm:$0xff] (!%p159_p3)   ;;  %v1071_v17 = vld [vmem:[%s1316_s1 + $0x38] sm:$0xff] (!%p159_p3)  }
   0xc   : > { %907 = vmatpush3.bf16.msra.mxu0 (!%p159_p3), %v1059_v3  ;;  %1025 = vmatpush3.bf16.msra.mxu1 (!%p159_p3), %v1059_v3 }
   0xd   : > { %908 = vmatprep.subr.bf16.mxu0 (!%p159_p3), %v1060_v4  ;;  %1018 = vmatprep.subr.bf16.mxu1 (!%p159_p3), %v1060_v4 }
   0xe   : > { %s1323_s15 = smov (!%p198_p4, %s848_s15), 63 }
   0xf   : > { %s903_s30 = sshll.u32 %s1323_s15, 3 }
  0x10   : > { %909 = vmatpush3.bf16.msra.mxu0 %v1061_v5  ;;  %1026 = vmatpush3.bf16.msra.mxu1 %v1061_v5  ;;  %s1212_s7 = scalar_lea.vmem %s1315_s0, %s903_s30  ;;  %s1272_s28 = scalar_lea.vmem %s1317_s2, %s903_s30 }
  0x11   : > { %910 = vmatprep.subr.bf16.mxu0 %v1062_v6  ;;  %1019 = vmatprep.subr.bf16.mxu1 %v1062_v6  ;;  %v1074_v11 = vld [vmem:[%s1212_s7 + $0x4] ss:$8 sps:$4 sm:$0xff]   ;;  %v1072_v18 = vld [vmem:[%s1212_s7] ss:$8 sps:$4 sm:$0xff]   ;;  %v1078_v20 = vld [vmem:[%s1212_s7 + $0x14] ss:$8 sps:$4 sm:$0xff]  }
  0x12   : > { %v1077_v12 = vld [vmem:[%s1212_s7 + $0x84] ss:$8 sps:$4 sm:$0xff]   ;;  %579 = vmatprep.mubr.bf16.mxu0 %v1074_v11  ;;  %v1075_v19 = vld [vmem:[%s1212_s7 + $0x80] ss:$8 sps:$4 sm:$0xff]   ;;  %v1080_v21 = vld [vmem:[%s1212_s7 + $0x94] ss:$8 sps:$4 sm:$0xff]  }
  0x13   : > { %643 = vmatprep.mubr.bf16.mxu1 %v1077_v12  ;;  %v1082_v22 = vld [vmem:[%s1212_s7 + $0x10] ss:$8 sps:$4 sm:$0xff]   ;;  %v1084_v24 = vld [vmem:[%s1212_s7 + $0x24] ss:$8 sps:$4 sm:$0xff]   ;;  %v1088_v26 = vld [vmem:[%s1212_s7 + $0x20] ss:$8 sps:$4 sm:$0xff]  }
  0x14   : > { %911 = vmatpush3.bf16.msra.mxu0 %v1063_v7  ;;  %1027 = vmatpush3.bf16.msra.mxu1 %v1063_v7  ;;  %v1083_v23 = vld [vmem:[%s1212_s7 + $0x90] ss:$8 sps:$4 sm:$0xff]   ;;  %v1086_v25 = vld [vmem:[%s1212_s7 + $0xa4] ss:$8 sps:$4 sm:$0xff]   ;;  %v1089_v27 = vld [vmem:[%s1212_s7 + $0xa0] ss:$8 sps:$4 sm:$0xff]  }
  0x15   : > { %912 = vmatprep.subr.bf16.mxu0 %v1064_v8  ;;  %1020 = vmatprep.subr.bf16.mxu1 %v1064_v8  ;;  %v1090_v28 = vld [vmem:[%s1212_s7 + $0x34] ss:$8 sps:$4 sm:$0xff]   ;;  %v1094_v30 = vld [vmem:[%s1212_s7 + $0x30] ss:$8 sps:$4 sm:$0xff]   ;;  %v1096_v32 = vld [vmem:[%s1212_s7 + $0x44] ss:$8 sps:$4 sm:$0xff]  }
  0x16   : > { %v1092_v29 = vld [vmem:[%s1212_s7 + $0xb4] ss:$8 sps:$4 sm:$0xff]   ;;  %v1095_v31 = vld [vmem:[%s1212_s7 + $0xb0] ss:$8 sps:$4 sm:$0xff]   ;;  %v1098_v33 = vld [vmem:[%s1212_s7 + $0xc4] ss:$8 sps:$4 sm:$0xff]  }
  0x17   : > { %v1100_v34 = vld [vmem:[%s1212_s7 + $0x40] ss:$8 sps:$4 sm:$0xff]   ;;  %v1102_v36 = vld [vmem:[%s1212_s7 + $0x54] ss:$8 sps:$4 sm:$0xff]   ;;  %v1106_v38 = vld [vmem:[%s1212_s7 + $0x50] ss:$8 sps:$4 sm:$0xff]  }
  0x18   : > { %913 = vmatpush3.bf16.msra.mxu0 %v1065_v9  ;;  %1028 = vmatpush3.bf16.msra.mxu1 %v1065_v9  ;;  %v1101_v35 = vld [vmem:[%s1212_s7 + $0xc0] ss:$8 sps:$4 sm:$0xff]   ;;  %v1104_v37 = vld [vmem:[%s1212_s7 + $0xd4] ss:$8 sps:$4 sm:$0xff]   ;;  %v1107_v39 = vld [vmem:[%s1212_s7 + $0xd0] ss:$8 sps:$4 sm:$0xff]  }
  0x19   : > { %914 = vmatprep.subr.bf16.mxu0 %v1066_v10  ;;  %1021 = vmatprep.subr.bf16.mxu1 %v1066_v10  ;;  %v1108_v40 = vld [vmem:[%s1212_s7 + $0x64] ss:$8 sps:$4 sm:$0xff]   ;;  %v1112_v42 = vld [vmem:[%s1212_s7 + $0x60] ss:$8 sps:$4 sm:$0xff]   ;;  %v1114_v44 = vld [vmem:[%s1212_s7 + $0x74] ss:$8 sps:$4 sm:$0xff]  }
  0x1a   : > { %v1110_v41 = vld [vmem:[%s1212_s7 + $0xe4] ss:$8 sps:$4 sm:$0xff]   ;;  %v1113_v43 = vld [vmem:[%s1212_s7 + $0xe0] ss:$8 sps:$4 sm:$0xff]   ;;  %v1116_v45 = vld [vmem:[%s1212_s7 + $0xf4] ss:$8 sps:$4 sm:$0xff]  }
  0x1b   : > { %v1118_v46 = vld [vmem:[%s1212_s7 + $0x70] ss:$8 sps:$4 sm:$0xff]  }
  0x1c   : > { %915 = vmatpush3.bf16.msra.mxu0 %v1067_v13  ;;  %1029 = vmatpush3.bf16.msra.mxu1 %v1067_v13  ;;  %v1119_v47 = vld [vmem:[%s1212_s7 + $0xf0] ss:$8 sps:$4 sm:$0xff]  }
  0x1d   : > { %916 = vmatprep.subr.bf16.mxu0 %v1068_v14  ;;  %1022 = vmatprep.subr.bf16.mxu1 %v1068_v14 }
  0x20   : > { %917 = vmatpush3.bf16.msra.mxu0 %v1069_v15  ;;  %1030 = vmatpush3.bf16.msra.mxu1 %v1069_v15 }
  0x21   : > { %918 = vmatprep.subr.bf16.mxu0 %v1070_v16  ;;  %1023 = vmatprep.subr.bf16.mxu1 %v1070_v16 }
  0x24   : > { %919 = vmatpush3.bf16.msra.mxu0 %v1071_v17  ;;  %1031 = vmatpush3.bf16.msra.mxu1 %v1071_v17 }
  0x27   : > { %580 = vmatmul.mubr.bf16.vlgmr.msra.gmra.mrb[0].mxu0 %v1072_v18  ;;  %644 = vmatmul.mubr.bf16.vlgmr.msra.gmra.mrb[0].mxu1 %v1075_v19 }
  0x28   : > { %587 = vmatprep.mubr.bf16.mxu0 %v1078_v20  ;;  %651 = vmatprep.mubr.bf16.mxu1 %v1080_v21 }
  0x2f   : > { %588 = vmatmul.mubr.bf16.gmra.mrb[4].mxu0 %v1082_v22  ;;  %652 = vmatmul.mubr.bf16.gmra.mrb[4].mxu1 %v1083_v23 }
  0x30   : > { %595 = vmatprep.mubr.bf16.mxu0 %v1084_v24  ;;  %659 = vmatprep.mubr.bf16.mxu1 %v1086_v25 }
  0x37   : > { %596 = vmatmul.mubr.bf16.gmra.mrb[8].mxu0 %v1088_v26  ;;  %660 = vmatmul.mubr.bf16.gmra.mrb[8].mxu1 %v1089_v27 }
  0x38   : > { %603 = vmatprep.mubr.bf16.mxu0 %v1090_v28  ;;  %667 = vmatprep.mubr.bf16.mxu1 %v1092_v29 }
  0x3f   : > { %604 = vmatmul.mubr.bf16.gmra.mrb[12].mxu0 %v1094_v30  ;;  %668 = vmatmul.mubr.bf16.gmra.mrb[12].mxu1 %v1095_v31 }
  0x40   : > { %611 = vmatprep.mubr.bf16.mxu0 %v1096_v32  ;;  %675 = vmatprep.mubr.bf16.mxu1 %v1098_v33 }
  0x47   : > { %612 = vmatmul.mubr.bf16.gmra.mrb[16].mxu0 %v1100_v34  ;;  %676 = vmatmul.mubr.bf16.gmra.mrb[16].mxu1 %v1101_v35 }
  0x48   : > { %619 = vmatprep.mubr.bf16.mxu0 %v1102_v36  ;;  %683 = vmatprep.mubr.bf16.mxu1 %v1104_v37 }
  0x4f   : > { %620 = vmatmul.mubr.bf16.gmra.mrb[20].mxu0 %v1106_v38  ;;  %684 = vmatmul.mubr.bf16.gmra.mrb[20].mxu1 %v1107_v39 }
  0x50   : > { %627 = vmatprep.mubr.bf16.mxu0 %v1108_v40  ;;  %691 = vmatprep.mubr.bf16.mxu1 %v1110_v41 }
  0x57   : > { %628 = vmatmul.mubr.bf16.gmra.mrb[24].mxu0 %v1112_v42  ;;  %692 = vmatmul.mubr.bf16.gmra.mrb[24].mxu1 %v1113_v43 }
  0x58   : > { %635 = vmatprep.mubr.bf16.mxu0 %v1114_v44  ;;  %699 = vmatprep.mubr.bf16.mxu1 %v1116_v45 }
  0x5f   : > { %636 = vmatmul.mubr.bf16.gmra.mrb[28].mxu0 %v1118_v46  ;;  %700 = vmatmul.mubr.bf16.gmra.mrb[28].mxu1 %v1119_v47 }
  0xfa   : > { %v920_v48 = vpop.f32.mrb[0].mxu0  ;;  %v968_v49 = vpop.f32.mrb[0].mxu1 }
  0xfb   : > { %v921_v50 = vpop.f32.mrb[1].mxu0  ;;  %v969_v51 = vpop.f32.mrb[1].mxu1 }
  0xfc   : > { %v922_v52 = vadd.f32 %v921_v50, %v920_v48  ;;  %v970_v53 = vadd.f32 %v969_v51, %v968_v49  ;;  %v923_v54 = vpop.f32.mrb[2].mxu0  ;;  %v971_v55 = vpop.f32.mrb[2].mxu1 }
  0xfd   : > { %v924_v56 = vpop.f32.mrb[3].mxu0  ;;  %v972_v57 = vpop.f32.mrb[3].mxu1 }
  0xfe   : > { %708 = vst [vmem:[%s1272_s28] sm:$0xff] %v922_v52  ;;  %724 = vst [vmem:[%s1272_s28 + $0x80] sm:$0xff] %v970_v53  ;;  %v925_v58 = vadd.f32 %v924_v56, %v923_v54  ;;  %v973_v59 = vadd.f32 %v972_v57, %v971_v55 }
 0x100   : > { %709 = vst [vmem:[%s1272_s28 + $0x8] sm:$0xff] %v925_v58  ;;  %725 = vst [vmem:[%s1272_s28 + $0x88] sm:$0xff] %v973_v59 }
 0x102   : > { %v926_v60 = vpop.f32.mrb[4].mxu0  ;;  %v974_v61 = vpop.f32.mrb[4].mxu1 }
 0x103   : > { %v927_v62 = vpop.f32.mrb[5].mxu0  ;;  %v975_v63 = vpop.f32.mrb[5].mxu1 }
 0x104   : > { %v928_v0 = vadd.f32 %v927_v62, %v926_v60  ;;  %v976_v1 = vadd.f32 %v975_v63, %v974_v61  ;;  %v929_v2 = vpop.f32.mrb[6].mxu0  ;;  %v977_v3 = vpop.f32.mrb[6].mxu1 }
 0x105   : > { %v930_v4 = vpop.f32.mrb[7].mxu0  ;;  %v978_v5 = vpop.f32.mrb[7].mxu1 }
 0x106   : > { %710 = vst [vmem:[%s1272_s28 + $0x10] sm:$0xff] %v928_v0  ;;  %726 = vst [vmem:[%s1272_s28 + $0x90] sm:$0xff] %v976_v1  ;;  %v931_v6 = vadd.f32 %v930_v4, %v929_v2  ;;  %v979_v7 = vadd.f32 %v978_v5, %v977_v3 }
 0x108   : > { %711 = vst [vmem:[%s1272_s28 + $0x18] sm:$0xff] %v931_v6  ;;  %727 = vst [vmem:[%s1272_s28 + $0x98] sm:$0xff] %v979_v7 }
 0x10a   : > { %v932_v8 = vpop.f32.mrb[8].mxu0  ;;  %v980_v9 = vpop.f32.mrb[8].mxu1 }
 0x10b   : > { %v933_v10 = vpop.f32.mrb[9].mxu0  ;;  %v981_v11 = vpop.f32.mrb[9].mxu1 }
 0x10c   : > { %v934_v12 = vadd.f32 %v933_v10, %v932_v8  ;;  %v982_v13 = vadd.f32 %v981_v11, %v980_v9  ;;  %v935_v14 = vpop.f32.mrb[10].mxu0  ;;  %v983_v15 = vpop.f32.mrb[10].mxu1 }
 0x10d   : > { %v936_v16 = vpop.f32.mrb[11].mxu0  ;;  %v984_v17 = vpop.f32.mrb[11].mxu1 }
 0x10e   : > { %712 = vst [vmem:[%s1272_s28 + $0x20] sm:$0xff] %v934_v12  ;;  %728 = vst [vmem:[%s1272_s28 + $0xa0] sm:$0xff] %v982_v13  ;;  %v937_v18 = vadd.f32 %v936_v16, %v935_v14  ;;  %v985_v19 = vadd.f32 %v984_v17, %v983_v15 }
 0x110   : > { %713 = vst [vmem:[%s1272_s28 + $0x28] sm:$0xff] %v937_v18  ;;  %729 = vst [vmem:[%s1272_s28 + $0xa8] sm:$0xff] %v985_v19 }
 0x112   : > { %v938_v20 = vpop.f32.mrb[12].mxu0  ;;  %v986_v21 = vpop.f32.mrb[12].mxu1 }
 0x113   : > { %v939_v22 = vpop.f32.mrb[13].mxu0  ;;  %v987_v23 = vpop.f32.mrb[13].mxu1 }
 0x114   : > { %v940_v24 = vadd.f32 %v939_v22, %v938_v20  ;;  %v988_v25 = vadd.f32 %v987_v23, %v986_v21  ;;  %v941_v26 = vpop.f32.mrb[14].mxu0  ;;  %v989_v27 = vpop.f32.mrb[14].mxu1 }
 0x115   : > { %v942_v28 = vpop.f32.mrb[15].mxu0  ;;  %v990_v29 = vpop.f32.mrb[15].mxu1 }
 0x116   : > { %714 = vst [vmem:[%s1272_s28 + $0x30] sm:$0xff] %v940_v24  ;;  %730 = vst [vmem:[%s1272_s28 + $0xb0] sm:$0xff] %v988_v25  ;;  %v943_v30 = vadd.f32 %v942_v28, %v941_v26  ;;  %v991_v31 = vadd.f32 %v990_v29, %v989_v27 }
 0x118   : > { %715 = vst [vmem:[%s1272_s28 + $0x38] sm:$0xff] %v943_v30  ;;  %731 = vst [vmem:[%s1272_s28 + $0xb8] sm:$0xff] %v991_v31 }
 0x11a   : > { %v944_v32 = vpop.f32.mrb[16].mxu0  ;;  %v992_v33 = vpop.f32.mrb[16].mxu1 }
 0x11b   : > { %v945_v34 = vpop.f32.mrb[17].mxu0  ;;  %v993_v35 = vpop.f32.mrb[17].mxu1 }
 0x11c   : > { %v946_v36 = vadd.f32 %v945_v34, %v944_v32  ;;  %v994_v37 = vadd.f32 %v993_v35, %v992_v33  ;;  %v947_v38 = vpop.f32.mrb[18].mxu0  ;;  %v995_v39 = vpop.f32.mrb[18].mxu1 }
 0x11d   : > { %v948_v40 = vpop.f32.mrb[19].mxu0  ;;  %v996_v41 = vpop.f32.mrb[19].mxu1 }
 0x11e   : > { %716 = vst [vmem:[%s1272_s28 + $0x40] sm:$0xff] %v946_v36  ;;  %732 = vst [vmem:[%s1272_s28 + $0xc0] sm:$0xff] %v994_v37  ;;  %v949_v42 = vadd.f32 %v948_v40, %v947_v38  ;;  %v997_v43 = vadd.f32 %v996_v41, %v995_v39 }
 0x120   : > { %717 = vst [vmem:[%s1272_s28 + $0x48] sm:$0xff] %v949_v42  ;;  %733 = vst [vmem:[%s1272_s28 + $0xc8] sm:$0xff] %v997_v43 }
 0x122   : > { %v950_v44 = vpop.f32.mrb[20].mxu0  ;;  %v998_v45 = vpop.f32.mrb[20].mxu1 }
 0x123   : > { %v951_v46 = vpop.f32.mrb[21].mxu0  ;;  %v999_v47 = vpop.f32.mrb[21].mxu1 }
 0x124   : > { %v952_v48 = vadd.f32 %v951_v46, %v950_v44  ;;  %v1000_v49 = vadd.f32 %v999_v47, %v998_v45  ;;  %v953_v50 = vpop.f32.mrb[22].mxu0  ;;  %v1001_v51 = vpop.f32.mrb[22].mxu1 }
 0x125   : > { %v954_v52 = vpop.f32.mrb[23].mxu0  ;;  %v1002_v53 = vpop.f32.mrb[23].mxu1 }
 0x126   : > { %718 = vst [vmem:[%s1272_s28 + $0x50] sm:$0xff] %v952_v48  ;;  %734 = vst [vmem:[%s1272_s28 + $0xd0] sm:$0xff] %v1000_v49  ;;  %v955_v54 = vadd.f32 %v954_v52, %v953_v50  ;;  %v1003_v55 = vadd.f32 %v1002_v53, %v1001_v51 }
 0x128   : > { %719 = vst [vmem:[%s1272_s28 + $0x58] sm:$0xff] %v955_v54  ;;  %735 = vst [vmem:[%s1272_s28 + $0xd8] sm:$0xff] %v1003_v55 }
 0x12a   : > { %v956_v56 = vpop.f32.mrb[24].mxu0  ;;  %v1004_v57 = vpop.f32.mrb[24].mxu1 }
 0x12b   : > { %v957_v58 = vpop.f32.mrb[25].mxu0  ;;  %v1005_v59 = vpop.f32.mrb[25].mxu1 }
 0x12c   : > { %v958_v60 = vadd.f32 %v957_v58, %v956_v56  ;;  %v1006_v61 = vadd.f32 %v1005_v59, %v1004_v57  ;;  %v959_v62 = vpop.f32.mrb[26].mxu0  ;;  %v1007_v63 = vpop.f32.mrb[26].mxu1 }
 0x12d   : > { %v960_v0 = vpop.f32.mrb[27].mxu0  ;;  %v1008_v1 = vpop.f32.mrb[27].mxu1 }
 0x12e   : > { %720 = vst [vmem:[%s1272_s28 + $0x60] sm:$0xff] %v958_v60  ;;  %736 = vst [vmem:[%s1272_s28 + $0xe0] sm:$0xff] %v1006_v61  ;;  %v961_v2 = vadd.f32 %v960_v0, %v959_v62  ;;  %v1009_v3 = vadd.f32 %v1008_v1, %v1007_v63 }
 0x130   : > { %721 = vst [vmem:[%s1272_s28 + $0x68] sm:$0xff] %v961_v2  ;;  %737 = vst [vmem:[%s1272_s28 + $0xe8] sm:$0xff] %v1009_v3 }
 0x132   : > { %v962_v4 = vpop.f32.mrb[28].mxu0  ;;  %v1010_v5 = vpop.f32.mrb[28].mxu1 }
 0x133   : > { %v963_v6 = vpop.f32.mrb[29].mxu0  ;;  %v1011_v7 = vpop.f32.mrb[29].mxu1 }
 0x134   : > { %v964_v8 = vadd.f32 %v963_v6, %v962_v4  ;;  %v1012_v9 = vadd.f32 %v1011_v7, %v1010_v5  ;;  %v965_v10 = vpop.f32.mrb[30].mxu0  ;;  %v1013_v11 = vpop.f32.mrb[30].mxu1 }
 0x135   : > { %v966_v12 = vpop.f32.mrb[31].mxu0  ;;  %v1014_v13 = vpop.f32.mrb[31].mxu1 }
 0x136   : > { %722 = vst [vmem:[%s1272_s28 + $0x70] sm:$0xff] %v964_v8  ;;  %738 = vst [vmem:[%s1272_s28 + $0xf0] sm:$0xff] %v1012_v9  ;;  %v967_v14 = vadd.f32 %v966_v12, %v965_v10  ;;  %v1015_v15 = vadd.f32 %v1014_v13, %v1013_v11 }
 0x138   : > { %723 = vst [vmem:[%s1272_s28 + $0x78] sm:$0xff] %v967_v14  ;;  %739 = vst [vmem:[%s1272_s28 + $0xf8] sm:$0xff] %v1015_v15 }
 0x139 PF: > { %s12_s11 = sadd.s32 1, %s1142_s11   ;;  %s1318_s9 = smov %s1138_s10 }
 0x13a   : > { %p9_p5 = scmp.ge.s32.totalorder %s12_s11, 4   ;;  %s1319_s10 = smov %s1321_s12 }
 0x13c   :  { %11 = sbr.rel (!%p9_p5) target bundleno = 2 (0x2), region = 61 }

// kernel: densenet_forward.55
= control target key start
LH: loop header
LB: loop body
LE: loop exit
PB: predicated region body
PF: predicated region fallthrough
CT: control target
= control target key end

     0   :  { %s554_s3 = inlined_call_operand.vmem [shape: bf16[128,128], index: 3, kind: input, shape index: {}]   ;;  %s555_s0 = inlined_call_operand.vmem [shape: f32[128,128], index: 0, kind: input, shape index: {}]   ;;  %s556_s1 = inlined_call_operand.vmem [shape: f32[1,128], index: 1, kind: input, shape index: {}]   ;;  %s557_s2 = inlined_call_operand.vmem [shape: f32[1,128], index: 2, kind: input, shape index: {}]   ;;  %s558_s4 = inlined_call_operand.vmem [shape: f32[128,128], index: 4, kind: output, shape index: {}]  }
   0x1   :  { %v359_v0 = vld [vmem:[%s554_s3] sm:$0xff]   ;;  %v360_v1 = vld [vmem:[%s554_s3 + $0x8] sm:$0xff]   ;;  %v361_v2 = vld [vmem:[%s554_s3 + $0x10] sm:$0xff]  }
   0x2   :  { %311 = vmatprep.subr.bf16.mxu0 %v359_v0  ;;  %343 = vmatprep.subr.bf16.mxu1 %v359_v0  ;;  %v362_v3 = vld [vmem:[%s554_s3 + $0x18] sm:$0xff]   ;;  %v18_v4 = vld [vmem:[%s555_s0] sm:$0xff]  ;;  %v19_v5 = vld [vmem:[%s555_s0 + $0x8] sm:$0xff] }
   0x3   :  { %312 = vmatpush3.bf16.msra.mxu0 %v359_v0  ;;  %351 = vmatpush3.bf16.msra.mxu1 %v359_v0  ;;  %v413_v6 = vld [vmem:[%s556_s1] ss:$0 sm:$0xff]  ;;  %v27_v11 = vld [vmem:[%s555_s0 + $0x48] sm:$0xff]  ;;  %v20_v21 = vld [vmem:[%s555_s0 + $0x10] sm:$0xff] }
   0x4   :  { %313 = vmatprep.subr.bf16.mxu0 %v360_v1  ;;  %344 = vmatprep.subr.bf16.mxu1 %v360_v1  ;;  %v41_v7 = vmul.f32 %v413_v6, %v18_v4  ;;  %v42_v8 = vmul.f32 %v413_v6, %v19_v5  ;;  %v420_v9 = vld [vmem:[%s557_s2] ss:$0 sm:$0xff]  ;;  %v50_v13 = vmul.f32 %v413_v6, %v27_v11  ;;  %v21_v24 = vld [vmem:[%s555_s0 + $0x18] sm:$0xff]  ;;  %v28_v25 = vld [vmem:[%s555_s0 + $0x50] sm:$0xff] }
   0x5   :  { %v26_v10 = vld [vmem:[%s555_s0 + $0x40] sm:$0xff]  ;;  %v29_v26 = vld [vmem:[%s555_s0 + $0x58] sm:$0xff]  ;;  %v364_v27 = vld [vmem:[%s554_s3 + $0x28] sm:$0xff]   ;;  %v43_v34 = vmul.f32 %v413_v6, %v20_v21  ;;  %v44_v35 = vmul.f32 %v413_v6, %v21_v24  ;;  %v51_v36 = vmul.f32 %v413_v6, %v28_v25 }
   0x6   :  { %v49_v12 = vmul.f32 %v413_v6, %v26_v10  ;;  %v64_v14 = vadd.f32 %v420_v9, %v41_v7  ;;  %v65_v15 = vadd.f32 %v420_v9, %v42_v8  ;;  %v363_v16 = vld [vmem:[%s554_s3 + $0x20] sm:$0xff]   ;;  %v73_v18 = vadd.f32 %v420_v9, %v50_v13  ;;  %v23_v31 = vld [vmem:[%s555_s0 + $0x28] sm:$0xff]  ;;  %v365_v42 = vld [vmem:[%s554_s3 + $0x30] sm:$0xff]  }
   0x7   :  { %314 = vmatpush3.bf16.msra.mxu0 %v360_v1  ;;  %352 = vmatpush3.bf16.msra.mxu1 %v360_v1  ;;  %v22_v29 = vld [vmem:[%s555_s0 + $0x20] sm:$0xff]  ;;  %v31_v33 = vld [vmem:[%s555_s0 + $0x68] sm:$0xff]  ;;  %v52_v37 = vmul.f32 %v413_v6, %v29_v26  ;;  %v46_v39 = vmul.f32 %v413_v6, %v23_v31  ;;  %v66_v43 = vadd.f32 %v420_v9, %v43_v34  ;;  %v24_v48 = vld [vmem:[%s555_s0 + $0x30] sm:$0xff] }
   0x8   :  { %315 = vmatprep.subr.bf16.mxu0 %v361_v2  ;;  %345 = vmatprep.subr.bf16.mxu1 %v361_v2  ;;  %v72_v17 = vadd.f32 %v420_v9, %v49_v12  ;;  %v80_v19 = vmax.f32 %v64_v14, 0.0  ;;  %v81_v20 = vmax.f32 %v65_v15, 0.0  ;;  %v89_v23 = vmax.f32 %v73_v18, 0.0  ;;  %v30_v32 = vld [vmem:[%s555_s0 + $0x60] sm:$0xff]  ;;  %v25_v52 = vld [vmem:[%s555_s0 + $0x38] sm:$0xff]  ;;  %v32_v53 = vld [vmem:[%s555_s0 + $0x70] sm:$0xff] }
   0x9   :  { %v45_v38 = vmul.f32 %v413_v6, %v22_v29  ;;  %v53_v40 = vmul.f32 %v413_v6, %v30_v32  ;;  %v54_v41 = vmul.f32 %v413_v6, %v31_v33  ;;  %v67_v44 = vadd.f32 %v420_v9, %v44_v35  ;;  %v33_v54 = vld [vmem:[%s555_s0 + $0x78] sm:$0xff] }
   0xa   :  { %v88_v22 = vmax.f32 %v72_v17, 0.0  ;;  %v96_v28 = vpack.c.bf16 %v81_v20, %v80_v19  ;;  %v74_v45 = vadd.f32 %v420_v9, %v51_v36  ;;  %v75_v46 = vadd.f32 %v420_v9, %v52_v37  ;;  %v366_v55 = vld [vmem:[%s554_s3 + $0x38] sm:$0xff]  }
   0xb   :  { %316 = vmatpush3.bf16.msra.mxu0 %v361_v2  ;;  %353 = vmatpush3.bf16.msra.mxu1 %v361_v2  ;;  %v68_v47 = vadd.f32 %v420_v9, %v45_v38  ;;  %v69_v49 = vadd.f32 %v420_v9, %v46_v39  ;;  %v76_v50 = vadd.f32 %v420_v9, %v53_v40  ;;  %v82_v56 = vmax.f32 %v66_v43, 0.0 }
   0xc   :  { %317 = vmatprep.subr.bf16.mxu0 %v362_v3  ;;  %346 = vmatprep.subr.bf16.mxu1 %v362_v3  ;;  %v100_v30 = vpack.c.bf16 %v89_v23, %v88_v22  ;;  %v77_v51 = vadd.f32 %v420_v9, %v54_v41  ;;  %v83_v57 = vmax.f32 %v67_v44, 0.0  ;;  %v90_v58 = vmax.f32 %v74_v45, 0.0 }
   0xd   :  { %327 = vmatprep.mubr.bf16.mxu0 %v96_v28  ;;  %v91_v59 = vmax.f32 %v75_v46, 0.0  ;;  %v47_v60 = vmul.f32 %v413_v6, %v24_v48  ;;  %v48_v61 = vmul.f32 %v413_v6, %v25_v52  ;;  %v55_v62 = vmul.f32 %v413_v6, %v32_v53 }
   0xe   :  { %335 = vmatprep.mubr.bf16.mxu1 %v100_v30  ;;  %v56_v63 = vmul.f32 %v413_v6, %v33_v54  ;;  %v84_v0 = vmax.f32 %v68_v47, 0.0  ;;  %v85_v1 = vmax.f32 %v69_v49, 0.0  ;;  %v92_v2 = vmax.f32 %v76_v50, 0.0 }
   0xf   :  { %318 = vmatpush3.bf16.msra.mxu0 %v362_v3  ;;  %354 = vmatpush3.bf16.msra.mxu1 %v362_v3  ;;  %v93_v3 = vmax.f32 %v77_v51, 0.0  ;;  %v97_v4 = vpack.c.bf16 %v83_v57, %v82_v56  ;;  %v101_v5 = vpack.c.bf16 %v91_v59, %v90_v58  ;;  %v70_v7 = vadd.f32 %v420_v9, %v47_v60 }
  0x10   :  { %319 = vmatprep.subr.bf16.mxu0 %v363_v16  ;;  %347 = vmatprep.subr.bf16.mxu1 %v363_v16  ;;  %v71_v8 = vadd.f32 %v420_v9, %v48_v61  ;;  %v78_v10 = vadd.f32 %v420_v9, %v55_v62  ;;  %v79_v11 = vadd.f32 %v420_v9, %v56_v63 }
  0x11   :  { %v98_v6 = vpack.c.bf16 %v85_v1, %v84_v0  ;;  %v102_v12 = vpack.c.bf16 %v93_v3, %v92_v2  ;;  %v86_v13 = vmax.f32 %v70_v7, 0.0 }
  0x12   :  { %v87_v14 = vmax.f32 %v71_v8, 0.0  ;;  %v94_v15 = vmax.f32 %v78_v10, 0.0 }
  0x13   :  { %320 = vmatpush3.bf16.msra.mxu0 %v363_v16  ;;  %355 = vmatpush3.bf16.msra.mxu1 %v363_v16  ;;  %v95_v16 = vmax.f32 %v79_v11, 0.0 }
  0x14   :  { %321 = vmatprep.subr.bf16.mxu0 %v364_v27  ;;  %348 = vmatprep.subr.bf16.mxu1 %v364_v27  ;;  %v99_v17 = vpack.c.bf16 %v87_v14, %v86_v13 }
  0x15   :  { %v103_v18 = vpack.c.bf16 %v95_v16, %v94_v15 }
  0x17   :  { %322 = vmatpush3.bf16.msra.mxu0 %v364_v27  ;;  %356 = vmatpush3.bf16.msra.mxu1 %v364_v27 }
  0x18   :  { %323 = vmatprep.subr.bf16.mxu0 %v365_v42  ;;  %349 = vmatprep.subr.bf16.mxu1 %v365_v42 }
  0x1b   :  { %324 = vmatpush3.bf16.msra.mxu0 %v365_v42  ;;  %357 = vmatpush3.bf16.msra.mxu1 %v365_v42 }
  0x1c   :  { %325 = vmatprep.subr.bf16.mxu0 %v366_v55  ;;  %350 = vmatprep.subr.bf16.mxu1 %v366_v55 }
  0x1f   :  { %326 = vmatpush3.bf16.msra.mxu0 %v366_v55  ;;  %358 = vmatpush3.bf16.msra.mxu1 %v366_v55 }
  0x22   :  { %328 = vmatmul.mubr.bf16.vlgmr.msra.gmra.mrb[0].mxu0 %v97_v4  ;;  %336 = vmatmul.mubr.bf16.vlgmr.msra.gmra.mrb[0].mxu1 %v101_v5 }
  0x23   :  { %331 = vmatprep.mubr.bf16.mxu0 %v98_v6  ;;  %339 = vmatprep.mubr.bf16.mxu1 %v102_v12 }
  0x2a   :  { %332 = vmatmul.mubr.bf16.gmra.mrb[4].mxu0 %v99_v17  ;;  %340 = vmatmul.mubr.bf16.gmra.mrb[4].mxu1 %v103_v18 }
  0xf5   :  { %v329_v19 = vpop.f32.mrb[0].mxu0  ;;  %v337_v20 = vpop.f32.mrb[0].mxu1 }
  0xf6   :  { %267 = vst [vmem:[%s558_s4 + $0x10] sm:$0xff] %v329_v19  ;;  %275 = vst [vmem:[%s558_s4 + $0x50] sm:$0xff] %v337_v20  ;;  %v202_v9 = vpop.f32.mrb[1].mxu0  ;;  %v234_v21 = vpop.f32.mrb[1].mxu1 }
  0xf7   :  { %265 = vst [vmem:[%s558_s4] sm:$0xff] %v202_v9  ;;  %273 = vst [vmem:[%s558_s4 + $0x40] sm:$0xff] %v234_v21  ;;  %v330_v22 = vpop.f32.mrb[2].mxu0  ;;  %v338_v23 = vpop.f32.mrb[2].mxu1 }
  0xf8   :  { %268 = vst [vmem:[%s558_s4 + $0x18] sm:$0xff] %v330_v22  ;;  %276 = vst [vmem:[%s558_s4 + $0x58] sm:$0xff] %v338_v23  ;;  %v205_v24 = vpop.f32.mrb[3].mxu0  ;;  %v237_v25 = vpop.f32.mrb[3].mxu1 }
  0xf9   :  { %266 = vst [vmem:[%s558_s4 + $0x8] sm:$0xff] %v205_v24  ;;  %274 = vst [vmem:[%s558_s4 + $0x48] sm:$0xff] %v237_v25 }
  0xfd   :  { %v333_v26 = vpop.f32.mrb[4].mxu0  ;;  %v341_v27 = vpop.f32.mrb[4].mxu1 }
  0xfe   :  { %271 = vst [vmem:[%s558_s4 + $0x30] sm:$0xff] %v333_v26  ;;  %279 = vst [vmem:[%s558_s4 + $0x70] sm:$0xff] %v341_v27  ;;  %v218_v28 = vpop.f32.mrb[5].mxu0  ;;  %v250_v29 = vpop.f32.mrb[5].mxu1 }
  0xff   :  { %269 = vst [vmem:[%s558_s4 + $0x20] sm:$0xff] %v218_v28  ;;  %277 = vst [vmem:[%s558_s4 + $0x60] sm:$0xff] %v250_v29  ;;  %v334_v30 = vpop.f32.mrb[6].mxu0  ;;  %v342_v31 = vpop.f32.mrb[6].mxu1 }
 0x100   :  { %272 = vst [vmem:[%s558_s4 + $0x38] sm:$0xff] %v334_v30  ;;  %280 = vst [vmem:[%s558_s4 + $0x78] sm:$0xff] %v342_v31  ;;  %v221_v32 = vpop.f32.mrb[7].mxu0  ;;  %v253_v33 = vpop.f32.mrb[7].mxu1 }
 0x101   :  { %270 = vst [vmem:[%s558_s4 + $0x28] sm:$0xff] %v221_v32  ;;  %278 = vst [vmem:[%s558_s4 + $0x68] sm:$0xff] %v253_v33 }

// kernel: densenet_forward.54
= control target key start
LH: loop header
LB: loop body
LE: loop exit
PB: predicated region body
PF: predicated region fallthrough
CT: control target
= control target key end

     0   :  { %v132_v0 = vmov 0.0   ;;  %s218_s0 = inlined_call_operand.vmem [shape: f32[128,128], index: 0, kind: input, shape index: {}]   ;;  %s219_s1 = inlined_call_operand.vmem [shape: f32[1,128], index: 1, kind: input, shape index: {}]   ;;  %s220_s2 = inlined_call_operand.vmem [shape: f32[1,128], index: 2, kind: input, shape index: {}]   ;;  %s221_s3 = inlined_call_operand.vmem [shape: f32[1,128], index: 3, kind: output, shape index: {0}]   ;;  %s222_s4 = inlined_call_operand.vmem [shape: f32[1,128], index: 4, kind: output, shape index: {1}]  }
   0x1   :  { %20 = vst [vmem:[#allocation2] sm:$0x1] %v132_v0  ;;  %21 = vst [vmem:[#allocation3] sm:$0x1] %v132_v0  ;;  %v22_v1 = vld [vmem:[%s218_s0] sm:$0xff]  ;;  %v23_v2 = vld [vmem:[%s218_s0 + $0x8] sm:$0xff] }
   0x2   :  { %v24_v3 = vld [vmem:[%s218_s0 + $0x10] sm:$0xff]  ;;  %v25_v4 = vld [vmem:[%s218_s0 + $0x18] sm:$0xff]  ;;  %v39_v5 = vadd.f32 %v23_v2, %v22_v1  ;;  %v63_v6 = vmul.f32 %v22_v1, %v22_v1  ;;  %v64_v7 = vmul.f32 %v23_v2, %v23_v2  ;;  %v26_v9 = vld [vmem:[%s218_s0 + $0x20] sm:$0xff] }
   0x3   :  { %v65_v8 = vmul.f32 %v24_v3, %v24_v3  ;;  %v66_v11 = vmul.f32 %v25_v4, %v25_v4  ;;  %v27_v13 = vld [vmem:[%s218_s0 + $0x28] sm:$0xff]  ;;  %v67_v15 = vmul.f32 %v26_v9, %v26_v9  ;;  %v28_v17 = vld [vmem:[%s218_s0 + $0x30] sm:$0xff]  ;;  %v29_v21 = vld [vmem:[%s218_s0 + $0x38] sm:$0xff] }
   0x4   :  { %v40_v10 = vadd.f32 %v39_v5, %v24_v3  ;;  %v79_v12 = vadd.f32 %v64_v7, %v63_v6  ;;  %v68_v19 = vmul.f32 %v27_v13, %v27_v13  ;;  %v69_v23 = vmul.f32 %v28_v17, %v28_v17  ;;  %v30_v25 = vld [vmem:[%s218_s0 + $0x40] sm:$0xff]  ;;  %v31_v29 = vld [vmem:[%s218_s0 + $0x48] sm:$0xff]  ;;  %v32_v33 = vld [vmem:[%s218_s0 + $0x50] sm:$0xff] }
   0x5   :  { %v70_v27 = vmul.f32 %v29_v21, %v29_v21  ;;  %v71_v31 = vmul.f32 %v30_v25, %v30_v25  ;;  %v72_v35 = vmul.f32 %v31_v29, %v31_v29  ;;  %v33_v37 = vld [vmem:[%s218_s0 + $0x58] sm:$0xff]  ;;  %v73_v39 = vmul.f32 %v32_v33, %v32_v33  ;;  %v34_v41 = vld [vmem:[%s218_s0 + $0x60] sm:$0xff]  ;;  %v35_v45 = vld [vmem:[%s218_s0 + $0x68] sm:$0xff] }
   0x6   :  { %v41_v14 = vadd.f32 %v40_v10, %v25_v4  ;;  %v80_v16 = vadd.f32 %v79_v12, %v65_v8  ;;  %v74_v43 = vmul.f32 %v33_v37, %v33_v37  ;;  %v75_v47 = vmul.f32 %v34_v41, %v34_v41  ;;  %v36_v49 = vld [vmem:[%s218_s0 + $0x70] sm:$0xff]  ;;  %v37_v53 = vld [vmem:[%s218_s0 + $0x78] sm:$0xff] }
   0x7   :  { %v76_v51 = vmul.f32 %v35_v45, %v35_v45  ;;  %v77_v55 = vmul.f32 %v36_v49, %v36_v49  ;;  %v78_v58 = vmul.f32 %v37_v53, %v37_v53 }
   0x8   :  { %v42_v18 = vadd.f32 %v41_v14, %v26_v9  ;;  %v81_v20 = vadd.f32 %v80_v16, %v66_v11  ;;  %v38_v7 = vld [vmem:[#allocation2] sm:$0x1]  ;;  %v62_v12 = vld [vmem:[#allocation3] sm:$0x1] }
   0xa   :  { %v43_v22 = vadd.f32 %v42_v18, %v27_v13  ;;  %v82_v24 = vadd.f32 %v81_v20, %v67_v15 }
   0xc   :  { %v44_v26 = vadd.f32 %v43_v22, %v28_v17  ;;  %v83_v28 = vadd.f32 %v82_v24, %v68_v19 }
   0xe   :  { %v45_v30 = vadd.f32 %v44_v26, %v29_v21  ;;  %v84_v32 = vadd.f32 %v83_v28, %v69_v23  ;;  %v112_v23 = vld [vmem:[%s219_s1] sm:$0x1] }
   0xf   :  { %v117_v26 = vld [vmem:[%s220_s2] sm:$0x1] }
  0x10   :  { %v46_v34 = vadd.f32 %v45_v30, %v30_v25  ;;  %v85_v36 = vadd.f32 %v84_v32, %v70_v27 }
  0x12   :  { %v47_v38 = vadd.f32 %v46_v34, %v31_v29  ;;  %v86_v40 = vadd.f32 %v85_v36, %v71_v31 }
  0x14   :  { %v48_v42 = vadd.f32 %v47_v38, %v32_v33  ;;  %v87_v44 = vadd.f32 %v86_v40, %v72_v35 }
  0x16   :  { %v49_v46 = vadd.f32 %v48_v42, %v33_v37  ;;  %v88_v48 = vadd.f32 %v87_v44, %v73_v39 }
  0x18   :  { %v50_v50 = vadd.f32 %v49_v46, %v34_v41  ;;  %v89_v52 = vadd.f32 %v88_v48, %v74_v43 }
  0x1a   :  { %v51_v54 = vadd.f32 %v50_v50, %v35_v45  ;;  %v90_v56 = vadd.f32 %v89_v52, %v75_v47 }
  0x1c   :  { %v52_v57 = vadd.f32 %v51_v54, %v36_v49  ;;  %v91_v59 = vadd.f32 %v90_v56, %v76_v51 }
  0x1e   :  { %v53_v60 = vadd.f32 %v52_v57, %v37_v53  ;;  %v92_v61 = vadd.f32 %v91_v59, %v77_v55 }
  0x20   :  { %v54_v62 = vrot.slane %v53_v60, 4  ;;  %v93_v63 = vadd.f32 %v92_v61, %v78_v58 }
  0x22   :  { %v55_v0 = vadd.f32 %v54_v62, %v53_v60  ;;  %v94_v1 = vrot.slane %v93_v63, 4 }
  0x24   :  { %v56_v2 = vrot.slane %v55_v0, 2  ;;  %v95_v3 = vadd.f32 %v94_v1, %v93_v63 }
  0x26   :  { %v57_v4 = vadd.f32 %v56_v2, %v55_v0  ;;  %v96_v5 = vrot.slane %v95_v3, 2 }
  0x28   :  { %v58_v6 = vrot.slane %v57_v4, 1  ;;  %v97_v8 = vadd.f32 %v96_v5, %v95_v3 }
  0x2a   :  { %v59_v9 = vadd.f32 %v58_v6, %v57_v4  ;;  %v98_v10 = vrot.slane %v97_v8, 1 }
  0x2c   :  { %v60_v11 = vadd.f32 %v59_v9, %v38_v7  ;;  %v99_v13 = vadd.f32 %v98_v10, %v97_v8 }
  0x2e   :  { %61 = vst [vmem:[#allocation2] sm:$0x1] %v60_v11  ;;  %v100_v14 = vadd.f32 %v99_v13, %v62_v12 }
  0x30   :  { %101 = vst [vmem:[#allocation3] sm:$0x1] %v100_v14 }
  0x35   :  { %v105_v15 = vld [vmem:[#allocation2] sm:$0x1] }
  0x36   :  { %v106_v16 = vmul.f32 0.0078125, %v105_v15 }
  0x37   :  { %v107_v17 = vld [vmem:[#allocation3] sm:$0x1] }
  0x38   :  { %v109_v18 = vmul.f32 %v106_v16, %v106_v16  ;;  %v108_v19 = vmul.f32 0.0078125, %v107_v17 }
  0x3a   :  { %v110_v20 = vsub.f32 %v108_v19, %v109_v18 }
  0x3c   :  { %v111_v21 = vmax.f32 %v110_v20, 0.0 }
  0x3e   :  { %v113_v22 = vadd.f32 1e-05, %v111_v21 }
  0x40   :  { %130 = vrsqrt.f32 %v113_v22 }
  0x4a   :  { %v131_v24 = vpop.eup %130 }
  0x4b   :  { %v115_v25 = vmul.f32 %v131_v24, %v112_v23 }
  0x4d   :  { %116 = vst [vmem:[%s221_s3] sm:$0x1] %v115_v25  ;;  %v118_v27 = vmul.f32 %v115_v25, %v106_v16 }
  0x4f   :  { %v119_v28 = vsub.f32 %v117_v26, %v118_v27 }
  0x51   :  { %120 = vst [vmem:[%s222_s4] sm:$0x1] %v119_v28 }

// kernel: densenet_forward.57
= control target key start
LH: loop header
LB: loop body
LE: loop exit
PB: predicated region body
PF: predicated region fallthrough
CT: control target
= control target key end

     0   :  { %s254_s0 = inlined_call_operand.vmem [shape: f32[128,128], index: 0, kind: input, shape index: {}]   ;;  %s255_s1 = inlined_call_operand.vmem [shape: f32[1,128], index: 1, kind: input, shape index: {}]   ;;  %s256_s2 = inlined_call_operand.vmem [shape: f32[1,128], index: 2, kind: input, shape index: {}]   ;;  %s257_s3 = inlined_call_operand.vmem [shape: f32[128,128], index: 3, kind: output, shape index: {}]  }
   0x1   :  { %v14_v0 = vld [vmem:[%s254_s0] sm:$0xff]  ;;  %v15_v4 = vld [vmem:[%s254_s0 + $0x8] sm:$0xff]  ;;  %v16_v5 = vld [vmem:[%s254_s0 + $0x10] sm:$0xff] }
   0x2   :  { %v112_v1 = vld [vmem:[%s255_s1] ss:$0 sm:$0xff]  ;;  %v17_v6 = vld [vmem:[%s254_s0 + $0x18] sm:$0xff]  ;;  %v19_v11 = vld [vmem:[%s254_s0 + $0x28] sm:$0xff] }
   0x3   :  { %v143_v2 = vld [vmem:[%s256_s2] ss:$0 sm:$0xff]  ;;  %v37_v3 = vmul.f32 %v112_v1, %v14_v0  ;;  %v38_v7 = vmul.f32 %v112_v1, %v15_v4  ;;  %v39_v8 = vmul.f32 %v112_v1, %v16_v5  ;;  %v40_v9 = vmul.f32 %v112_v1, %v17_v6  ;;  %v20_v12 = vld [vmem:[%s254_s0 + $0x30] sm:$0xff]  ;;  %v21_v17 = vld [vmem:[%s254_s0 + $0x38] sm:$0xff] }
   0x4   :  { %v18_v10 = vld [vmem:[%s254_s0 + $0x20] sm:$0xff]  ;;  %v42_v15 = vmul.f32 %v112_v1, %v19_v11  ;;  %v43_v16 = vmul.f32 %v112_v1, %v20_v12  ;;  %v44_v21 = vmul.f32 %v112_v1, %v21_v17  ;;  %v23_v27 = vld [vmem:[%s254_s0 + $0x48] sm:$0xff]  ;;  %v24_v28 = vld [vmem:[%s254_s0 + $0x50] sm:$0xff] }
   0x5   :  { %v60_v13 = vadd.f32 %v143_v2, %v37_v3  ;;  %v41_v14 = vmul.f32 %v112_v1, %v18_v10  ;;  %v61_v18 = vadd.f32 %v143_v2, %v38_v7  ;;  %v62_v19 = vadd.f32 %v143_v2, %v39_v8  ;;  %v22_v22 = vld [vmem:[%s254_s0 + $0x40] sm:$0xff]  ;;  %v25_v29 = vld [vmem:[%s254_s0 + $0x58] sm:$0xff]  ;;  %v27_v35 = vld [vmem:[%s254_s0 + $0x68] sm:$0xff] }
   0x6   :  { %v63_v20 = vadd.f32 %v143_v2, %v40_v9  ;;  %v65_v25 = vadd.f32 %v143_v2, %v42_v15  ;;  %v66_v26 = vadd.f32 %v143_v2, %v43_v16  ;;  %v67_v33 = vadd.f32 %v143_v2, %v44_v21  ;;  %v26_v34 = vld [vmem:[%s254_s0 + $0x60] sm:$0xff]  ;;  %v28_v36 = vld [vmem:[%s254_s0 + $0x70] sm:$0xff]  ;;  %v29_v41 = vld [vmem:[%s254_s0 + $0x78] sm:$0xff] }
   0x7   :  { %v76_v23 = vmax.f32 %v60_v13, 0.0  ;;  %v64_v24 = vadd.f32 %v143_v2, %v41_v14  ;;  %v77_v30 = vmax.f32 %v61_v18, 0.0  ;;  %v78_v31 = vmax.f32 %v62_v19, 0.0 }
   0x8   :  { %v79_v32 = vmax.f32 %v63_v20, 0.0  ;;  %v81_v38 = vmax.f32 %v65_v25, 0.0  ;;  %v82_v39 = vmax.f32 %v66_v26, 0.0  ;;  %v45_v40 = vmul.f32 %v112_v1, %v22_v22 }
   0x9   :  { %92 = vst [vmem:[%s257_s3] sm:$0xff] %v76_v23  ;;  %v80_v37 = vmax.f32 %v64_v24, 0.0  ;;  %93 = vst [vmem:[%s257_s3 + $0x8] sm:$0xff] %v77_v30  ;;  %v83_v42 = vmax.f32 %v67_v33, 0.0  ;;  %v46_v43 = vmul.f32 %v112_v1, %v23_v27  ;;  %v47_v44 = vmul.f32 %v112_v1, %v24_v28 }
   0xa   :  { %94 = vst [vmem:[%s257_s3 + $0x10] sm:$0xff] %v78_v31  ;;  %95 = vst [vmem:[%s257_s3 + $0x18] sm:$0xff] %v79_v32  ;;  %v48_v45 = vmul.f32 %v112_v1, %v25_v29  ;;  %v68_v46 = vadd.f32 %v143_v2, %v45_v40  ;;  %v49_v47 = vmul.f32 %v112_v1, %v26_v34 }
   0xb   :  { %96 = vst [vmem:[%s257_s3 + $0x20] sm:$0xff] %v80_v37  ;;  %97 = vst [vmem:[%s257_s3 + $0x28] sm:$0xff] %v81_v38  ;;  %v50_v48 = vmul.f32 %v112_v1, %v27_v35  ;;  %v51_v49 = vmul.f32 %v112_v1, %v28_v36  ;;  %v69_v50 = vadd.f32 %v143_v2, %v46_v43 }
   0xc   :  { %98 = vst [vmem:[%s257_s3 + $0x30] sm:$0xff] %v82_v39  ;;  %99 = vst [vmem:[%s257_s3 + $0x38] sm:$0xff] %v83_v42  ;;  %v70_v51 = vadd.f32 %v143_v2, %v47_v44  ;;  %v71_v52 = vadd.f32 %v143_v2, %v48_v45  ;;  %v52_v53 = vmul.f32 %v112_v1, %v29_v41  ;;  %v84_v54 = vmax.f32 %v68_v46, 0.0 }
   0xd   :  { %v72_v55 = vadd.f32 %v143_v2, %v49_v47  ;;  %v73_v56 = vadd.f32 %v143_v2, %v50_v48  ;;  %v74_v57 = vadd.f32 %v143_v2, %v51_v49  ;;  %v85_v58 = vmax.f32 %v69_v50, 0.0 }
   0xe   :  { %v86_v59 = vmax.f32 %v70_v51, 0.0  ;;  %v87_v60 = vmax.f32 %v71_v52, 0.0  ;;  %v75_v61 = vadd.f32 %v143_v2, %v52_v53  ;;  %100 = vst [vmem:[%s257_s3 + $0x40] sm:$0xff] %v84_v54 }
   0xf   :  { %v88_v62 = vmax.f32 %v72_v55, 0.0  ;;  %v89_v63 = vmax.f32 %v73_v56, 0.0  ;;  %v90_v0 = vmax.f32 %v74_v57, 0.0  ;;  %101 = vst [vmem:[%s257_s3 + $0x48] sm:$0xff] %v85_v58 }
  0x10   :  { %102 = vst [vmem:[%s257_s3 + $0x50] sm:$0xff] %v86_v59  ;;  %103 = vst [vmem:[%s257_s3 + $0x58] sm:$0xff] %v87_v60  ;;  %v91_v1 = vmax.f32 %v75_v61, 0.0 }
  0x11   :  { %104 = vst [vmem:[%s257_s3 + $0x60] sm:$0xff] %v88_v62  ;;  %105 = vst [vmem:[%s257_s3 + $0x68] sm:$0xff] %v89_v63 }
  0x12   :  { %106 = vst [vmem:[%s257_s3 + $0x70] sm:$0xff] %v90_v0  ;;  %107 = vst [vmem:[%s257_s3 + $0x78] sm:$0xff] %v91_v1 }

// kernel: densenet_forward.58
= control target key start
LH: loop header
LB: loop body
LE: loop exit
PB: predicated region body
PF: predicated region fallthrough
CT: control target
= control target key end

     0   :  { %s664_s1 = inlined_call_operand.vmem [shape: bf16[256,128], index: 1, kind: input, shape index: {}]   ;;  %s665_s0 = inlined_call_operand.vmem [shape: bf16[128,256], index: 0, kind: input, shape index: {}]   ;;  %s666_s2 = inlined_call_operand.vmem [shape: f32[128,128], index: 2, kind: output, shape index: {}]  }
   0x1   :  { %v465_v0 = vld [vmem:[%s664_s1 + $0x40] sm:$0xff]   ;;  %v467_v2 = vld [vmem:[%s664_s1 + $0x48] sm:$0xff]   ;;  %v469_v4 = vld [vmem:[%s664_s1 + $0x50] sm:$0xff]  }
   0x2   :  { %v466_v1 = vld [vmem:[%s664_s1] sm:$0xff]   ;;  %385 = vmatprep.subr.bf16.mxu0 %v465_v0  ;;  %449 = vmatprep.subr.bf16.mxu1 %v465_v0  ;;  %v468_v3 = vld [vmem:[%s664_s1 + $0x8] sm:$0xff]   ;;  %v470_v5 = vld [vmem:[%s664_s1 + $0x10] sm:$0xff]  }
   0x3   :  { %386 = vmatpush3.bf16.msra.mxu0 %v466_v1  ;;  %457 = vmatpush3.bf16.msra.mxu1 %v466_v1  ;;  %v471_v6 = vld [vmem:[%s664_s1 + $0x58] sm:$0xff]   ;;  %v473_v8 = vld [vmem:[%s664_s1 + $0x60] sm:$0xff]   ;;  %v475_v10 = vld [vmem:[%s664_s1 + $0x68] sm:$0xff]  }
   0x4   :  { %387 = vmatprep.subr.bf16.mxu0 %v467_v2  ;;  %450 = vmatprep.subr.bf16.mxu1 %v467_v2  ;;  %v472_v7 = vld [vmem:[%s664_s1 + $0x18] sm:$0xff]   ;;  %v474_v9 = vld [vmem:[%s664_s1 + $0x20] sm:$0xff]   ;;  %v476_v13 = vld [vmem:[%s664_s1 + $0x28] sm:$0xff]  }
   0x5   :  { %v483_v11 = vld [vmem:[%s665_s0 + $0x4] ss:$8 sps:$4 sm:$0xff]   ;;  %v477_v14 = vld [vmem:[%s664_s1 + $0x70] sm:$0xff]   ;;  %v479_v16 = vld [vmem:[%s664_s1 + $0x78] sm:$0xff]  }
   0x6   :  { %v486_v12 = vld [vmem:[%s665_s0 + $0x44] ss:$8 sps:$4 sm:$0xff]   ;;  %268 = vmatprep.mubr.bf16.mxu0 %v483_v11  ;;  %v478_v15 = vld [vmem:[%s664_s1 + $0x30] sm:$0xff]   ;;  %v480_v17 = vld [vmem:[%s664_s1 + $0x38] sm:$0xff]  }
   0x7   :  { %388 = vmatpush3.bf16.msra.mxu0 %v468_v3  ;;  %458 = vmatpush3.bf16.msra.mxu1 %v468_v3  ;;  %v481_v18 = vld [vmem:[%s665_s0] ss:$8 sps:$4 sm:$0xff]   ;;  %v487_v20 = vld [vmem:[%s665_s0 + $0x14] ss:$8 sps:$4 sm:$0xff]   ;;  %v491_v22 = vld [vmem:[%s665_s0 + $0x10] ss:$8 sps:$4 sm:$0xff]  }
   0x8   :  { %389 = vmatprep.subr.bf16.mxu0 %v469_v4  ;;  %451 = vmatprep.subr.bf16.mxu1 %v469_v4  ;;  %v484_v19 = vld [vmem:[%s665_s0 + $0x40] ss:$8 sps:$4 sm:$0xff]   ;;  %v489_v21 = vld [vmem:[%s665_s0 + $0x54] ss:$8 sps:$4 sm:$0xff]   ;;  %v492_v23 = vld [vmem:[%s665_s0 + $0x50] ss:$8 sps:$4 sm:$0xff]  }
   0x9   :  { %300 = vmatprep.mubr.bf16.mxu1 %v486_v12  ;;  %v493_v24 = vld [vmem:[%s665_s0 + $0x24] ss:$8 sps:$4 sm:$0xff]   ;;  %v497_v26 = vld [vmem:[%s665_s0 + $0x20] ss:$8 sps:$4 sm:$0xff]   ;;  %v499_v28 = vld [vmem:[%s665_s0 + $0x34] ss:$8 sps:$4 sm:$0xff]  }
   0xa   :  { %v495_v25 = vld [vmem:[%s665_s0 + $0x64] ss:$8 sps:$4 sm:$0xff]   ;;  %v498_v27 = vld [vmem:[%s665_s0 + $0x60] ss:$8 sps:$4 sm:$0xff]   ;;  %v501_v29 = vld [vmem:[%s665_s0 + $0x74] ss:$8 sps:$4 sm:$0xff]  }
   0xb   :  { %390 = vmatpush3.bf16.msra.mxu0 %v470_v5  ;;  %459 = vmatpush3.bf16.msra.mxu1 %v470_v5  ;;  %v503_v30 = vld [vmem:[%s665_s0 + $0x30] ss:$8 sps:$4 sm:$0xff]  }
   0xc   :  { %391 = vmatprep.subr.bf16.mxu0 %v471_v6  ;;  %452 = vmatprep.subr.bf16.mxu1 %v471_v6  ;;  %v504_v31 = vld [vmem:[%s665_s0 + $0x70] ss:$8 sps:$4 sm:$0xff]  }
   0xf   :  { %392 = vmatpush3.bf16.msra.mxu0 %v472_v7  ;;  %460 = vmatpush3.bf16.msra.mxu1 %v472_v7 }
  0x10   :  { %393 = vmatprep.subr.bf16.mxu0 %v473_v8  ;;  %453 = vmatprep.subr.bf16.mxu1 %v473_v8 }
  0x13   :  { %394 = vmatpush3.bf16.msra.mxu0 %v474_v9  ;;  %461 = vmatpush3.bf16.msra.mxu1 %v474_v9 }
  0x14   :  { %395 = vmatprep.subr.bf16.mxu0 %v475_v10  ;;  %454 = vmatprep.subr.bf16.mxu1 %v475_v10 }
  0x17   :  { %396 = vmatpush3.bf16.msra.mxu0 %v476_v13  ;;  %462 = vmatpush3.bf16.msra.mxu1 %v476_v13 }
  0x18   :  { %397 = vmatprep.subr.bf16.mxu0 %v477_v14  ;;  %455 = vmatprep.subr.bf16.mxu1 %v477_v14 }
  0x1b   :  { %398 = vmatpush3.bf16.msra.mxu0 %v478_v15  ;;  %463 = vmatpush3.bf16.msra.mxu1 %v478_v15 }
  0x1c   :  { %399 = vmatprep.subr.bf16.mxu0 %v479_v16  ;;  %456 = vmatprep.subr.bf16.mxu1 %v479_v16 }
  0x1f   :  { %400 = vmatpush3.bf16.msra.mxu0 %v480_v17  ;;  %464 = vmatpush3.bf16.msra.mxu1 %v480_v17 }
  0x22   :  { %269 = vmatmul.mubr.bf16.vlgmr.msra.gmra.mrb[0].mxu0 %v481_v18  ;;  %301 = vmatmul.mubr.bf16.vlgmr.msra.gmra.mrb[0].mxu1 %v484_v19 }
  0x23   :  { %276 = vmatprep.mubr.bf16.mxu0 %v487_v20  ;;  %308 = vmatprep.mubr.bf16.mxu1 %v489_v21 }
  0x2a   :  { %277 = vmatmul.mubr.bf16.gmra.mrb[4].mxu0 %v491_v22  ;;  %309 = vmatmul.mubr.bf16.gmra.mrb[4].mxu1 %v492_v23 }
  0x2b   :  { %284 = vmatprep.mubr.bf16.mxu0 %v493_v24  ;;  %316 = vmatprep.mubr.bf16.mxu1 %v495_v25 }
  0x32   :  { %285 = vmatmul.mubr.bf16.gmra.mrb[8].mxu0 %v497_v26  ;;  %317 = vmatmul.mubr.bf16.gmra.mrb[8].mxu1 %v498_v27 }
  0x33   :  { %292 = vmatprep.mubr.bf16.mxu0 %v499_v28  ;;  %324 = vmatprep.mubr.bf16.mxu1 %v501_v29 }
  0x3a   :  { %293 = vmatmul.mubr.bf16.gmra.mrb[12].mxu0 %v503_v30  ;;  %325 = vmatmul.mubr.bf16.gmra.mrb[12].mxu1 %v504_v31 }
  0xf5   :  { %v401_v32 = vpop.f32.mrb[0].mxu0  ;;  %v425_v33 = vpop.f32.mrb[0].mxu1 }
  0xf6   :  { %v402_v34 = vpop.f32.mrb[1].mxu0  ;;  %v426_v35 = vpop.f32.mrb[1].mxu1 }
  0xf7   :  { %v403_v36 = vadd.f32 %v402_v34, %v401_v32  ;;  %v427_v37 = vadd.f32 %v426_v35, %v425_v33  ;;  %v404_v38 = vpop.f32.mrb[2].mxu0  ;;  %v428_v39 = vpop.f32.mrb[2].mxu1 }
  0xf8   :  { %v405_v40 = vpop.f32.mrb[3].mxu0  ;;  %v429_v41 = vpop.f32.mrb[3].mxu1 }
  0xf9   :  { %333 = vst [vmem:[%s666_s2] sm:$0xff] %v403_v36  ;;  %341 = vst [vmem:[%s666_s2 + $0x40] sm:$0xff] %v427_v37  ;;  %v406_v42 = vadd.f32 %v405_v40, %v404_v38  ;;  %v430_v43 = vadd.f32 %v429_v41, %v428_v39 }
  0xfb   :  { %334 = vst [vmem:[%s666_s2 + $0x8] sm:$0xff] %v406_v42  ;;  %342 = vst [vmem:[%s666_s2 + $0x48] sm:$0xff] %v430_v43 }
  0xfd   :  { %v407_v44 = vpop.f32.mrb[4].mxu0  ;;  %v431_v45 = vpop.f32.mrb[4].mxu1 }
  0xfe   :  { %v408_v46 = vpop.f32.mrb[5].mxu0  ;;  %v432_v47 = vpop.f32.mrb[5].mxu1 }
  0xff   :  { %v409_v48 = vadd.f32 %v408_v46, %v407_v44  ;;  %v433_v49 = vadd.f32 %v432_v47, %v431_v45  ;;  %v410_v50 = vpop.f32.mrb[6].mxu0  ;;  %v434_v51 = vpop.f32.mrb[6].mxu1 }
 0x100   :  { %v411_v52 = vpop.f32.mrb[7].mxu0  ;;  %v435_v53 = vpop.f32.mrb[7].mxu1 }
 0x101   :  { %335 = vst [vmem:[%s666_s2 + $0x10] sm:$0xff] %v409_v48  ;;  %343 = vst [vmem:[%s666_s2 + $0x50] sm:$0xff] %v433_v49  ;;  %v412_v54 = vadd.f32 %v411_v52, %v410_v50  ;;  %v436_v55 = vadd.f32 %v435_v53, %v434_v51 }
 0x103   :  { %336 = vst [vmem:[%s666_s2 + $0x18] sm:$0xff] %v412_v54  ;;  %344 = vst [vmem:[%s666_s2 + $0x58] sm:$0xff] %v436_v55 }
 0x105   :  { %v413_v56 = vpop.f32.mrb[8].mxu0  ;;  %v437_v57 = vpop.f32.mrb[8].mxu1 }
 0x106   :  { %v414_v58 = vpop.f32.mrb[9].mxu0  ;;  %v438_v59 = vpop.f32.mrb[9].mxu1 }
 0x107   :  { %v415_v60 = vadd.f32 %v414_v58, %v413_v56  ;;  %v439_v61 = vadd.f32 %v438_v59, %v437_v57  ;;  %v416_v62 = vpop.f32.mrb[10].mxu0  ;;  %v440_v63 = vpop.f32.mrb[10].mxu1 }
 0x108   :  { %v417_v0 = vpop.f32.mrb[11].mxu0  ;;  %v441_v1 = vpop.f32.mrb[11].mxu1 }
 0x109   :  { %337 = vst [vmem:[%s666_s2 + $0x20] sm:$0xff] %v415_v60  ;;  %345 = vst [vmem:[%s666_s2 + $0x60] sm:$0xff] %v439_v61  ;;  %v418_v2 = vadd.f32 %v417_v0, %v416_v62  ;;  %v442_v3 = vadd.f32 %v441_v1, %v440_v63 }
 0x10b   :  { %338 = vst [vmem:[%s666_s2 + $0x28] sm:$0xff] %v418_v2  ;;  %346 = vst [vmem:[%s666_s2 + $0x68] sm:$0xff] %v442_v3 }
 0x10d   :  { %v419_v4 = vpop.f32.mrb[12].mxu0  ;;  %v443_v5 = vpop.f32.mrb[12].mxu1 }
 0x10e   :  { %v420_v6 = vpop.f32.mrb[13].mxu0  ;;  %v444_v7 = vpop.f32.mrb[13].mxu1 }
 0x10f   :  { %v421_v8 = vadd.f32 %v420_v6, %v419_v4  ;;  %v445_v9 = vadd.f32 %v444_v7, %v443_v5  ;;  %v422_v10 = vpop.f32.mrb[14].mxu0  ;;  %v446_v11 = vpop.f32.mrb[14].mxu1 }
 0x110   :  { %v423_v12 = vpop.f32.mrb[15].mxu0  ;;  %v447_v13 = vpop.f32.mrb[15].mxu1 }
 0x111   :  { %339 = vst [vmem:[%s666_s2 + $0x30] sm:$0xff] %v421_v8  ;;  %347 = vst [vmem:[%s666_s2 + $0x70] sm:$0xff] %v445_v9  ;;  %v424_v14 = vadd.f32 %v423_v12, %v422_v10  ;;  %v448_v15 = vadd.f32 %v447_v13, %v446_v11 }
 0x113   :  { %340 = vst [vmem:[%s666_s2 + $0x38] sm:$0xff] %v424_v14  ;;  %348 = vst [vmem:[%s666_s2 + $0x78] sm:$0xff] %v448_v15 }

// kernel: densenet_forward.66
= control target key start
LH: loop header
LB: loop body
LE: loop exit
PB: predicated region body
PF: predicated region fallthrough
CT: control target
= control target key end

     0   :  { %v84_v0 = vmov 0.0   ;;  %s134_s0 = inlined_call_operand.vmem [shape: f32[32,128], index: 0, kind: input, shape index: {}]   ;;  %s135_s1 = inlined_call_operand.vmem [shape: f32[1,128], index: 1, kind: input, shape index: {}]   ;;  %s136_s2 = inlined_call_operand.vmem [shape: f32[1,128], index: 2, kind: input, shape index: {}]   ;;  %s137_s3 = inlined_call_operand.vmem [shape: f32[1,128], index: 3, kind: output, shape index: {0}]   ;;  %s138_s4 = inlined_call_operand.vmem [shape: f32[1,128], index: 4, kind: output, shape index: {1}]  }
   0x1   :  { %20 = vst [vmem:[#allocation2] sm:$0x1] %v84_v0  ;;  %21 = vst [vmem:[#allocation3] sm:$0x1] %v84_v0  ;;  %v22_v1 = vld [vmem:[%s134_s0] sm:$0xff]  ;;  %v23_v2 = vld [vmem:[%s134_s0 + $0x8] sm:$0xff] }
   0x2   :  { %v24_v3 = vld [vmem:[%s134_s0 + $0x10] sm:$0xff]  ;;  %v25_v4 = vld [vmem:[%s134_s0 + $0x18] sm:$0xff]  ;;  %v27_v5 = vadd.f32 %v23_v2, %v22_v1  ;;  %v39_v6 = vmul.f32 %v22_v1, %v22_v1  ;;  %v40_v7 = vmul.f32 %v23_v2, %v23_v2  ;;  %v64_v39 = vld [vmem:[%s135_s1] sm:$0x1] }
   0x3   :  { %v41_v8 = vmul.f32 %v24_v3, %v24_v3  ;;  %v42_v10 = vmul.f32 %v25_v4, %v25_v4  ;;  %v69_v42 = vld [vmem:[%s136_s2] sm:$0x1] }
   0x4   :  { %v28_v9 = vadd.f32 %v27_v5, %v24_v3  ;;  %v43_v11 = vadd.f32 %v40_v7, %v39_v6 }
   0x6   :  { %v29_v12 = vadd.f32 %v28_v9, %v25_v4  ;;  %v44_v13 = vadd.f32 %v43_v11, %v41_v8 }
   0x8   :  { %v30_v14 = vrot.slane %v29_v12, 4  ;;  %v45_v15 = vadd.f32 %v44_v13, %v42_v10  ;;  %v26_v24 = vld [vmem:[#allocation2] sm:$0x1]  ;;  %v38_v27 = vld [vmem:[#allocation3] sm:$0x1] }
   0xa   :  { %v31_v16 = vadd.f32 %v30_v14, %v29_v12  ;;  %v46_v17 = vrot.slane %v45_v15, 4 }
   0xc   :  { %v32_v18 = vrot.slane %v31_v16, 2  ;;  %v47_v19 = vadd.f32 %v46_v17, %v45_v15 }
   0xe   :  { %v33_v20 = vadd.f32 %v32_v18, %v31_v16  ;;  %v48_v21 = vrot.slane %v47_v19, 2 }
  0x10   :  { %v34_v22 = vrot.slane %v33_v20, 1  ;;  %v49_v23 = vadd.f32 %v48_v21, %v47_v19 }
  0x12   :  { %v35_v25 = vadd.f32 %v34_v22, %v33_v20  ;;  %v50_v26 = vrot.slane %v49_v23, 1 }
  0x14   :  { %v36_v28 = vadd.f32 %v35_v25, %v26_v24  ;;  %v51_v29 = vadd.f32 %v50_v26, %v49_v23 }
  0x16   :  { %37 = vst [vmem:[#allocation2] sm:$0x1] %v36_v28  ;;  %v52_v30 = vadd.f32 %v51_v29, %v38_v27 }
  0x18   :  { %53 = vst [vmem:[#allocation3] sm:$0x1] %v52_v30 }
  0x1d   :  { %v57_v31 = vld [vmem:[#allocation2] sm:$0x1] }
  0x1e   :  { %v58_v32 = vmul.f32 0.03125, %v57_v31 }
  0x1f   :  { %v59_v33 = vld [vmem:[#allocation3] sm:$0x1] }
  0x20   :  { %v60_v34 = vmul.f32 0.03125, %v59_v33  ;;  %v61_v35 = vmul.f32 %v58_v32, %v58_v32 }
  0x22   :  { %v62_v36 = vsub.f32 %v60_v34, %v61_v35 }
  0x24   :  { %v63_v37 = vmax.f32 %v62_v36, 0.0 }
  0x26   :  { %v65_v38 = vadd.f32 1e-05, %v63_v37 }
  0x28   :  { %82 = vrsqrt.f32 %v65_v38 }
  0x32   :  { %v83_v40 = vpop.eup %82 }
  0x33   :  { %v67_v41 = vmul.f32 %v83_v40, %v64_v39 }
  0x35   :  { %68 = vst [vmem:[%s137_s3] sm:$0x1] %v67_v41  ;;  %v70_v43 = vmul.f32 %v67_v41, %v58_v32 }
  0x37   :  { %v71_v44 = vsub.f32 %v69_v42, %v70_v43 }
  0x39   :  { %72 = vst [vmem:[%s138_s4] sm:$0x1] %v71_v44 }

// kernel: densenet_forward.69
= control target key start
LH: loop header
LB: loop body
LE: loop exit
PB: predicated region body
PF: predicated region fallthrough
CT: control target
= control target key end

     0   :  { %s104_s0 = inlined_call_operand.vmem [shape: f32[32,128], index: 0, kind: input, shape index: {}]   ;;  %s105_s1 = inlined_call_operand.vmem [shape: f32[1,128], index: 1, kind: input, shape index: {}]   ;;  %s106_s2 = inlined_call_operand.vmem [shape: f32[1,128], index: 2, kind: input, shape index: {}]   ;;  %s107_s3 = inlined_call_operand.vmem [shape: f32[32,128], index: 3, kind: output, shape index: {}]  }
   0x1   :  { %v14_v0 = vld [vmem:[%s104_s0] sm:$0xff]  ;;  %v15_v4 = vld [vmem:[%s104_s0 + $0x8] sm:$0xff]  ;;  %v16_v5 = vld [vmem:[%s104_s0 + $0x10] sm:$0xff] }
   0x2   :  { %v52_v1 = vld [vmem:[%s105_s1] ss:$0 sm:$0xff]  ;;  %v17_v6 = vld [vmem:[%s104_s0 + $0x18] sm:$0xff] }
   0x3   :  { %v53_v2 = vld [vmem:[%s106_s2] ss:$0 sm:$0xff]  ;;  %v25_v3 = vmul.f32 %v52_v1, %v14_v0  ;;  %v26_v7 = vmul.f32 %v52_v1, %v15_v4  ;;  %v27_v8 = vmul.f32 %v52_v1, %v16_v5  ;;  %v28_v9 = vmul.f32 %v52_v1, %v17_v6 }
   0x5   :  { %v36_v10 = vadd.f32 %v53_v2, %v25_v3  ;;  %v37_v11 = vadd.f32 %v53_v2, %v26_v7  ;;  %v38_v12 = vadd.f32 %v53_v2, %v27_v8  ;;  %v39_v13 = vadd.f32 %v53_v2, %v28_v9 }
   0x7   :  { %v40_v14 = vmax.f32 %v36_v10, 0.0  ;;  %v41_v15 = vmax.f32 %v37_v11, 0.0  ;;  %v42_v16 = vmax.f32 %v38_v12, 0.0  ;;  %v43_v17 = vmax.f32 %v39_v13, 0.0 }
   0x9   :  { %44 = vst [vmem:[%s107_s3] sm:$0xff] %v40_v14  ;;  %45 = vst [vmem:[%s107_s3 + $0x8] sm:$0xff] %v41_v15 }
   0xa   :  { %46 = vst [vmem:[%s107_s3 + $0x10] sm:$0xff] %v42_v16  ;;  %47 = vst [vmem:[%s107_s3 + $0x18] sm:$0xff] %v43_v17 }

// kernel: densenet_forward.67
= control target key start
LH: loop header
LB: loop body
LE: loop exit
PB: predicated region body
PF: predicated region fallthrough
CT: control target
= control target key end

     0   :  { %s298_s3 = inlined_call_operand.vmem [shape: bf16[128,128], index: 3, kind: input, shape index: {}]   ;;  %s299_s0 = inlined_call_operand.vmem [shape: f32[32,128], index: 0, kind: input, shape index: {}]   ;;  %s300_s1 = inlined_call_operand.vmem [shape: f32[1,128], index: 1, kind: input, shape index: {}]   ;;  %s301_s2 = inlined_call_operand.vmem [shape: f32[1,128], index: 2, kind: input, shape index: {}]   ;;  %s302_s4 = inlined_call_operand.vmem [shape: f32[32,128], index: 4, kind: output, shape index: {}]  }
   0x1   :  { %v211_v0 = vld [vmem:[%s298_s3] sm:$0xff]   ;;  %v212_v1 = vld [vmem:[%s298_s3 + $0x8] sm:$0xff]   ;;  %v213_v2 = vld [vmem:[%s298_s3 + $0x10] sm:$0xff]  }
   0x2   :  { %191 = vmatprep.subr.bf16.mxu0 %v211_v0  ;;  %v214_v3 = vld [vmem:[%s298_s3 + $0x18] sm:$0xff]   ;;  %v18_v4 = vld [vmem:[%s299_s0] sm:$0xff]  ;;  %v19_v5 = vld [vmem:[%s299_s0 + $0x8] sm:$0xff] }
   0x3   :  { %192 = vmatpush3.bf16.msra.mxu0 %v211_v0  ;;  %v171_v6 = vld [vmem:[%s300_s1] ss:$0 sm:$0xff]  ;;  %v20_v16 = vld [vmem:[%s299_s0 + $0x10] sm:$0xff]  ;;  %v21_v17 = vld [vmem:[%s299_s0 + $0x18] sm:$0xff] }
   0x4   :  { %193 = vmatprep.subr.bf16.mxu0 %v212_v1  ;;  %v29_v7 = vmul.f32 %v171_v6, %v18_v4  ;;  %v30_v8 = vmul.f32 %v171_v6, %v19_v5  ;;  %v172_v9 = vld [vmem:[%s301_s2] ss:$0 sm:$0xff]  ;;  %v216_v18 = vld [vmem:[%s298_s3 + $0x28] sm:$0xff]   ;;  %v31_v19 = vmul.f32 %v171_v6, %v20_v16  ;;  %v32_v20 = vmul.f32 %v171_v6, %v21_v17  ;;  %v217_v21 = vld [vmem:[%s298_s3 + $0x30] sm:$0xff]  }
   0x5   :  { %v215_v12 = vld [vmem:[%s298_s3 + $0x20] sm:$0xff]   ;;  %v218_v24 = vld [vmem:[%s298_s3 + $0x38] sm:$0xff]  }
   0x6   :  { %v40_v10 = vadd.f32 %v172_v9, %v29_v7  ;;  %v41_v11 = vadd.f32 %v172_v9, %v30_v8  ;;  %v42_v22 = vadd.f32 %v172_v9, %v31_v19  ;;  %v43_v23 = vadd.f32 %v172_v9, %v32_v20 }
   0x7   :  { %194 = vmatpush3.bf16.msra.mxu0 %v212_v1 }
   0x8   :  { %195 = vmatprep.subr.bf16.mxu0 %v213_v2  ;;  %v44_v13 = vmax.f32 %v40_v10, 0.0  ;;  %v45_v14 = vmax.f32 %v41_v11, 0.0  ;;  %v46_v25 = vmax.f32 %v42_v22, 0.0  ;;  %v47_v26 = vmax.f32 %v43_v23, 0.0 }
   0xa   :  { %v48_v15 = vpack.c.bf16 %v45_v14, %v44_v13  ;;  %v49_v27 = vpack.c.bf16 %v47_v26, %v46_v25 }
   0xb   :  { %196 = vmatpush3.bf16.msra.mxu0 %v213_v2 }
   0xc   :  { %197 = vmatprep.subr.bf16.mxu0 %v214_v3  ;;  %207 = vmatprep.mubr.bf16.mxu0 %v48_v15 }
   0xf   :  { %198 = vmatpush3.bf16.msra.mxu0 %v214_v3 }
  0x10   :  { %199 = vmatprep.subr.bf16.mxu0 %v215_v12 }
  0x13   :  { %200 = vmatpush3.bf16.msra.mxu0 %v215_v12 }
  0x14   :  { %201 = vmatprep.subr.bf16.mxu0 %v216_v18 }
  0x17   :  { %202 = vmatpush3.bf16.msra.mxu0 %v216_v18 }
  0x18   :  { %203 = vmatprep.subr.bf16.mxu0 %v217_v21 }
  0x1b   :  { %204 = vmatpush3.bf16.msra.mxu0 %v217_v21 }
  0x1c   :  { %205 = vmatprep.subr.bf16.mxu0 %v218_v24 }
  0x1f   :  { %206 = vmatpush3.bf16.msra.mxu0 %v218_v24 }
  0x22   :  { %208 = vmatmul.mubr.bf16.vlgmr.msra.gmra.mrb[0].mxu0 %v49_v27 }
  0xf5   :  { %v209_v28 = vpop.f32.mrb[0].mxu0 }
  0xf6   :  { %165 = vst [vmem:[%s302_s4 + $0x10] sm:$0xff] %v209_v28  ;;  %v148_v29 = vpop.f32.mrb[1].mxu0 }
  0xf7   :  { %163 = vst [vmem:[%s302_s4] sm:$0xff] %v148_v29  ;;  %v210_v30 = vpop.f32.mrb[2].mxu0 }
  0xf8   :  { %166 = vst [vmem:[%s302_s4 + $0x18] sm:$0xff] %v210_v30  ;;  %v151_v31 = vpop.f32.mrb[3].mxu0 }
  0xf9   :  { %164 = vst [vmem:[%s302_s4 + $0x8] sm:$0xff] %v151_v31 }

// kernel: densenet_forward.70
= control target key start
LH: loop header
LB: loop body
LE: loop exit
PB: predicated region body
PF: predicated region fallthrough
CT: control target
= control target key end

     0   :  { %s394_s1 = inlined_call_operand.vmem [shape: bf16[256,128], index: 1, kind: input, shape index: {}]   ;;  %s395_s0 = inlined_call_operand.vmem [shape: bf16[32,256], index: 0, kind: input, shape index: {}]   ;;  %s396_s2 = inlined_call_operand.vmem [shape: f32[32,128], index: 2, kind: output, shape index: {}]  }
   0x1   :  { %v285_v0 = vld [vmem:[%s394_s1 + $0x40] sm:$0xff]   ;;  %v287_v2 = vld [vmem:[%s394_s1 + $0x48] sm:$0xff]   ;;  %v289_v4 = vld [vmem:[%s394_s1 + $0x50] sm:$0xff]  }
   0x2   :  { %v286_v1 = vld [vmem:[%s394_s1] sm:$0xff]   ;;  %241 = vmatprep.subr.bf16.mxu0 %v285_v0  ;;  %269 = vmatprep.subr.bf16.mxu1 %v285_v0  ;;  %v288_v3 = vld [vmem:[%s394_s1 + $0x8] sm:$0xff]   ;;  %v290_v5 = vld [vmem:[%s394_s1 + $0x10] sm:$0xff]  }
   0x3   :  { %242 = vmatpush3.bf16.msra.mxu0 %v286_v1  ;;  %277 = vmatpush3.bf16.msra.mxu1 %v286_v1  ;;  %v291_v6 = vld [vmem:[%s394_s1 + $0x58] sm:$0xff]   ;;  %v293_v8 = vld [vmem:[%s394_s1 + $0x60] sm:$0xff]   ;;  %v295_v10 = vld [vmem:[%s394_s1 + $0x68] sm:$0xff]  }
   0x4   :  { %243 = vmatprep.subr.bf16.mxu0 %v287_v2  ;;  %270 = vmatprep.subr.bf16.mxu1 %v287_v2  ;;  %v292_v7 = vld [vmem:[%s394_s1 + $0x18] sm:$0xff]   ;;  %v294_v9 = vld [vmem:[%s394_s1 + $0x20] sm:$0xff]   ;;  %v296_v13 = vld [vmem:[%s394_s1 + $0x28] sm:$0xff]  }
   0x5   :  { %v303_v11 = vld [vmem:[%s395_s0 + $0x4] ss:$8 sps:$4 sm:$0xff]   ;;  %v306_v12 = vld [vmem:[%s395_s0 + $0x14] ss:$8 sps:$4 sm:$0xff]   ;;  %v301_v18 = vld [vmem:[%s395_s0] ss:$8 sps:$4 sm:$0xff]  }
   0x6   :  { %v297_v14 = vld [vmem:[%s394_s1 + $0x70] sm:$0xff]   ;;  %196 = vmatprep.mubr.bf16.mxu0 %v303_v11  ;;  %204 = vmatprep.mubr.bf16.mxu1 %v306_v12  ;;  %v299_v16 = vld [vmem:[%s394_s1 + $0x78] sm:$0xff]  }
   0x7   :  { %244 = vmatpush3.bf16.msra.mxu0 %v288_v3  ;;  %278 = vmatpush3.bf16.msra.mxu1 %v288_v3  ;;  %v298_v15 = vld [vmem:[%s394_s1 + $0x30] sm:$0xff]   ;;  %v300_v17 = vld [vmem:[%s394_s1 + $0x38] sm:$0xff]  }
   0x8   :  { %245 = vmatprep.subr.bf16.mxu0 %v289_v4  ;;  %271 = vmatprep.subr.bf16.mxu1 %v289_v4  ;;  %v304_v19 = vld [vmem:[%s395_s0 + $0x10] ss:$8 sps:$4 sm:$0xff]  }
   0xb   :  { %246 = vmatpush3.bf16.msra.mxu0 %v290_v5  ;;  %279 = vmatpush3.bf16.msra.mxu1 %v290_v5 }
   0xc   :  { %247 = vmatprep.subr.bf16.mxu0 %v291_v6  ;;  %272 = vmatprep.subr.bf16.mxu1 %v291_v6 }
   0xf   :  { %248 = vmatpush3.bf16.msra.mxu0 %v292_v7  ;;  %280 = vmatpush3.bf16.msra.mxu1 %v292_v7 }
  0x10   :  { %249 = vmatprep.subr.bf16.mxu0 %v293_v8  ;;  %273 = vmatprep.subr.bf16.mxu1 %v293_v8 }
  0x13   :  { %250 = vmatpush3.bf16.msra.mxu0 %v294_v9  ;;  %281 = vmatpush3.bf16.msra.mxu1 %v294_v9 }
  0x14   :  { %251 = vmatprep.subr.bf16.mxu0 %v295_v10  ;;  %274 = vmatprep.subr.bf16.mxu1 %v295_v10 }
  0x17   :  { %252 = vmatpush3.bf16.msra.mxu0 %v296_v13  ;;  %282 = vmatpush3.bf16.msra.mxu1 %v296_v13 }
  0x18   :  { %253 = vmatprep.subr.bf16.mxu0 %v297_v14  ;;  %275 = vmatprep.subr.bf16.mxu1 %v297_v14 }
  0x1b   :  { %254 = vmatpush3.bf16.msra.mxu0 %v298_v15  ;;  %283 = vmatpush3.bf16.msra.mxu1 %v298_v15 }
  0x1c   :  { %255 = vmatprep.subr.bf16.mxu0 %v299_v16  ;;  %276 = vmatprep.subr.bf16.mxu1 %v299_v16 }
  0x1f   :  { %256 = vmatpush3.bf16.msra.mxu0 %v300_v17  ;;  %284 = vmatpush3.bf16.msra.mxu1 %v300_v17 }
  0x22   :  { %197 = vmatmul.mubr.bf16.vlgmr.msra.gmra.mrb[0].mxu0 %v301_v18  ;;  %205 = vmatmul.mubr.bf16.vlgmr.msra.gmra.mrb[0].mxu1 %v304_v19 }
  0xf5   :  { %v257_v20 = vpop.f32.mrb[0].mxu0  ;;  %v263_v21 = vpop.f32.mrb[0].mxu1 }
  0xf6   :  { %v258_v22 = vpop.f32.mrb[1].mxu0  ;;  %v264_v23 = vpop.f32.mrb[1].mxu1 }
  0xf7   :  { %v259_v24 = vadd.f32 %v258_v22, %v257_v20  ;;  %v265_v25 = vadd.f32 %v264_v23, %v263_v21  ;;  %v260_v26 = vpop.f32.mrb[2].mxu0  ;;  %v266_v27 = vpop.f32.mrb[2].mxu1 }
  0xf8   :  { %v261_v28 = vpop.f32.mrb[3].mxu0  ;;  %v267_v29 = vpop.f32.mrb[3].mxu1 }
  0xf9   :  { %213 = vst [vmem:[%s396_s2] sm:$0xff] %v259_v24  ;;  %215 = vst [vmem:[%s396_s2 + $0x10] sm:$0xff] %v265_v25  ;;  %v262_v30 = vadd.f32 %v261_v28, %v260_v26  ;;  %v268_v31 = vadd.f32 %v267_v29, %v266_v27 }
  0xfb   :  { %214 = vst [vmem:[%s396_s2 + $0x8] sm:$0xff] %v262_v30  ;;  %216 = vst [vmem:[%s396_s2 + $0x18] sm:$0xff] %v268_v31 }

// kernel: densenet_forward.78
= control target key start
LH: loop header
LB: loop body
LE: loop exit
PB: predicated region body
PF: predicated region fallthrough
CT: control target
= control target key end

     0   :  { %v76_v0 = vmov 0.0   ;;  %s120_s0 = inlined_call_operand.vmem [shape: f32[16,128], index: 0, kind: input, shape index: {}]   ;;  %s121_s1 = inlined_call_operand.vmem [shape: f32[1,128], index: 1, kind: input, shape index: {}]   ;;  %s122_s2 = inlined_call_operand.vmem [shape: f32[1,128], index: 2, kind: input, shape index: {}]   ;;  %s123_s3 = inlined_call_operand.vmem [shape: f32[1,128], index: 3, kind: output, shape index: {0}]   ;;  %s124_s4 = inlined_call_operand.vmem [shape: f32[1,128], index: 4, kind: output, shape index: {1}]  }
   0x1   :  { %20 = vst [vmem:[#allocation2] sm:$0x1] %v76_v0  ;;  %21 = vst [vmem:[#allocation3] sm:$0x1] %v76_v0  ;;  %v22_v1 = vld [vmem:[%s120_s0] sm:$0xff]  ;;  %v23_v2 = vld [vmem:[%s120_s0 + $0x8] sm:$0xff] }
   0x2   :  { %v25_v3 = vadd.f32 %v23_v2, %v22_v1  ;;  %v35_v4 = vmul.f32 %v22_v1, %v22_v1  ;;  %v36_v5 = vmul.f32 %v23_v2, %v23_v2  ;;  %v56_v31 = vld [vmem:[%s121_s1] sm:$0x1] }
   0x3   :  { %v61_v34 = vld [vmem:[%s122_s2] sm:$0x1] }
   0x4   :  { %v26_v6 = vrot.slane %v25_v3, 4  ;;  %v37_v7 = vadd.f32 %v36_v5, %v35_v4 }
   0x6   :  { %v27_v8 = vadd.f32 %v26_v6, %v25_v3  ;;  %v38_v9 = vrot.slane %v37_v7, 4 }
   0x8   :  { %v28_v10 = vrot.slane %v27_v8, 2  ;;  %v39_v11 = vadd.f32 %v38_v9, %v37_v7  ;;  %v24_v16 = vld [vmem:[#allocation2] sm:$0x1]  ;;  %v34_v19 = vld [vmem:[#allocation3] sm:$0x1] }
   0xa   :  { %v29_v12 = vadd.f32 %v28_v10, %v27_v8  ;;  %v40_v13 = vrot.slane %v39_v11, 2 }
   0xc   :  { %v30_v14 = vrot.slane %v29_v12, 1  ;;  %v41_v15 = vadd.f32 %v40_v13, %v39_v11 }
   0xe   :  { %v31_v17 = vadd.f32 %v30_v14, %v29_v12  ;;  %v42_v18 = vrot.slane %v41_v15, 1 }
  0x10   :  { %v32_v20 = vadd.f32 %v31_v17, %v24_v16  ;;  %v43_v21 = vadd.f32 %v42_v18, %v41_v15 }
  0x12   :  { %33 = vst [vmem:[#allocation2] sm:$0x1] %v32_v20  ;;  %v44_v22 = vadd.f32 %v43_v21, %v34_v19 }
  0x14   :  { %45 = vst [vmem:[#allocation3] sm:$0x1] %v44_v22 }
  0x19   :  { %v49_v23 = vld [vmem:[#allocation2] sm:$0x1] }
  0x1a   :  { %v50_v24 = vmul.f32 0.125, %v49_v23 }
  0x1b   :  { %v51_v25 = vld [vmem:[#allocation3] sm:$0x1] }
  0x1c   :  { %v52_v26 = vmul.f32 0.125, %v51_v25  ;;  %v53_v27 = vmul.f32 %v50_v24, %v50_v24 }
  0x1e   :  { %v54_v28 = vsub.f32 %v52_v26, %v53_v27 }
  0x20   :  { %v55_v29 = vmax.f32 %v54_v28, 0.0 }
  0x22   :  { %v57_v30 = vadd.f32 1e-05, %v55_v29 }
  0x24   :  { %74 = vrsqrt.f32 %v57_v30 }
  0x2e   :  { %v75_v32 = vpop.eup %74 }
  0x2f   :  { %v59_v33 = vmul.f32 %v75_v32, %v56_v31 }
  0x31   :  { %60 = vst [vmem:[%s123_s3] sm:$0x1] %v59_v33  ;;  %v62_v35 = vmul.f32 %v59_v33, %v50_v24 }
  0x33   :  { %v63_v36 = vsub.f32 %v61_v34, %v62_v35 }
  0x35   :  { %64 = vst [vmem:[%s124_s4] sm:$0x1] %v63_v36 }

// kernel: densenet_forward.79
= control target key start
LH: loop header
LB: loop body
LE: loop exit
PB: predicated region body
PF: predicated region fallthrough
CT: control target
= control target key end

     0   :  { %v201_v0 = vmov 0.0   ;;  %vm202_vm0 = vmmov 0   ;;  %s270_s3 = inlined_call_operand.vmem [shape: bf16[128,128], index: 3, kind: input, shape index: {}]   ;;  %s271_s0 = inlined_call_operand.vmem [shape: f32[16,128], index: 0, kind: input, shape index: {}]   ;;  %s272_s1 = inlined_call_operand.vmem [shape: f32[1,128], index: 1, kind: input, shape index: {}]   ;;  %s273_s2 = inlined_call_operand.vmem [shape: f32[1,128], index: 2, kind: input, shape index: {}]   ;;  %s274_s4 = inlined_call_operand.vmem [shape: f32[16,128], index: 4, kind: output, shape index: {}]  }
   0x1   :  { %171 = vmatprep.subr.bf16.mxu0 %v201_v0  ;;  %v193_v1 = vld [vmem:[%s270_s3] sm:$0xff]   ;;  %187 = vmatprep.mubr.msk.bf16.mxu0 %vm202_vm0, %v201_v0  ;;  %v194_v2 = vld [vmem:[%s270_s3 + $0x8] sm:$0xff]   ;;  %v195_v3 = vld [vmem:[%s270_s3 + $0x10] sm:$0xff]  }
   0x2   :  { %172 = vmatpush3.bf16.msra.mxu0 %v193_v1  ;;  %v196_v4 = vld [vmem:[%s270_s3 + $0x18] sm:$0xff]   ;;  %v197_v5 = vld [vmem:[%s270_s3 + $0x20] sm:$0xff]   ;;  %v19_v7 = vld [vmem:[%s271_s0 + $0x8] sm:$0xff] }
   0x3   :  { %173 = vmatprep.subr.bf16.mxu0 %v201_v0  ;;  %v18_v6 = vld [vmem:[%s271_s0] sm:$0xff]  ;;  %v198_v11 = vld [vmem:[%s270_s3 + $0x28] sm:$0xff]   ;;  %v199_v15 = vld [vmem:[%s270_s3 + $0x30] sm:$0xff]  }
   0x4   :  { %v152_v8 = vld [vmem:[%s272_s1] ss:$0 sm:$0xff]  ;;  %v200_v18 = vld [vmem:[%s270_s3 + $0x38] sm:$0xff]  }
   0x5   :  { %v27_v9 = vmul.f32 %v152_v8, %v18_v6  ;;  %v28_v10 = vmul.f32 %v152_v8, %v19_v7  ;;  %v153_v12 = vld [vmem:[%s273_s2] ss:$0 sm:$0xff] }
   0x6   :  { %174 = vmatpush3.bf16.msra.mxu0 %v194_v2 }
   0x7   :  { %175 = vmatprep.subr.bf16.mxu0 %v201_v0  ;;  %v36_v13 = vadd.f32 %v153_v12, %v27_v9  ;;  %v37_v14 = vadd.f32 %v153_v12, %v28_v10 }
   0x9   :  { %v38_v16 = vmax.f32 %v36_v13, 0.0  ;;  %v39_v17 = vmax.f32 %v37_v14, 0.0 }
   0xa   :  { %176 = vmatpush3.bf16.msra.mxu0 %v195_v3 }
   0xb   :  { %177 = vmatprep.subr.bf16.mxu0 %v201_v0  ;;  %v40_v19 = vpack.c.bf16 %v39_v17, %v38_v16 }
   0xe   :  { %178 = vmatpush3.bf16.msra.mxu0 %v196_v4 }
   0xf   :  { %179 = vmatprep.subr.bf16.mxu0 %v201_v0 }
  0x12   :  { %180 = vmatpush3.bf16.msra.mxu0 %v197_v5 }
  0x13   :  { %181 = vmatprep.subr.bf16.mxu0 %v201_v0 }
  0x16   :  { %182 = vmatpush3.bf16.msra.mxu0 %v198_v11 }
  0x17   :  { %183 = vmatprep.subr.bf16.mxu0 %v201_v0 }
  0x1a   :  { %184 = vmatpush3.bf16.msra.mxu0 %v199_v15 }
  0x1b   :  { %185 = vmatprep.subr.bf16.mxu0 %v201_v0 }
  0x1e   :  { %186 = vmatpush3.bf16.msra.mxu0 %v200_v18 }
  0x21   :  { %188 = vmatmul.mubr.bf16.vlgmr.msra.gmra.mrb[0].mxu0 %v40_v19 }
  0xf4   :  { %v139_v20 = vpop.f32.mrb[0].mxu0 }
  0xf5   :  { %146 = vst [vmem:[%s274_s4] sm:$0xff] %v139_v20  ;;  %v189_v21 = vpop.f32.mrb[1].mxu0 }
  0xf6   :  { %v142_v22 = vpop.f32.mrb[2].mxu0 }
  0xf7   :  { %147 = vst [vmem:[%s274_s4 + $0x8] sm:$0xff] %v142_v22  ;;  %v190_v23 = vpop.f32.mrb[3].mxu0 }

// kernel: densenet_forward.81
= control target key start
LH: loop header
LB: loop body
LE: loop exit
PB: predicated region body
PF: predicated region fallthrough
CT: control target
= control target key end

     0   :  { %s82_s0 = inlined_call_operand.vmem [shape: f32[16,128], index: 0, kind: input, shape index: {}]   ;;  %s83_s1 = inlined_call_operand.vmem [shape: f32[1,128], index: 1, kind: input, shape index: {}]   ;;  %s84_s2 = inlined_call_operand.vmem [shape: f32[1,128], index: 2, kind: input, shape index: {}]   ;;  %s85_s3 = inlined_call_operand.vmem [shape: f32[16,128], index: 3, kind: output, shape index: {}]  }
   0x1   :  { %v14_v0 = vld [vmem:[%s82_s0] sm:$0xff]  ;;  %v15_v4 = vld [vmem:[%s82_s0 + $0x8] sm:$0xff] }
   0x2   :  { %v42_v1 = vld [vmem:[%s83_s1] ss:$0 sm:$0xff] }
   0x3   :  { %v43_v2 = vld [vmem:[%s84_s2] ss:$0 sm:$0xff]  ;;  %v23_v3 = vmul.f32 %v42_v1, %v14_v0  ;;  %v24_v5 = vmul.f32 %v42_v1, %v15_v4 }
   0x5   :  { %v32_v6 = vadd.f32 %v43_v2, %v23_v3  ;;  %v33_v7 = vadd.f32 %v43_v2, %v24_v5 }
   0x7   :  { %v34_v8 = vmax.f32 %v32_v6, 0.0  ;;  %v35_v9 = vmax.f32 %v33_v7, 0.0 }
   0x9   :  { %36 = vst [vmem:[%s85_s3] sm:$0xff] %v34_v8  ;;  %37 = vst [vmem:[%s85_s3 + $0x8] sm:$0xff] %v35_v9 }

// kernel: densenet_forward.82
= control target key start
LH: loop header
LB: loop body
LE: loop exit
PB: predicated region body
PF: predicated region fallthrough
CT: control target
= control target key end

     0   :  { %s333_s1 = inlined_call_operand.vmem [shape: bf16[256,128], index: 1, kind: input, shape index: {}]   ;;  %s334_s0 = inlined_call_operand.vmem [shape: bf16[16,256], index: 0, kind: input, shape index: {}]   ;;  %s335_s2 = inlined_call_operand.vmem [shape: f32[16,128], index: 2, kind: output, shape index: {}]  }
   0x1   :  { %v239_v0 = vld [vmem:[%s333_s1 + $0x40] sm:$0xff]   ;;  %v241_v2 = vld [vmem:[%s333_s1 + $0x48] sm:$0xff]   ;;  %v243_v4 = vld [vmem:[%s333_s1 + $0x50] sm:$0xff]  }
   0x2   :  { %v240_v1 = vld [vmem:[%s333_s1] sm:$0xff]   ;;  %217 = vmatprep.subr.bf16.mxu0 %v239_v0  ;;  %v242_v3 = vld [vmem:[%s333_s1 + $0x8] sm:$0xff]   ;;  %v244_v5 = vld [vmem:[%s333_s1 + $0x10] sm:$0xff]  }
   0x3   :  { %218 = vmatpush3.bf16.msra.mxu0 %v240_v1  ;;  %v245_v6 = vld [vmem:[%s333_s1 + $0x58] sm:$0xff]   ;;  %v247_v8 = vld [vmem:[%s333_s1 + $0x60] sm:$0xff]   ;;  %v249_v10 = vld [vmem:[%s333_s1 + $0x68] sm:$0xff]  }
   0x4   :  { %219 = vmatprep.subr.bf16.mxu0 %v241_v2  ;;  %v246_v7 = vld [vmem:[%s333_s1 + $0x18] sm:$0xff]   ;;  %v248_v9 = vld [vmem:[%s333_s1 + $0x20] sm:$0xff]   ;;  %v250_v12 = vld [vmem:[%s333_s1 + $0x28] sm:$0xff]  }
   0x5   :  { %v257_v11 = vld [vmem:[%s334_s0 + $0x4] ss:$8 sps:$4 sm:$0xff]   ;;  %v251_v13 = vld [vmem:[%s333_s1 + $0x70] sm:$0xff]   ;;  %v253_v15 = vld [vmem:[%s333_s1 + $0x78] sm:$0xff]  }
   0x6   :  { %184 = vmatprep.mubr.bf16.mxu0 %v257_v11  ;;  %v252_v14 = vld [vmem:[%s333_s1 + $0x30] sm:$0xff]   ;;  %v254_v16 = vld [vmem:[%s333_s1 + $0x38] sm:$0xff]   ;;  %v255_v17 = vld [vmem:[%s334_s0] ss:$8 sps:$4 sm:$0xff]  }
   0x7   :  { %220 = vmatpush3.bf16.msra.mxu0 %v242_v3 }
   0x8   :  { %221 = vmatprep.subr.bf16.mxu0 %v243_v4 }
   0xb   :  { %222 = vmatpush3.bf16.msra.mxu0 %v244_v5 }
   0xc   :  { %223 = vmatprep.subr.bf16.mxu0 %v245_v6 }
   0xf   :  { %224 = vmatpush3.bf16.msra.mxu0 %v246_v7 }
  0x10   :  { %225 = vmatprep.subr.bf16.mxu0 %v247_v8 }
  0x13   :  { %226 = vmatpush3.bf16.msra.mxu0 %v248_v9 }
  0x14   :  { %227 = vmatprep.subr.bf16.mxu0 %v249_v10 }
  0x17   :  { %228 = vmatpush3.bf16.msra.mxu0 %v250_v12 }
  0x18   :  { %229 = vmatprep.subr.bf16.mxu0 %v251_v13 }
  0x1b   :  { %230 = vmatpush3.bf16.msra.mxu0 %v252_v14 }
  0x1c   :  { %231 = vmatprep.subr.bf16.mxu0 %v253_v15 }
  0x1f   :  { %232 = vmatpush3.bf16.msra.mxu0 %v254_v16 }
  0x22   :  { %185 = vmatmul.mubr.bf16.vlgmr.msra.gmra.mrb[0].mxu0 %v255_v17 }
  0xf5   :  { %v233_v18 = vpop.f32.mrb[0].mxu0 }
  0xf6   :  { %v234_v19 = vpop.f32.mrb[1].mxu0 }
  0xf7   :  { %v235_v20 = vadd.f32 %v234_v19, %v233_v18  ;;  %v236_v21 = vpop.f32.mrb[2].mxu0 }
  0xf8   :  { %v237_v22 = vpop.f32.mrb[3].mxu0 }
  0xf9   :  { %193 = vst [vmem:[%s335_s2] sm:$0xff] %v235_v20  ;;  %v238_v23 = vadd.f32 %v237_v22, %v236_v21 }
  0xfb   :  { %194 = vst [vmem:[%s335_s2 + $0x8] sm:$0xff] %v238_v23 }

// kernel: densenet_forward.90
= control target key start
LH: loop header
LB: loop body
LE: loop exit
PB: predicated region body
PF: predicated region fallthrough
CT: control target
= control target key end

     0   :  { %v76_v0 = vmov 0.0   ;;  %s120_s0 = inlined_call_operand.vmem [shape: f32[16,128], index: 0, kind: input, shape index: {}]   ;;  %s121_s1 = inlined_call_operand.vmem [shape: f32[1,128], index: 1, kind: input, shape index: {}]   ;;  %s122_s2 = inlined_call_operand.vmem [shape: f32[1,128], index: 2, kind: input, shape index: {}]   ;;  %s123_s3 = inlined_call_operand.vmem [shape: f32[1,128], index: 3, kind: output, shape index: {0}]   ;;  %s124_s4 = inlined_call_operand.vmem [shape: f32[1,128], index: 4, kind: output, shape index: {1}]  }
   0x1   :  { %20 = vst [vmem:[#allocation2] sm:$0x1] %v76_v0  ;;  %21 = vst [vmem:[#allocation3] sm:$0x1] %v76_v0  ;;  %v22_v1 = vld [vmem:[%s120_s0] sm:$0xff]  ;;  %v23_v2 = vld [vmem:[%s120_s0 + $0x8] sm:$0xff] }
   0x2   :  { %v25_v3 = vadd.f32 %v23_v2, %v22_v1  ;;  %v35_v4 = vmul.f32 %v22_v1, %v22_v1  ;;  %v36_v5 = vmul.f32 %v23_v2, %v23_v2  ;;  %v56_v31 = vld [vmem:[%s121_s1] sm:$0x1] }
   0x3   :  { %v61_v34 = vld [vmem:[%s122_s2] sm:$0x1] }
   0x4   :  { %v26_v6 = vrot.slane %v25_v3, 4  ;;  %v37_v7 = vadd.f32 %v36_v5, %v35_v4 }
   0x6   :  { %v27_v8 = vadd.f32 %v26_v6, %v25_v3  ;;  %v38_v9 = vrot.slane %v37_v7, 4 }
   0x8   :  { %v28_v10 = vrot.slane %v27_v8, 2  ;;  %v39_v11 = vadd.f32 %v38_v9, %v37_v7  ;;  %v24_v16 = vld [vmem:[#allocation2] sm:$0x1]  ;;  %v34_v19 = vld [vmem:[#allocation3] sm:$0x1] }
   0xa   :  { %v29_v12 = vadd.f32 %v28_v10, %v27_v8  ;;  %v40_v13 = vrot.slane %v39_v11, 2 }
   0xc   :  { %v30_v14 = vrot.slane %v29_v12, 1  ;;  %v41_v15 = vadd.f32 %v40_v13, %v39_v11 }
   0xe   :  { %v31_v17 = vadd.f32 %v30_v14, %v29_v12  ;;  %v42_v18 = vrot.slane %v41_v15, 1 }
  0x10   :  { %v32_v20 = vadd.f32 %v31_v17, %v24_v16  ;;  %v43_v21 = vadd.f32 %v42_v18, %v41_v15 }
  0x12   :  { %33 = vst [vmem:[#allocation2] sm:$0x1] %v32_v20  ;;  %v44_v22 = vadd.f32 %v43_v21, %v34_v19 }
  0x14   :  { %45 = vst [vmem:[#allocation3] sm:$0x1] %v44_v22 }
  0x19   :  { %v49_v23 = vld [vmem:[#allocation2] sm:$0x1] }
  0x1a   :  { %v50_v24 = vmul.f32 0.5, %v49_v23 }
  0x1b   :  { %v51_v25 = vld [vmem:[#allocation3] sm:$0x1] }
  0x1c   :  { %v52_v26 = vmul.f32 0.5, %v51_v25  ;;  %v53_v27 = vmul.f32 %v50_v24, %v50_v24 }
  0x1e   :  { %v54_v28 = vsub.f32 %v52_v26, %v53_v27 }
  0x20   :  { %v55_v29 = vmax.f32 %v54_v28, 0.0 }
  0x22   :  { %v57_v30 = vadd.f32 1e-05, %v55_v29 }
  0x24   :  { %74 = vrsqrt.f32 %v57_v30 }
  0x2e   :  { %v75_v32 = vpop.eup %74 }
  0x2f   :  { %v59_v33 = vmul.f32 %v75_v32, %v56_v31 }
  0x31   :  { %60 = vst [vmem:[%s123_s3] sm:$0x1] %v59_v33  ;;  %v62_v35 = vmul.f32 %v59_v33, %v50_v24 }
  0x33   :  { %v63_v36 = vsub.f32 %v61_v34, %v62_v35 }
  0x35   :  { %64 = vst [vmem:[%s124_s4] sm:$0x1] %v63_v36 }

// kernel: densenet_forward.101
= control target key start
LH: loop header
LB: loop body
LE: loop exit
PB: predicated region body
PF: predicated region fallthrough
CT: control target
= control target key end

     0   :  { %v332_v0 = vmov 0.0   ;;  %vm333_vm0 = vmmov 0   ;;  %v67_v3 = vlaneseq  ;;  %vm173_vm2 = vcmask 1041409   ;;  %s443_s3 = inlined_call_operand.vmem [shape: bf16[128,128], index: 3, kind: input, shape index: {}]   ;;  %s444_s0 = inlined_call_operand.vmem [shape: f32[8,8,128], index: 0, kind: input, shape index: {}]   ;;  %s445_s1 = inlined_call_operand.vmem [shape: f32[1,128], index: 1, kind: input, shape index: {}]   ;;  %s446_s2 = inlined_call_operand.vmem [shape: f32[1,128], index: 2, kind: input, shape index: {}]   ;;  %s447_s4 = inlined_call_operand.vmem [shape: f32[1,128], index: 4, kind: input, shape index: {}]   ;;  %s448_s5 = inlined_call_operand.vmem [shape: f32[8,128], index: 5, kind: output, shape index: {}]  }
   0x1   :  { %302 = vmatprep.subr.bf16.mxu0 %v332_v0  ;;  %v324_v1 = vld [vmem:[%s443_s3] sm:$0xff]   ;;  %318 = vmatprep.mubr.msk.bf16.mxu0 %vm333_vm0, %v332_v0  ;;  %v325_v2 = vld [vmem:[%s443_s3 + $0x8] sm:$0xff]   ;;  %v326_v4 = vld [vmem:[%s443_s3 + $0x10] sm:$0xff]   ;;  %vm175_vm3 = vcmask 1042434   ;;  %vm177_vm4 = vcmask 1043459   ;;  %vm179_vm5 = vcmask 1044484  }
   0x2   :  { %303 = vmatpush3.bf16.msra.mxu0 %v324_v1  ;;  %v68_v5 = vshrl.u32 %v67_v3, 7  ;;  %v327_v6 = vld [vmem:[%s443_s3 + $0x18] sm:$0xff]   ;;  %v21_v7 = vld [vmem:[%s444_s0] sm:$0xff]  ;;  %v22_v8 = vld [vmem:[%s444_s0 + $0x8] sm:$0xff]  ;;  %vm181_vm6 = vcmask 1045509   ;;  %vm183_vm7 = vcmask 1046534  }
   0x3   :  { %304 = vmatprep.subr.bf16.mxu0 %v332_v0  ;;  %v23_v9 = vld [vmem:[%s444_s0 + $0x10] sm:$0xff]  ;;  %v24_v10 = vld [vmem:[%s444_s0 + $0x18] sm:$0xff]  ;;  %v25_v11 = vld [vmem:[%s444_s0 + $0x20] sm:$0xff]  ;;  %vm185_vm8 = vcmask 1047559  }
   0x4   :  { %v26_v12 = vld [vmem:[%s444_s0 + $0x28] sm:$0xff]  ;;  %v27_v13 = vld [vmem:[%s444_s0 + $0x30] sm:$0xff]  ;;  %v28_v14 = vld [vmem:[%s444_s0 + $0x38] sm:$0xff]  ;;  %vm69_vm1 = vcmp.lt.s32.totalorder %v68_v5, 1 }
   0x5   :  { %v282_v15 = vld [vmem:[%s445_s1] ss:$0 sm:$0xff]  ;;  %v329_v46 = vld [vmem:[%s443_s3 + $0x28] sm:$0xff]   ;;  %v330_v63 = vld [vmem:[%s443_s3 + $0x30] sm:$0xff]  }
   0x6   :  { %305 = vmatpush3.bf16.msra.mxu0 %v325_v2  ;;  %v36_v16 = vmul.f32 %v282_v15, %v21_v7  ;;  %v37_v17 = vmul.f32 %v282_v15, %v22_v8  ;;  %v38_v18 = vmul.f32 %v282_v15, %v23_v9  ;;  %v39_v19 = vmul.f32 %v282_v15, %v24_v10  ;;  %v283_v20 = vld [vmem:[%s446_s2] ss:$0 sm:$0xff] }
   0x7   :  { %306 = vmatprep.subr.bf16.mxu0 %v332_v0  ;;  %v40_v21 = vmul.f32 %v282_v15, %v25_v11  ;;  %v41_v22 = vmul.f32 %v282_v15, %v26_v12  ;;  %v42_v23 = vmul.f32 %v282_v15, %v27_v13  ;;  %v43_v24 = vmul.f32 %v282_v15, %v28_v14  ;;  %v328_v29 = vld [vmem:[%s443_s3 + $0x20] sm:$0xff]  }
   0x8   :  { %v51_v25 = vadd.f32 %v283_v20, %v36_v16  ;;  %v52_v26 = vadd.f32 %v283_v20, %v37_v17  ;;  %v53_v27 = vadd.f32 %v283_v20, %v38_v18  ;;  %v54_v28 = vadd.f32 %v283_v20, %v39_v19  ;;  %v331_v17 = vld [vmem:[%s443_s3 + $0x38] sm:$0xff]  }
   0x9   :  { %v55_v30 = vadd.f32 %v283_v20, %v40_v21  ;;  %v56_v31 = vadd.f32 %v283_v20, %v41_v22  ;;  %v57_v32 = vadd.f32 %v283_v20, %v42_v23  ;;  %v58_v33 = vadd.f32 %v283_v20, %v43_v24 }
   0xa   :  { %307 = vmatpush3.bf16.msra.mxu0 %v326_v4  ;;  %v59_v34 = vmax.f32 %v51_v25, 0.0  ;;  %v60_v35 = vmax.f32 %v52_v26, 0.0  ;;  %v61_v36 = vmax.f32 %v53_v27, 0.0  ;;  %v62_v37 = vmax.f32 %v54_v28, 0.0 }
   0xb   :  { %308 = vmatprep.subr.bf16.mxu0 %v332_v0  ;;  %v63_v38 = vmax.f32 %v55_v30, 0.0  ;;  %v64_v39 = vmax.f32 %v56_v31, 0.0  ;;  %v65_v40 = vmax.f32 %v57_v32, 0.0  ;;  %v66_v41 = vmax.f32 %v58_v33, 0.0 }
   0xc   :  { %v70_v42 = vsel %vm69_vm1, %v59_v34, 0.0  ;;  %v71_v43 = vsel %vm69_vm1, %v60_v35, 0.0  ;;  %v72_v44 = vsel %vm69_vm1, %v61_v36, 0.0  ;;  %v73_v45 = vsel %vm69_vm1, %v62_v37, 0.0 }
   0xd   :  { %v74_v47 = vsel %vm69_vm1, %v63_v38, 0.0  ;;  %v75_v48 = vsel %vm69_vm1, %v64_v39, 0.0  ;;  %v76_v49 = vsel %vm69_vm1, %v65_v40, 0.0  ;;  %v77_v50 = vsel %vm69_vm1, %v66_v41, 0.0 }
   0xe   :  { %309 = vmatpush3.bf16.msra.mxu0 %v327_v6  ;;  %v78_v51 = vrot.slane %v70_v42, 4  ;;  %v84_v52 = vrot.slane %v71_v43, 4  ;;  %v90_v53 = vrot.slane %v72_v44, 4  ;;  %v96_v54 = vrot.slane %v73_v45, 4 }
   0xf   :  { %310 = vmatprep.subr.bf16.mxu0 %v332_v0  ;;  %v102_v55 = vrot.slane %v74_v47, 4  ;;  %v108_v56 = vrot.slane %v75_v48, 4  ;;  %v114_v57 = vrot.slane %v76_v49, 4  ;;  %v120_v58 = vrot.slane %v77_v50, 4 }
  0x10   :  { %v79_v59 = vadd.f32 %v78_v51, %v70_v42  ;;  %v85_v60 = vadd.f32 %v84_v52, %v71_v43  ;;  %v91_v61 = vadd.f32 %v90_v53, %v72_v44  ;;  %v97_v62 = vadd.f32 %v96_v54, %v73_v45 }
  0x11   :  { %v103_v1 = vadd.f32 %v102_v55, %v74_v47  ;;  %v109_v2 = vadd.f32 %v108_v56, %v75_v48  ;;  %v115_v3 = vadd.f32 %v114_v57, %v76_v49  ;;  %v121_v4 = vadd.f32 %v120_v58, %v77_v50 }
  0x12   :  { %311 = vmatpush3.bf16.msra.mxu0 %v328_v29  ;;  %v80_v5 = vrot.slane %v79_v59, 2  ;;  %v86_v6 = vrot.slane %v85_v60, 2  ;;  %v92_v7 = vrot.slane %v91_v61, 2  ;;  %v98_v8 = vrot.slane %v97_v62, 2 }
  0x13   :  { %312 = vmatprep.subr.bf16.mxu0 %v332_v0  ;;  %v104_v9 = vrot.slane %v103_v1, 2  ;;  %v110_v10 = vrot.slane %v109_v2, 2  ;;  %v116_v11 = vrot.slane %v115_v3, 2  ;;  %v122_v12 = vrot.slane %v121_v4, 2 }
  0x14   :  { %v81_v13 = vadd.f32 %v80_v5, %v79_v59  ;;  %v87_v14 = vadd.f32 %v86_v6, %v85_v60  ;;  %v93_v15 = vadd.f32 %v92_v7, %v91_v61  ;;  %v99_v16 = vadd.f32 %v98_v8, %v97_v62  ;;  %v284_v61 = vld [vmem:[%s447_s4] ss:$0 sm:$0xff] }
  0x15   :  { %v105_v18 = vadd.f32 %v104_v9, %v103_v1  ;;  %v111_v19 = vadd.f32 %v110_v10, %v109_v2  ;;  %v117_v20 = vadd.f32 %v116_v11, %v115_v3  ;;  %v123_v21 = vadd.f32 %v122_v12, %v121_v4 }
  0x16   :  { %313 = vmatpush3.bf16.msra.mxu0 %v329_v46  ;;  %v82_v22 = vrot.slane %v81_v13, 1  ;;  %v88_v23 = vrot.slane %v87_v14, 1  ;;  %v94_v24 = vrot.slane %v93_v15, 1  ;;  %v100_v25 = vrot.slane %v99_v16, 1 }
  0x17   :  { %314 = vmatprep.subr.bf16.mxu0 %v332_v0  ;;  %v106_v26 = vrot.slane %v105_v18, 1  ;;  %v112_v27 = vrot.slane %v111_v19, 1  ;;  %v118_v28 = vrot.slane %v117_v20, 1  ;;  %v124_v29 = vrot.slane %v123_v21, 1 }
  0x18   :  { %v83_v30 = vadd.f32 %v82_v22, %v81_v13  ;;  %v89_v31 = vadd.f32 %v88_v23, %v87_v14  ;;  %v95_v32 = vadd.f32 %v94_v24, %v93_v15  ;;  %v101_v33 = vadd.f32 %v100_v25, %v99_v16 }
  0x19   :  { %v107_v34 = vadd.f32 %v106_v26, %v105_v18  ;;  %v113_v35 = vadd.f32 %v112_v27, %v111_v19  ;;  %v119_v36 = vadd.f32 %v118_v28, %v117_v20  ;;  %v125_v37 = vadd.f32 %v124_v29, %v123_v21 }
  0x1a   :  { %315 = vmatpush3.bf16.msra.mxu0 %v330_v63  ;;  %v126_v38 = vpack.c.bf16 %v83_v30, %v83_v30  ;;  %v127_v39 = vpack.c.bf16 %v89_v31, %v89_v31  ;;  %v129_v40 = vpack.c.bf16 %v101_v33, %v101_v33 }
  0x1b   :  { %316 = vmatprep.subr.bf16.mxu0 %v332_v0  ;;  %v128_v0 = vpack.c.bf16 %v95_v32, %v95_v32  ;;  %v130_v41 = vpack.c.bf16 %v107_v34, %v107_v34  ;;  %v131_v42 = vpack.c.bf16 %v113_v35, %v113_v35  ;;  %v132_v43 = vpack.c.bf16 %v119_v36, %v119_v36 }
  0x1c   :  { %v133_v44 = vpack.c.bf16 %v125_v37, %v125_v37  ;;  %v165_v45 = vunpack.c.l.b16 %v126_v38  ;;  %v166_v46 = vunpack.c.l.b16 %v127_v39  ;;  %v168_v48 = vunpack.c.l.b16 %v129_v40 }
  0x1d   :  { %v167_v47 = vunpack.c.l.b16 %v128_v0  ;;  %v169_v49 = vunpack.c.l.b16 %v130_v41  ;;  %v170_v50 = vunpack.c.l.b16 %v131_v42  ;;  %v171_v52 = vunpack.c.l.b16 %v132_v43 }
  0x1e   :  { %317 = vmatpush3.bf16.msra.mxu0 %v331_v17  ;;  %v174_v51 = vsel %vm173_vm2, %v166_v46, %v165_v45  ;;  %v172_v54 = vunpack.c.l.b16 %v133_v44 }
  0x1f   :  { %v176_v53 = vsel %vm175_vm3, %v167_v47, %v174_v51 }
  0x20   :  { %v178_v55 = vsel %vm177_vm4, %v168_v48, %v176_v53 }
  0x21   :  { %v180_v56 = vsel %vm179_vm5, %v169_v49, %v178_v55 }
  0x22   :  { %v182_v57 = vsel %vm181_vm6, %v170_v50, %v180_v56 }
  0x23   :  { %v184_v58 = vsel %vm183_vm7, %v171_v52, %v182_v57 }
  0x24   :  { %v186_v59 = vsel %vm185_vm8, %v172_v54, %v184_v58 }
  0x25   :  { %v187_v60 = vpack.c.b16 %v186_v59, %v186_v59 }
  0x27   :  { %319 = vmatmul.mubr.bf16.vlgmr.msra.gmra.mrb[0].mxu0 %v187_v60 }
  0xfa   :  { %v271_v62 = vpop.f32.mrb[0].mxu0 }
  0xfb   :  { %v272_v63 = vadd.f32 %v284_v61, %v271_v62  ;;  %v320_v1 = vpop.f32.mrb[1].mxu0 }
  0xfc   :  { %v274_v2 = vpop.f32.mrb[2].mxu0 }
  0xfd   :  { %277 = vst [vmem:[%s448_s5] sm:$0xff] %v272_v63  ;;  %v321_v3 = vpop.f32.mrb[3].mxu0 }

</bundles_post_ra>
